<compile_context>
chip_gen: v7x
topology: tpu7x:2x2x1
jax: 0.10.0
libtpu: 0.0.40
codegen_flags: <defaults>
</compile_context>

<pallas_src>
import jax
import jax.numpy as jnp
from jax import lax
from jax.experimental import pallas as pl
from jax.experimental.pallas import tpu as pltpu


# --------------------------- fused BiLSTM kernel -----------------------------

def _make_bilstm_kernel(T, Bp, H, L):
    G = 4 * H  # gates per direction (i|f|g|o)

    def lstm_cell(gates, c_prev):
        # gates: (Bp, 4H), PyTorch order i|f|g|o along lanes.
        # Full-width EUP passes, then slice (cheaper than 4 narrow EUP calls).
        sg = jax.nn.sigmoid(gates)
        th = jnp.tanh(gates)
        i = sg[:, 0 * H:1 * H]
        f = sg[:, 1 * H:2 * H]
        o = sg[:, 3 * H:4 * H]
        g = th[:, 2 * H:3 * H]
        c = f * c_prev + i * g
        h = o * jnp.tanh(c)
        return h, c

    def kernel(*refs):
        # refs = [x2] + L * [w_ih_cat, b_cat, w_hh_blk] + [w_fin, b_fin]
        #        + [logit_out] + [pre_scratch, hf_scratch, hb_scratch]
        x_ref = refs[0]
        layer_refs = [refs[1 + 3 * l: 1 + 3 * (l + 1)] for l in range(L)]
        wfin_ref, bfin_ref = refs[1 + 3 * L], refs[2 + 3 * L]
        logit_ref = refs[3 + 3 * L]
        pre_ref, hf_ref, hb_ref = refs[4 + 3 * L], refs[5 + 3 * L], refs[6 + 3 * L]

        hmax_f = None
        hmax_b = None

        for l, (wih_ref, b_ref, whh_ref) in enumerate(layer_refs):
            last = (l == L - 1)
            bias = b_ref[...]                                   # (1, 8H)

            # ---- input projection for all T steps, both directions, as one
            #      batched matmul, spilled to VMEM scratch (off the serial
            #      dependence chain; bounds vreg pressure in the T loop) ------
            if l == 0:
                pre_ref[...] = jnp.dot(
                    x_ref[...], wih_ref[...],
                    preferred_element_type=jnp.float32) + bias
            else:
                # Previous layer's output is kept as two VMEM buffers
                # (fwd half / bwd half); split W_ih by rows instead of
                # concatenating the activations.
                pre_ref[...] = (
                    jnp.dot(hf_ref[...], wih_ref[0:H, :],
                            preferred_element_type=jnp.float32)
                    + jnp.dot(hb_ref[...], wih_ref[H:2 * H, :],
                              preferred_element_type=jnp.float32)
                    + bias)                                     # (T*Bp, 8H)

            whh_blk = whh_ref[...]                              # (2H, 8H) block-diag

            h_cat = jnp.zeros((Bp, 2 * H), jnp.float32)         # [h_f | h_b]
            c_f = jnp.zeros((Bp, H), jnp.float32)
            c_b = jnp.zeros((Bp, H), jnp.float32)

            # ---- serial recurrence: fwd step t and bwd step T-1-t together,
            #      ONE block-diagonal matmul per iteration.  Static Python
            #      unroll (T is tiny) -> all indices/slices static & aligned.
            for t in range(T):
                tb = T - 1 - t
                rf = t * Bp
                rb = tb * Bp
                gates_hh = jnp.dot(h_cat, whh_blk,
                                   preferred_element_type=jnp.float32)  # (Bp, 8H)
                gates_f = pre_ref[rf:rf + Bp, 0:G] + gates_hh[:, 0:G]
                gates_b = pre_ref[rb:rb + Bp, G:2 * G] + gates_hh[:, G:2 * G]
                h_f, c_f = lstm_cell(gates_f, c_f)
                h_b, c_b = lstm_cell(gates_b, c_b)
                h_cat = jnp.concatenate([h_f, h_b], axis=1)
                if not last:
                    # Store (by time position) for the next layer's projection.
                    hf_ref[rf:rf + Bp, :] = h_f
                    hb_ref[rb:rb + Bp, :] = h_b
                else:
                    # Fold max-over-time directly into the last layer's loop.
                    hmax_f = h_f if hmax_f is None else jnp.maximum(hmax_f, h_f)
                    hmax_b = h_b if hmax_b is None else jnp.maximum(hmax_b, h_b)

        # ---- head: Linear(2H -> 2) on the max-pooled features ---------------
        logit_ref[...] = (
            jnp.dot(hmax_f, wfin_ref[0:H, :], preferred_element_type=jnp.float32)
            + jnp.dot(hmax_b, wfin_ref[H:2 * H, :],
                      preferred_element_type=jnp.float32)
            + bfin_ref[...])                                    # (Bp, 2)

    return kernel


# ------------------------------ model wrapper --------------------------------

class Config:
    def __init__(self, embedding_size, hidden_size, num_hidden_layers,
                 hidden_dropout_prob):
        self.embedding_size = embedding_size
        self.hidden_size = hidden_size
        self.num_hidden_layers = num_hidden_layers
        self.hidden_dropout_prob = hidden_dropout_prob


def init_params(key, config):
    """Deterministic synthetic init matching the PyTorch parameter shapes."""
    H = config.hidden_size
    E = config.embedding_size
    L = config.num_hidden_layers
    k = 1.0 / jnp.sqrt(H)

    layers = []
    for l in range(L):
        d_in = E if l == 0 else 2 * H
        layer = {}
        for name in ("fwd", "bwd"):
            key, k1, k2, k3, k4 = jax.random.split(key, 5)
            w_ih = jax.random.uniform(k1, (d_in, 4 * H), jnp.float32, -k, k)
            w_hh = jax.random.uniform(k2, (H, 4 * H), jnp.float32, -k, k)
            b_ih = jax.random.uniform(k3, (4 * H,), jnp.float32, -k, k)
            b_hh = jax.random.uniform(k4, (4 * H,), jnp.float32, -k, k)
            layer[name] = {"w_ih": w_ih, "w_hh": w_hh,
                           "b": (b_ih + b_hh).reshape(1, 4 * H)}
        layers.append(layer)

    kf = 1.0 / jnp.sqrt(2 * H)
    key, k1, k2 = jax.random.split(key, 3)
    w_final = jax.random.uniform(k1, (2 * H, 2), jnp.float32, -kf, kf)
    b_final = jax.random.uniform(k2, (1, 2), jnp.float32, -kf, kf)
    return {"layers": layers, "w_final": w_final, "b_final": b_final}


def bilstm_forward(params, x):
    """x: (B, T, E) batch_first, like the PyTorch module (eval mode)."""
    B, T, E = x.shape
    layers = params["layers"]
    L = len(layers)
    H = layers[0]["fwd"]["w_hh"].shape[0]
    G = 4 * H

    # Pad batch to one sublane tile so every per-step slice is (8, ...) aligned.
    Bp = max(8, ((B + 7) // 8) * 8)

    # Time-major, batch-padded, flattened to 2D (row index = t*Bp + b) so each
    # layer's input projection is a single (T*Bp, D_in) @ (D_in, 8H) matmul.
    x_tm = jnp.transpose(x, (1, 0, 2)).astype(jnp.float32)       # (T, B, E)
    x_tm = jnp.pad(x_tm, ((0, 0), (0, Bp - B), (0, 0)))          # (T, Bp, E)
    x2 = x_tm.reshape(T * Bp, E)

    inputs = [x2]
    in_specs = [pl.BlockSpec((T * Bp, E), lambda i: (0, 0))]
    for l, layer in enumerate(layers):
        d_in = E if l == 0 else 2 * H
        w_ih_cat = jnp.concatenate(
            [layer["fwd"]["w_ih"], layer["bwd"]["w_ih"]], axis=1)   # (D_in, 8H)
        b_cat = jnp.concatenate(
            [layer["fwd"]["b"], layer["bwd"]["b"]], axis=1)         # (1, 8H)
        # Block-diagonal W_hh so one (Bp,2H)@(2H,8H) matmul serves both
        # directions per recurrence step.
        whh_blk = jnp.zeros((2 * H, 2 * G), jnp.float32)
        whh_blk = whh_blk.at[0:H, 0:G].set(layer["fwd"]["w_hh"])
        whh_blk = whh_blk.at[H:2 * H, G:2 * G].set(layer["bwd"]["w_hh"])
        inputs += [w_ih_cat, b_cat, whh_blk]
        in_specs += [
            pl.BlockSpec((d_in, 2 * G), lambda i: (0, 0)),
            pl.BlockSpec((1, 2 * G), lambda i: (0, 0)),
            pl.BlockSpec((2 * H, 2 * G), lambda i: (0, 0)),
        ]
    inputs += [params["w_final"], params["b_final"]]
    in_specs += [pl.BlockSpec((2 * H, 2), lambda i: (0, 0)),
                 pl.BlockSpec((1, 2), lambda i: (0, 0))]

    kernel = _make_bilstm_kernel(T, Bp, H, L)

    logit_p = pl.pallas_call(
        kernel,
        out_shape=jax.ShapeDtypeStruct((Bp, 2), jnp.float32),
        grid_spec=pltpu.PrefetchScalarGridSpec(
            num_scalar_prefetch=0,
            grid=(1,),                       # everything fused in one step
            in_specs=in_specs,
            out_specs=pl.BlockSpec((Bp, 2), lambda i: (0, 0)),
            scratch_shapes=[
                pltpu.VMEM((T * Bp, 2 * G), jnp.float32),  # staged input-proj gates
                pltpu.VMEM((T * Bp, H), jnp.float32),      # inter-layer h (fwd)
                pltpu.VMEM((T * Bp, H), jnp.float32),      # inter-layer h (bwd)
            ],
        ),
        compiler_params=pltpu.CompilerParams(
            dimension_semantics=("arbitrary",)),
    )(*inputs)

    logit = logit_p[:B]                       # drop batch padding
    prob = jax.nn.sigmoid(logit)              # tiny (B,2) sigmoid in XLA
    return {"lc": (logit[:, 0], prob[:, 0]),
            "rc": (logit[:, 1], prob[:, 1])}


# ------------------------------ pure-JAX reference ---------------------------

def _lstm_direction_ref(x_tm, w_ih, w_hh, b):
    T, B, D = x_tm.shape
    H = w_hh.shape[0]

    def step(carry, x_t):
        h, c = carry
        gates = x_t @ w_ih + h @ w_hh + b
        i = jax.nn.sigmoid(gates[:, :H])
        f = jax.nn.sigmoid(gates[:, H:2 * H])
        g = jnp.tanh(gates[:, 2 * H:3 * H])
        o = jax.nn.sigmoid(gates[:, 3 * H:])
        c = f * c + i * g
        h = o * jnp.tanh(c)
        return (h, c), h

    init = (jnp.zeros((B, H), jnp.float32), jnp.zeros((B, H), jnp.float32))
    _, hs = lax.scan(step, init, x_tm)
    return hs


def bilstm_forward_ref(params, x):
    h = jnp.transpose(x, (1, 0, 2)).astype(jnp.float32)
    for layer in params["layers"]:
        h_f = _lstm_direction_ref(h, layer["fwd"]["w_ih"],
                                  layer["fwd"]["w_hh"], layer["fwd"]["b"])
        h_b = _lstm_direction_ref(h[::-1], layer["bwd"]["w_ih"],
                                  layer["bwd"]["w_hh"], layer["bwd"]["b"])[::-1]
        h = jnp.concatenate([h_f, h_b], axis=-1)
    hmax = jnp.max(h, axis=0)
    logit = hmax @ params["w_final"] + params["b_final"]
    prob = jax.nn.sigmoid(logit)
    return logit, prob


# ------------------------------------ main ------------------------------------

if __name__ == "__main__":
    config = Config(embedding_size=16, hidden_size=32, num_hidden_layers=2,
                    hidden_dropout_prob=0.1)
    B, T = 2, 8

    key = jax.random.PRNGKey(0)
    key, pkey, xkey = jax.random.split(key, 3)
    params = init_params(pkey, config)
    x = jax.random.normal(xkey, (B, T, config.embedding_size), jnp.float32)

    out = jax.jit(bilstm_forward)(params, x)
    jax.block_until_ready(out)

    # Numerical check against a pure-JAX reference.
    logit_ref, prob_ref = bilstm_forward_ref(params, x)
    logit = jnp.stack([out["lc"][0], out["rc"][0]], axis=-1)
    prob = jnp.stack([out["lc"][1], out["rc"][1]], axis=-1)
    assert jnp.allclose(logit, logit_ref, atol=5e-5, rtol=5e-5), "logit mismatch"
    assert jnp.allclose(prob, prob_ref, atol=5e-5, rtol=5e-5), "prob mismatch"

    print("KERNEL_OK")
</pallas_src>

<mosaic_0001>
module attributes {stable_mosaic.version = 11 : i64} {
  func.func @kernel(%arg0: i32, %arg1: memref<64x16xf32, #tpu.memory_space<vmem>>, %arg2: memref<16x256xf32, #tpu.memory_space<vmem>>, %arg3: memref<1x256xf32, #tpu.memory_space<vmem>>, %arg4: memref<64x256xf32, #tpu.memory_space<vmem>>, %arg5: memref<64x256xf32, #tpu.memory_space<vmem>>, %arg6: memref<1x256xf32, #tpu.memory_space<vmem>>, %arg7: memref<64x256xf32, #tpu.memory_space<vmem>>, %arg8: memref<64x2xf32, #tpu.memory_space<vmem>>, %arg9: memref<1x2xf32, #tpu.memory_space<vmem>>, %arg10: memref<8x2xf32, #tpu.memory_space<vmem>>, %arg11: memref<64x256xf32, #tpu.memory_space<vmem>>, %arg12: memref<64x32xf32, #tpu.memory_space<vmem>>, %arg13: memref<64x32xf32, #tpu.memory_space<vmem>>) attributes {dimension_semantics = [#tpu.dimension_semantics<arbitrary>], iteration_bounds = array<i64: 1>, scalar_prefetch = 0 : i64, scratch_operands = 3 : i64, tpu.core_type = #tpu.core_type<tc>, window_params = [{pipeline_mode = #tpu.pipeline_mode<synchronous>, transform_indices = @transform_0, window_bounds = array<i64: 64, 16>}, {pipeline_mode = #tpu.pipeline_mode<synchronous>, transform_indices = @transform_1, window_bounds = array<i64: 16, 256>}, {pipeline_mode = #tpu.pipeline_mode<synchronous>, transform_indices = @transform_2, window_bounds = array<i64: 1, 256>}, {pipeline_mode = #tpu.pipeline_mode<synchronous>, transform_indices = @transform_3, window_bounds = array<i64: 64, 256>}, {pipeline_mode = #tpu.pipeline_mode<synchronous>, transform_indices = @transform_4, window_bounds = array<i64: 64, 256>}, {pipeline_mode = #tpu.pipeline_mode<synchronous>, transform_indices = @transform_5, window_bounds = array<i64: 1, 256>}, {pipeline_mode = #tpu.pipeline_mode<synchronous>, transform_indices = @transform_6, window_bounds = array<i64: 64, 256>}, {pipeline_mode = #tpu.pipeline_mode<synchronous>, transform_indices = @transform_7, window_bounds = array<i64: 64, 2>}, {pipeline_mode = #tpu.pipeline_mode<synchronous>, transform_indices = @transform_8, window_bounds = array<i64: 1, 2>}, {pipeline_mode = #tpu.pipeline_mode<synchronous>, transform_indices = @transform_9, window_bounds = array<i64: 8, 2>}]} {
    %c0 = arith.constant 0 : index
    %c0_0 = arith.constant 0 : index
    %0 = vector.load %arg3[%c0, %c0_0] : memref<1x256xf32, #tpu.memory_space<vmem>>, vector<1x256xf32>
    %c0_1 = arith.constant 0 : index
    %c0_2 = arith.constant 0 : index
    %1 = vector.load %arg1[%c0_1, %c0_2] : memref<64x16xf32, #tpu.memory_space<vmem>>, vector<64x16xf32>
    %c0_3 = arith.constant 0 : index
    %c0_4 = arith.constant 0 : index
    %2 = vector.load %arg2[%c0_3, %c0_4] : memref<16x256xf32, #tpu.memory_space<vmem>>, vector<16x256xf32>
    %cst = arith.constant dense<0.000000e+00> : vector<64x256xf32>
    %3 = tpu.matmul %1, %2, %cst {dimension_numbers = #tpu.dot_dimension_numbers<[1], [0], [0], [1], [0, 0, 1, 1], [], []>} : vector<64x16xf32>, vector<16x256xf32>, vector<64x256xf32> -> vector<64x256xf32>
    %4 = vector.broadcast %0 : vector<1x256xf32> to vector<64x256xf32>
    %5 = arith.addf %3, %4 : vector<64x256xf32>
    %c0_5 = arith.constant 0 : index
    %c0_6 = arith.constant 0 : index
    %6 = vector.load %arg11[%c0_5, %c0_6] : memref<64x256xf32, #tpu.memory_space<vmem>>, vector<64x256xf32>
    tpu.vector_store %arg11[%c0_5, %c0_6], %5 {strides = array<i32>} : memref<64x256xf32, #tpu.memory_space<vmem>>, vector<64x256xf32>,
    %c0_7 = arith.constant 0 : index
    %c0_8 = arith.constant 0 : index
    %7 = vector.load %arg4[%c0_7, %c0_8] : memref<64x256xf32, #tpu.memory_space<vmem>>, vector<64x256xf32>
    %cst_9 = arith.constant 0.000000e+00 : f32
    %8 = vector.broadcast %cst_9 : f32 to vector<8x64xf32>
    %cst_10 = arith.constant 0.000000e+00 : f32
    %9 = vector.broadcast %cst_10 : f32 to vector<8x32xf32>
    %cst_11 = arith.constant 0.000000e+00 : f32
    %10 = vector.broadcast %cst_11 : f32 to vector<8x32xf32>
    %cst_12 = arith.constant dense<0.000000e+00> : vector<8x256xf32>
    %11 = tpu.matmul %8, %7, %cst_12 {dimension_numbers = #tpu.dot_dimension_numbers<[1], [0], [0], [1], [0, 0, 1, 1], [], []>} : vector<8x64xf32>, vector<64x256xf32>, vector<8x256xf32> -> vector<8x256xf32>
    %c0_13 = arith.constant 0 : index
    %c0_14 = arith.constant 0 : index
    %12 = vector.load %arg11[%c0_13, %c0_14] : memref<64x256xf32, #tpu.memory_space<vmem>>, vector<8x128xf32>
    %13 = vector.extract_strided_slice %11 {offsets = [0, 0], sizes = [8, 128], strides = [1, 1]} : vector<8x256xf32> to vector<8x128xf32>
    %14 = arith.addf %12, %13 : vector<8x128xf32>
    %c56 = arith.constant 56 : index
    %c128 = arith.constant 128 : index
    %15 = vector.load %arg11[%c56, %c128] : memref<64x256xf32, #tpu.memory_space<vmem>>, vector<8x128xf32>
    %16 = vector.extract_strided_slice %11 {offsets = [0, 128], sizes = [8, 128], strides = [1, 1]} : vector<8x256xf32> to vector<8x128xf32>
    %17 = arith.addf %15, %16 : vector<8x128xf32>
    %18 = arith.negf %14 : vector<8x128xf32>
    %19 = math.exp %18 : vector<8x128xf32>
    %cst_15 = arith.constant 1.000000e+00 : f32
    %20 = vector.broadcast %cst_15 : f32 to vector<8x128xf32>
    %21 = arith.addf %20, %19 : vector<8x128xf32>
    %22 = arith.divf %20, %21 : vector<8x128xf32>
    %23 = math.tanh %14 : vector<8x128xf32>
    %24 = vector.extract_strided_slice %22 {offsets = [0, 0], sizes = [8, 32], strides = [1, 1]} : vector<8x128xf32> to vector<8x32xf32>
    %25 = vector.extract_strided_slice %22 {offsets = [0, 32], sizes = [8, 32], strides = [1, 1]} : vector<8x128xf32> to vector<8x32xf32>
    %26 = vector.extract_strided_slice %22 {offsets = [0, 96], sizes = [8, 32], strides = [1, 1]} : vector<8x128xf32> to vector<8x32xf32>
    %27 = vector.extract_strided_slice %23 {offsets = [0, 64], sizes = [8, 32], strides = [1, 1]} : vector<8x128xf32> to vector<8x32xf32>
    %28 = arith.mulf %25, %9 : vector<8x32xf32>
    %29 = arith.mulf %24, %27 : vector<8x32xf32>
    %30 = arith.addf %28, %29 : vector<8x32xf32>
    %31 = math.tanh %30 : vector<8x32xf32>
    %32 = arith.mulf %26, %31 : vector<8x32xf32>
    %33 = arith.negf %17 : vector<8x128xf32>
    %34 = math.exp %33 : vector<8x128xf32>
    %cst_16 = arith.constant 1.000000e+00 : f32
    %35 = vector.broadcast %cst_16 : f32 to vector<8x128xf32>
    %36 = arith.addf %35, %34 : vector<8x128xf32>
    %37 = arith.divf %35, %36 : vector<8x128xf32>
    %38 = math.tanh %17 : vector<8x128xf32>
    %39 = vector.extract_strided_slice %37 {offsets = [0, 0], sizes = [8, 32], strides = [1, 1]} : vector<8x128xf32> to vector<8x32xf32>
    %40 = vector.extract_strided_slice %37 {offsets = [0, 32], sizes = [8, 32], strides = [1, 1]} : vector<8x128xf32> to vector<8x32xf32>
    %41 = vector.extract_strided_slice %37 {offsets = [0, 96], sizes = [8, 32], strides = [1, 1]} : vector<8x128xf32> to vector<8x32xf32>
    %42 = vector.extract_strided_slice %38 {offsets = [0, 64], sizes = [8, 32], strides = [1, 1]} : vector<8x128xf32> to vector<8x32xf32>
    %43 = arith.mulf %40, %10 : vector<8x32xf32>
    %44 = arith.mulf %39, %42 : vector<8x32xf32>
    %45 = arith.addf %43, %44 : vector<8x32xf32>
    %46 = math.tanh %45 : vector<8x32xf32>
    %47 = arith.mulf %41, %46 : vector<8x32xf32>
    %48 = tpu.concatenate %32, %47 in 1 : vector<8x32xf32>, vector<8x32xf32> -> vector<8x64xf32>
    %c0_17 = arith.constant 0 : index
    %c0_18 = arith.constant 0 : index
    %49 = vector.load %arg12[%c0_17, %c0_18] : memref<64x32xf32, #tpu.memory_space<vmem>>, vector<8x32xf32>
    tpu.vector_store %arg12[%c0_17, %c0_18], %32 {strides = array<i32>} : memref<64x32xf32, #tpu.memory_space<vmem>>, vector<8x32xf32>,
    %c56_19 = arith.constant 56 : index
    %c0_20 = arith.constant 0 : index
    %50 = vector.load %arg13[%c56_19, %c0_20] : memref<64x32xf32, #tpu.memory_space<vmem>>, vector<8x32xf32>
    tpu.vector_store %arg13[%c56_19, %c0_20], %47 {strides = array<i32>} : memref<64x32xf32, #tpu.memory_space<vmem>>, vector<8x32xf32>,
    %cst_21 = arith.constant dense<0.000000e+00> : vector<8x256xf32>
    %51 = tpu.matmul %48, %7, %cst_21 {dimension_numbers = #tpu.dot_dimension_numbers<[1], [0], [0], [1], [0, 0, 1, 1], [], []>} : vector<8x64xf32>, vector<64x256xf32>, vector<8x256xf32> -> vector<8x256xf32>
    %c8 = arith.constant 8 : index
    %c0_22 = arith.constant 0 : index
    %52 = vector.load %arg11[%c8, %c0_22] : memref<64x256xf32, #tpu.memory_space<vmem>>, vector<8x128xf32>
    %53 = vector.extract_strided_slice %51 {offsets = [0, 0], sizes = [8, 128], strides = [1, 1]} : vector<8x256xf32> to vector<8x128xf32>
    %54 = arith.addf %52, %53 : vector<8x128xf32>
    %c48 = arith.constant 48 : index
    %c128_23 = arith.constant 128 : index
    %55 = vector.load %arg11[%c48, %c128_23] : memref<64x256xf32, #tpu.memory_space<vmem>>, vector<8x128xf32>
    %56 = vector.extract_strided_slice %51 {offsets = [0, 128], sizes = [8, 128], strides = [1, 1]} : vector<8x256xf32> to vector<8x128xf32>
    %57 = arith.addf %55, %56 : vector<8x128xf32>
    %58 = arith.negf %54 : vector<8x128xf32>
    %59 = math.exp %58 : vector<8x128xf32>
    %cst_24 = arith.constant 1.000000e+00 : f32
    %60 = vector.broadcast %cst_24 : f32 to vector<8x128xf32>
    %61 = arith.addf %60, %59 : vector<8x128xf32>
    %62 = arith.divf %60, %61 : vector<8x128xf32>
    %63 = math.tanh %54 : vector<8x128xf32>
    %64 = vector.extract_strided_slice %62 {offsets = [0, 0], sizes = [8, 32], strides = [1, 1]} : vector<8x128xf32> to vector<8x32xf32>
    %65 = vector.extract_strided_slice %62 {offsets = [0, 32], sizes = [8, 32], strides = [1, 1]} : vector<8x128xf32> to vector<8x32xf32>
    %66 = vector.extract_strided_slice %62 {offsets = [0, 96], sizes = [8, 32], strides = [1, 1]} : vector<8x128xf32> to vector<8x32xf32>
    %67 = vector.extract_strided_slice %63 {offsets = [0, 64], sizes = [8, 32], strides = [1, 1]} : vector<8x128xf32> to vector<8x32xf32>
    %68 = arith.mulf %65, %30 : vector<8x32xf32>
    %69 = arith.mulf %64, %67 : vector<8x32xf32>
    %70 = arith.addf %68, %69 : vector<8x32xf32>
    %71 = math.tanh %70 : vector<8x32xf32>
    %72 = arith.mulf %66, %71 : vector<8x32xf32>
    %73 = arith.negf %57 : vector<8x128xf32>
    %74 = math.exp %73 : vector<8x128xf32>
    %cst_25 = arith.constant 1.000000e+00 : f32
    %75 = vector.broadcast %cst_25 : f32 to vector<8x128xf32>
    %76 = arith.addf %75, %74 : vector<8x128xf32>
    %77 = arith.divf %75, %76 : vector<8x128xf32>
    %78 = math.tanh %57 : vector<8x128xf32>
    %79 = vector.extract_strided_slice %77 {offsets = [0, 0], sizes = [8, 32], strides = [1, 1]} : vector<8x128xf32> to vector<8x32xf32>
    %80 = vector.extract_strided_slice %77 {offsets = [0, 32], sizes = [8, 32], strides = [1, 1]} : vector<8x128xf32> to vector<8x32xf32>
    %81 = vector.extract_strided_slice %77 {offsets = [0, 96], sizes = [8, 32], strides = [1, 1]} : vector<8x128xf32> to vector<8x32xf32>
    %82 = vector.extract_strided_slice %78 {offsets = [0, 64], sizes = [8, 32], strides = [1, 1]} : vector<8x128xf32> to vector<8x32xf32>
    %83 = arith.mulf %80, %45 : vector<8x32xf32>
    %84 = arith.mulf %79, %82 : vector<8x32xf32>
    %85 = arith.addf %83, %84 : vector<8x32xf32>
    %86 = math.tanh %85 : vector<8x32xf32>
    %87 = arith.mulf %81, %86 : vector<8x32xf32>
    %88 = tpu.concatenate %72, %87 in 1 : vector<8x32xf32>, vector<8x32xf32> -> vector<8x64xf32>
    %c8_26 = arith.constant 8 : index
    %c0_27 = arith.constant 0 : index
    %89 = vector.load %arg12[%c8_26, %c0_27] : memref<64x32xf32, #tpu.memory_space<vmem>>, vector<8x32xf32>
    tpu.vector_store %arg12[%c8_26, %c0_27], %72 {strides = array<i32>} : memref<64x32xf32, #tpu.memory_space<vmem>>, vector<8x32xf32>,
    %c48_28 = arith.constant 48 : index
    %c0_29 = arith.constant 0 : index
    %90 = vector.load %arg13[%c48_28, %c0_29] : memref<64x32xf32, #tpu.memory_space<vmem>>, vector<8x32xf32>
    tpu.vector_store %arg13[%c48_28, %c0_29], %87 {strides = array<i32>} : memref<64x32xf32, #tpu.memory_space<vmem>>, vector<8x32xf32>,
    %cst_30 = arith.constant dense<0.000000e+00> : vector<8x256xf32>
    %91 = tpu.matmul %88, %7, %cst_30 {dimension_numbers = #tpu.dot_dimension_numbers<[1], [0], [0], [1], [0, 0, 1, 1], [], []>} : vector<8x64xf32>, vector<64x256xf32>, vector<8x256xf32> -> vector<8x256xf32>
    %c16 = arith.constant 16 : index
    %c0_31 = arith.constant 0 : index
    %92 = vector.load %arg11[%c16, %c0_31] : memref<64x256xf32, #tpu.memory_space<vmem>>, vector<8x128xf32>
    %93 = vector.extract_strided_slice %91 {offsets = [0, 0], sizes = [8, 128], strides = [1, 1]} : vector<8x256xf32> to vector<8x128xf32>
    %94 = arith.addf %92, %93 : vector<8x128xf32>
    %c40 = arith.constant 40 : index
    %c128_32 = arith.constant 128 : index
    %95 = vector.load %arg11[%c40, %c128_32] : memref<64x256xf32, #tpu.memory_space<vmem>>, vector<8x128xf32>
    %96 = vector.extract_strided_slice %91 {offsets = [0, 128], sizes = [8, 128], strides = [1, 1]} : vector<8x256xf32> to vector<8x128xf32>
    %97 = arith.addf %95, %96 : vector<8x128xf32>
    %98 = arith.negf %94 : vector<8x128xf32>
    %99 = math.exp %98 : vector<8x128xf32>
    %cst_33 = arith.constant 1.000000e+00 : f32
    %100 = vector.broadcast %cst_33 : f32 to vector<8x128xf32>
    %101 = arith.addf %100, %99 : vector<8x128xf32>
    %102 = arith.divf %100, %101 : vector<8x128xf32>
    %103 = math.tanh %94 : vector<8x128xf32>
    %104 = vector.extract_strided_slice %102 {offsets = [0, 0], sizes = [8, 32], strides = [1, 1]} : vector<8x128xf32> to vector<8x32xf32>
    %105 = vector.extract_strided_slice %102 {offsets = [0, 32], sizes = [8, 32], strides = [1, 1]} : vector<8x128xf32> to vector<8x32xf32>
    %106 = vector.extract_strided_slice %102 {offsets = [0, 96], sizes = [8, 32], strides = [1, 1]} : vector<8x128xf32> to vector<8x32xf32>
    %107 = vector.extract_strided_slice %103 {offsets = [0, 64], sizes = [8, 32], strides = [1, 1]} : vector<8x128xf32> to vector<8x32xf32>
    %108 = arith.mulf %105, %70 : vector<8x32xf32>
    %109 = arith.mulf %104, %107 : vector<8x32xf32>
    %110 = arith.addf %108, %109 : vector<8x32xf32>
    %111 = math.tanh %110 : vector<8x32xf32>
    %112 = arith.mulf %106, %111 : vector<8x32xf32>
    %113 = arith.negf %97 : vector<8x128xf32>
    %114 = math.exp %113 : vector<8x128xf32>
    %cst_34 = arith.constant 1.000000e+00 : f32
    %115 = vector.broadcast %cst_34 : f32 to vector<8x128xf32>
    %116 = arith.addf %115, %114 : vector<8x128xf32>
    %117 = arith.divf %115, %116 : vector<8x128xf32>
    %118 = math.tanh %97 : vector<8x128xf32>
    %119 = vector.extract_strided_slice %117 {offsets = [0, 0], sizes = [8, 32], strides = [1, 1]} : vector<8x128xf32> to vector<8x32xf32>
    %120 = vector.extract_strided_slice %117 {offsets = [0, 32], sizes = [8, 32], strides = [1, 1]} : vector<8x128xf32> to vector<8x32xf32>
    %121 = vector.extract_strided_slice %117 {offsets = [0, 96], sizes = [8, 32], strides = [1, 1]} : vector<8x128xf32> to vector<8x32xf32>
    %122 = vector.extract_strided_slice %118 {offsets = [0, 64], sizes = [8, 32], strides = [1, 1]} : vector<8x128xf32> to vector<8x32xf32>
    %123 = arith.mulf %120, %85 : vector<8x32xf32>
    %124 = arith.mulf %119, %122 : vector<8x32xf32>
    %125 = arith.addf %123, %124 : vector<8x32xf32>
    %126 = math.tanh %125 : vector<8x32xf32>
    %127 = arith.mulf %121, %126 : vector<8x32xf32>
    %128 = tpu.concatenate %112, %127 in 1 : vector<8x32xf32>, vector<8x32xf32> -> vector<8x64xf32>
    %c16_35 = arith.constant 16 : index
    %c0_36 = arith.constant 0 : index
    %129 = vector.load %arg12[%c16_35, %c0_36] : memref<64x32xf32, #tpu.memory_space<vmem>>, vector<8x32xf32>
    tpu.vector_store %arg12[%c16_35, %c0_36], %112 {strides = array<i32>} : memref<64x32xf32, #tpu.memory_space<vmem>>, vector<8x32xf32>,
    %c40_37 = arith.constant 40 : index
    %c0_38 = arith.constant 0 : index
    %130 = vector.load %arg13[%c40_37, %c0_38] : memref<64x32xf32, #tpu.memory_space<vmem>>, vector<8x32xf32>
    tpu.vector_store %arg13[%c40_37, %c0_38], %127 {strides = array<i32>} : memref<64x32xf32, #tpu.memory_space<vmem>>, vector<8x32xf32>,
    %cst_39 = arith.constant dense<0.000000e+00> : vector<8x256xf32>
    %131 = tpu.matmul %128, %7, %cst_39 {dimension_numbers = #tpu.dot_dimension_numbers<[1], [0], [0], [1], [0, 0, 1, 1], [], []>} : vector<8x64xf32>, vector<64x256xf32>, vector<8x256xf32> -> vector<8x256xf32>
    %c24 = arith.constant 24 : index
    %c0_40 = arith.constant 0 : index
    %132 = vector.load %arg11[%c24, %c0_40] : memref<64x256xf32, #tpu.memory_space<vmem>>, vector<8x128xf32>
    %133 = vector.extract_strided_slice %131 {offsets = [0, 0], sizes = [8, 128], strides = [1, 1]} : vector<8x256xf32> to vector<8x128xf32>
    %134 = arith.addf %132, %133 : vector<8x128xf32>
    %c32 = arith.constant 32 : index
    %c128_41 = arith.constant 128 : index
    %135 = vector.load %arg11[%c32, %c128_41] : memref<64x256xf32, #tpu.memory_space<vmem>>, vector<8x128xf32>
    %136 = vector.extract_strided_slice %131 {offsets = [0, 128], sizes = [8, 128], strides = [1, 1]} : vector<8x256xf32> to vector<8x128xf32>
    %137 = arith.addf %135, %136 : vector<8x128xf32>
    %138 = arith.negf %134 : vector<8x128xf32>
    %139 = math.exp %138 : vector<8x128xf32>
    %cst_42 = arith.constant 1.000000e+00 : f32
    %140 = vector.broadcast %cst_42 : f32 to vector<8x128xf32>
    %141 = arith.addf %140, %139 : vector<8x128xf32>
    %142 = arith.divf %140, %141 : vector<8x128xf32>
    %143 = math.tanh %134 : vector<8x128xf32>
    %144 = vector.extract_strided_slice %142 {offsets = [0, 0], sizes = [8, 32], strides = [1, 1]} : vector<8x128xf32> to vector<8x32xf32>
    %145 = vector.extract_strided_slice %142 {offsets = [0, 32], sizes = [8, 32], strides = [1, 1]} : vector<8x128xf32> to vector<8x32xf32>
    %146 = vector.extract_strided_slice %142 {offsets = [0, 96], sizes = [8, 32], strides = [1, 1]} : vector<8x128xf32> to vector<8x32xf32>
    %147 = vector.extract_strided_slice %143 {offsets = [0, 64], sizes = [8, 32], strides = [1, 1]} : vector<8x128xf32> to vector<8x32xf32>
    %148 = arith.mulf %145, %110 : vector<8x32xf32>
    %149 = arith.mulf %144, %147 : vector<8x32xf32>
    %150 = arith.addf %148, %149 : vector<8x32xf32>
    %151 = math.tanh %150 : vector<8x32xf32>
    %152 = arith.mulf %146, %151 : vector<8x32xf32>
    %153 = arith.negf %137 : vector<8x128xf32>
    %154 = math.exp %153 : vector<8x128xf32>
    %cst_43 = arith.constant 1.000000e+00 : f32
    %155 = vector.broadcast %cst_43 : f32 to vector<8x128xf32>
    %156 = arith.addf %155, %154 : vector<8x128xf32>
    %157 = arith.divf %155, %156 : vector<8x128xf32>
    %158 = math.tanh %137 : vector<8x128xf32>
    %159 = vector.extract_strided_slice %157 {offsets = [0, 0], sizes = [8, 32], strides = [1, 1]} : vector<8x128xf32> to vector<8x32xf32>
    %160 = vector.extract_strided_slice %157 {offsets = [0, 32], sizes = [8, 32], strides = [1, 1]} : vector<8x128xf32> to vector<8x32xf32>
    %161 = vector.extract_strided_slice %157 {offsets = [0, 96], sizes = [8, 32], strides = [1, 1]} : vector<8x128xf32> to vector<8x32xf32>
    %162 = vector.extract_strided_slice %158 {offsets = [0, 64], sizes = [8, 32], strides = [1, 1]} : vector<8x128xf32> to vector<8x32xf32>
    %163 = arith.mulf %160, %125 : vector<8x32xf32>
    %164 = arith.mulf %159, %162 : vector<8x32xf32>
    %165 = arith.addf %163, %164 : vector<8x32xf32>
    %166 = math.tanh %165 : vector<8x32xf32>
    %167 = arith.mulf %161, %166 : vector<8x32xf32>
    %168 = tpu.concatenate %152, %167 in 1 : vector<8x32xf32>, vector<8x32xf32> -> vector<8x64xf32>
    %c24_44 = arith.constant 24 : index
    %c0_45 = arith.constant 0 : index
    %169 = vector.load %arg12[%c24_44, %c0_45] : memref<64x32xf32, #tpu.memory_space<vmem>>, vector<8x32xf32>
    tpu.vector_store %arg12[%c24_44, %c0_45], %152 {strides = array<i32>} : memref<64x32xf32, #tpu.memory_space<vmem>>, vector<8x32xf32>,
    %c32_46 = arith.constant 32 : index
    %c0_47 = arith.constant 0 : index
    %170 = vector.load %arg13[%c32_46, %c0_47] : memref<64x32xf32, #tpu.memory_space<vmem>>, vector<8x32xf32>
    tpu.vector_store %arg13[%c32_46, %c0_47], %167 {strides = array<i32>} : memref<64x32xf32, #tpu.memory_space<vmem>>, vector<8x32xf32>,
    %cst_48 = arith.constant dense<0.000000e+00> : vector<8x256xf32>
    %171 = tpu.matmul %168, %7, %cst_48 {dimension_numbers = #tpu.dot_dimension_numbers<[1], [0], [0], [1], [0, 0, 1, 1], [], []>} : vector<8x64xf32>, vector<64x256xf32>, vector<8x256xf32> -> vector<8x256xf32>
    %c32_49 = arith.constant 32 : index
    %c0_50 = arith.constant 0 : index
    %172 = vector.load %arg11[%c32_49, %c0_50] : memref<64x256xf32, #tpu.memory_space<vmem>>, vector<8x128xf32>
    %173 = vector.extract_strided_slice %171 {offsets = [0, 0], sizes = [8, 128], strides = [1, 1]} : vector<8x256xf32> to vector<8x128xf32>
    %174 = arith.addf %172, %173 : vector<8x128xf32>
    %c24_51 = arith.constant 24 : index
    %c128_52 = arith.constant 128 : index
    %175 = vector.load %arg11[%c24_51, %c128_52] : memref<64x256xf32, #tpu.memory_space<vmem>>, vector<8x128xf32>
    %176 = vector.extract_strided_slice %171 {offsets = [0, 128], sizes = [8, 128], strides = [1, 1]} : vector<8x256xf32> to vector<8x128xf32>
    %177 = arith.addf %175, %176 : vector<8x128xf32>
    %178 = arith.negf %174 : vector<8x128xf32>
    %179 = math.exp %178 : vector<8x128xf32>
    %cst_53 = arith.constant 1.000000e+00 : f32
    %180 = vector.broadcast %cst_53 : f32 to vector<8x128xf32>
    %181 = arith.addf %180, %179 : vector<8x128xf32>
    %182 = arith.divf %180, %181 : vector<8x128xf32>
    %183 = math.tanh %174 : vector<8x128xf32>
    %184 = vector.extract_strided_slice %182 {offsets = [0, 0], sizes = [8, 32], strides = [1, 1]} : vector<8x128xf32> to vector<8x32xf32>
    %185 = vector.extract_strided_slice %182 {offsets = [0, 32], sizes = [8, 32], strides = [1, 1]} : vector<8x128xf32> to vector<8x32xf32>
    %186 = vector.extract_strided_slice %182 {offsets = [0, 96], sizes = [8, 32], strides = [1, 1]} : vector<8x128xf32> to vector<8x32xf32>
    %187 = vector.extract_strided_slice %183 {offsets = [0, 64], sizes = [8, 32], strides = [1, 1]} : vector<8x128xf32> to vector<8x32xf32>
    %188 = arith.mulf %185, %150 : vector<8x32xf32>
    %189 = arith.mulf %184, %187 : vector<8x32xf32>
    %190 = arith.addf %188, %189 : vector<8x32xf32>
    %191 = math.tanh %190 : vector<8x32xf32>
    %192 = arith.mulf %186, %191 : vector<8x32xf32>
    %193 = arith.negf %177 : vector<8x128xf32>
    %194 = math.exp %193 : vector<8x128xf32>
    %cst_54 = arith.constant 1.000000e+00 : f32
    %195 = vector.broadcast %cst_54 : f32 to vector<8x128xf32>
    %196 = arith.addf %195, %194 : vector<8x128xf32>
    %197 = arith.divf %195, %196 : vector<8x128xf32>
    %198 = math.tanh %177 : vector<8x128xf32>
    %199 = vector.extract_strided_slice %197 {offsets = [0, 0], sizes = [8, 32], strides = [1, 1]} : vector<8x128xf32> to vector<8x32xf32>
    %200 = vector.extract_strided_slice %197 {offsets = [0, 32], sizes = [8, 32], strides = [1, 1]} : vector<8x128xf32> to vector<8x32xf32>
    %201 = vector.extract_strided_slice %197 {offsets = [0, 96], sizes = [8, 32], strides = [1, 1]} : vector<8x128xf32> to vector<8x32xf32>
    %202 = vector.extract_strided_slice %198 {offsets = [0, 64], sizes = [8, 32], strides = [1, 1]} : vector<8x128xf32> to vector<8x32xf32>
    %203 = arith.mulf %200, %165 : vector<8x32xf32>
    %204 = arith.mulf %199, %202 : vector<8x32xf32>
    %205 = arith.addf %203, %204 : vector<8x32xf32>
    %206 = math.tanh %205 : vector<8x32xf32>
    %207 = arith.mulf %201, %206 : vector<8x32xf32>
    %208 = tpu.concatenate %192, %207 in 1 : vector<8x32xf32>, vector<8x32xf32> -> vector<8x64xf32>
    %c32_55 = arith.constant 32 : index
    %c0_56 = arith.constant 0 : index
    %209 = vector.load %arg12[%c32_55, %c0_56] : memref<64x32xf32, #tpu.memory_space<vmem>>, vector<8x32xf32>
    tpu.vector_store %arg12[%c32_55, %c0_56], %192 {strides = array<i32>} : memref<64x32xf32, #tpu.memory_space<vmem>>, vector<8x32xf32>,
    %c24_57 = arith.constant 24 : index
    %c0_58 = arith.constant 0 : index
    %210 = vector.load %arg13[%c24_57, %c0_58] : memref<64x32xf32, #tpu.memory_space<vmem>>, vector<8x32xf32>
    tpu.vector_store %arg13[%c24_57, %c0_58], %207 {strides = array<i32>} : memref<64x32xf32, #tpu.memory_space<vmem>>, vector<8x32xf32>,
    %cst_59 = arith.constant dense<0.000000e+00> : vector<8x256xf32>
    %211 = tpu.matmul %208, %7, %cst_59 {dimension_numbers = #tpu.dot_dimension_numbers<[1], [0], [0], [1], [0, 0, 1, 1], [], []>} : vector<8x64xf32>, vector<64x256xf32>, vector<8x256xf32> -> vector<8x256xf32>
    %c40_60 = arith.constant 40 : index
    %c0_61 = arith.constant 0 : index
    %212 = vector.load %arg11[%c40_60, %c0_61] : memref<64x256xf32, #tpu.memory_space<vmem>>, vector<8x128xf32>
    %213 = vector.extract_strided_slice %211 {offsets = [0, 0], sizes = [8, 128], strides = [1, 1]} : vector<8x256xf32> to vector<8x128xf32>
    %214 = arith.addf %212, %213 : vector<8x128xf32>
    %c16_62 = arith.constant 16 : index
    %c128_63 = arith.constant 128 : index
    %215 = vector.load %arg11[%c16_62, %c128_63] : memref<64x256xf32, #tpu.memory_space<vmem>>, vector<8x128xf32>
    %216 = vector.extract_strided_slice %211 {offsets = [0, 128], sizes = [8, 128], strides = [1, 1]} : vector<8x256xf32> to vector<8x128xf32>
    %217 = arith.addf %215, %216 : vector<8x128xf32>
    %218 = arith.negf %214 : vector<8x128xf32>
    %219 = math.exp %218 : vector<8x128xf32>
    %cst_64 = arith.constant 1.000000e+00 : f32
    %220 = vector.broadcast %cst_64 : f32 to vector<8x128xf32>
    %221 = arith.addf %220, %219 : vector<8x128xf32>
    %222 = arith.divf %220, %221 : vector<8x128xf32>
    %223 = math.tanh %214 : vector<8x128xf32>
    %224 = vector.extract_strided_slice %222 {offsets = [0, 0], sizes = [8, 32], strides = [1, 1]} : vector<8x128xf32> to vector<8x32xf32>
    %225 = vector.extract_strided_slice %222 {offsets = [0, 32], sizes = [8, 32], strides = [1, 1]} : vector<8x128xf32> to vector<8x32xf32>
    %226 = vector.extract_strided_slice %222 {offsets = [0, 96], sizes = [8, 32], strides = [1, 1]} : vector<8x128xf32> to vector<8x32xf32>
    %227 = vector.extract_strided_slice %223 {offsets = [0, 64], sizes = [8, 32], strides = [1, 1]} : vector<8x128xf32> to vector<8x32xf32>
    %228 = arith.mulf %225, %190 : vector<8x32xf32>
    %229 = arith.mulf %224, %227 : vector<8x32xf32>
    %230 = arith.addf %228, %229 : vector<8x32xf32>
    %231 = math.tanh %230 : vector<8x32xf32>
    %232 = arith.mulf %226, %231 : vector<8x32xf32>
    %233 = arith.negf %217 : vector<8x128xf32>
    %234 = math.exp %233 : vector<8x128xf32>
    %cst_65 = arith.constant 1.000000e+00 : f32
    %235 = vector.broadcast %cst_65 : f32 to vector<8x128xf32>
    %236 = arith.addf %235, %234 : vector<8x128xf32>
    %237 = arith.divf %235, %236 : vector<8x128xf32>
    %238 = math.tanh %217 : vector<8x128xf32>
    %239 = vector.extract_strided_slice %237 {offsets = [0, 0], sizes = [8, 32], strides = [1, 1]} : vector<8x128xf32> to vector<8x32xf32>
    %240 = vector.extract_strided_slice %237 {offsets = [0, 32], sizes = [8, 32], strides = [1, 1]} : vector<8x128xf32> to vector<8x32xf32>
    %241 = vector.extract_strided_slice %237 {offsets = [0, 96], sizes = [8, 32], strides = [1, 1]} : vector<8x128xf32> to vector<8x32xf32>
    %242 = vector.extract_strided_slice %238 {offsets = [0, 64], sizes = [8, 32], strides = [1, 1]} : vector<8x128xf32> to vector<8x32xf32>
    %243 = arith.mulf %240, %205 : vector<8x32xf32>
    %244 = arith.mulf %239, %242 : vector<8x32xf32>
    %245 = arith.addf %243, %244 : vector<8x32xf32>
    %246 = math.tanh %245 : vector<8x32xf32>
    %247 = arith.mulf %241, %246 : vector<8x32xf32>
    %248 = tpu.concatenate %232, %247 in 1 : vector<8x32xf32>, vector<8x32xf32> -> vector<8x64xf32>
    %c40_66 = arith.constant 40 : index
    %c0_67 = arith.constant 0 : index
    %249 = vector.load %arg12[%c40_66, %c0_67] : memref<64x32xf32, #tpu.memory_space<vmem>>, vector<8x32xf32>
    tpu.vector_store %arg12[%c40_66, %c0_67], %232 {strides = array<i32>} : memref<64x32xf32, #tpu.memory_space<vmem>>, vector<8x32xf32>,
    %c16_68 = arith.constant 16 : index
    %c0_69 = arith.constant 0 : index
    %250 = vector.load %arg13[%c16_68, %c0_69] : memref<64x32xf32, #tpu.memory_space<vmem>>, vector<8x32xf32>
    tpu.vector_store %arg13[%c16_68, %c0_69], %247 {strides = array<i32>} : memref<64x32xf32, #tpu.memory_space<vmem>>, vector<8x32xf32>,
    %cst_70 = arith.constant dense<0.000000e+00> : vector<8x256xf32>
    %251 = tpu.matmul %248, %7, %cst_70 {dimension_numbers = #tpu.dot_dimension_numbers<[1], [0], [0], [1], [0, 0, 1, 1], [], []>} : vector<8x64xf32>, vector<64x256xf32>, vector<8x256xf32> -> vector<8x256xf32>
    %c48_71 = arith.constant 48 : index
    %c0_72 = arith.constant 0 : index
    %252 = vector.load %arg11[%c48_71, %c0_72] : memref<64x256xf32, #tpu.memory_space<vmem>>, vector<8x128xf32>
    %253 = vector.extract_strided_slice %251 {offsets = [0, 0], sizes = [8, 128], strides = [1, 1]} : vector<8x256xf32> to vector<8x128xf32>
    %254 = arith.addf %252, %253 : vector<8x128xf32>
    %c8_73 = arith.constant 8 : index
    %c128_74 = arith.constant 128 : index
    %255 = vector.load %arg11[%c8_73, %c128_74] : memref<64x256xf32, #tpu.memory_space<vmem>>, vector<8x128xf32>
    %256 = vector.extract_strided_slice %251 {offsets = [0, 128], sizes = [8, 128], strides = [1, 1]} : vector<8x256xf32> to vector<8x128xf32>
    %257 = arith.addf %255, %256 : vector<8x128xf32>
    %258 = arith.negf %254 : vector<8x128xf32>
    %259 = math.exp %258 : vector<8x128xf32>
    %cst_75 = arith.constant 1.000000e+00 : f32
    %260 = vector.broadcast %cst_75 : f32 to vector<8x128xf32>
    %261 = arith.addf %260, %259 : vector<8x128xf32>
    %262 = arith.divf %260, %261 : vector<8x128xf32>
    %263 = math.tanh %254 : vector<8x128xf32>
    %264 = vector.extract_strided_slice %262 {offsets = [0, 0], sizes = [8, 32], strides = [1, 1]} : vector<8x128xf32> to vector<8x32xf32>
    %265 = vector.extract_strided_slice %262 {offsets = [0, 32], sizes = [8, 32], strides = [1, 1]} : vector<8x128xf32> to vector<8x32xf32>
    %266 = vector.extract_strided_slice %262 {offsets = [0, 96], sizes = [8, 32], strides = [1, 1]} : vector<8x128xf32> to vector<8x32xf32>
    %267 = vector.extract_strided_slice %263 {offsets = [0, 64], sizes = [8, 32], strides = [1, 1]} : vector<8x128xf32> to vector<8x32xf32>
    %268 = arith.mulf %265, %230 : vector<8x32xf32>
    %269 = arith.mulf %264, %267 : vector<8x32xf32>
    %270 = arith.addf %268, %269 : vector<8x32xf32>
    %271 = math.tanh %270 : vector<8x32xf32>
    %272 = arith.mulf %266, %271 : vector<8x32xf32>
    %273 = arith.negf %257 : vector<8x128xf32>
    %274 = math.exp %273 : vector<8x128xf32>
    %cst_76 = arith.constant 1.000000e+00 : f32
    %275 = vector.broadcast %cst_76 : f32 to vector<8x128xf32>
    %276 = arith.addf %275, %274 : vector<8x128xf32>
    %277 = arith.divf %275, %276 : vector<8x128xf32>
    %278 = math.tanh %257 : vector<8x128xf32>
    %279 = vector.extract_strided_slice %277 {offsets = [0, 0], sizes = [8, 32], strides = [1, 1]} : vector<8x128xf32> to vector<8x32xf32>
    %280 = vector.extract_strided_slice %277 {offsets = [0, 32], sizes = [8, 32], strides = [1, 1]} : vector<8x128xf32> to vector<8x32xf32>
    %281 = vector.extract_strided_slice %277 {offsets = [0, 96], sizes = [8, 32], strides = [1, 1]} : vector<8x128xf32> to vector<8x32xf32>
    %282 = vector.extract_strided_slice %278 {offsets = [0, 64], sizes = [8, 32], strides = [1, 1]} : vector<8x128xf32> to vector<8x32xf32>
    %283 = arith.mulf %280, %245 : vector<8x32xf32>
    %284 = arith.mulf %279, %282 : vector<8x32xf32>
    %285 = arith.addf %283, %284 : vector<8x32xf32>
    %286 = math.tanh %285 : vector<8x32xf32>
    %287 = arith.mulf %281, %286 : vector<8x32xf32>
    %288 = tpu.concatenate %272, %287 in 1 : vector<8x32xf32>, vector<8x32xf32> -> vector<8x64xf32>
    %c48_77 = arith.constant 48 : index
    %c0_78 = arith.constant 0 : index
    %289 = vector.load %arg12[%c48_77, %c0_78] : memref<64x32xf32, #tpu.memory_space<vmem>>, vector<8x32xf32>
    tpu.vector_store %arg12[%c48_77, %c0_78], %272 {strides = array<i32>} : memref<64x32xf32, #tpu.memory_space<vmem>>, vector<8x32xf32>,
    %c8_79 = arith.constant 8 : index
    %c0_80 = arith.constant 0 : index
    %290 = vector.load %arg13[%c8_79, %c0_80] : memref<64x32xf32, #tpu.memory_space<vmem>>, vector<8x32xf32>
    tpu.vector_store %arg13[%c8_79, %c0_80], %287 {strides = array<i32>} : memref<64x32xf32, #tpu.memory_space<vmem>>, vector<8x32xf32>,
    %cst_81 = arith.constant dense<0.000000e+00> : vector<8x256xf32>
    %291 = tpu.matmul %288, %7, %cst_81 {dimension_numbers = #tpu.dot_dimension_numbers<[1], [0], [0], [1], [0, 0, 1, 1], [], []>} : vector<8x64xf32>, vector<64x256xf32>, vector<8x256xf32> -> vector<8x256xf32>
    %c56_82 = arith.constant 56 : index
    %c0_83 = arith.constant 0 : index
    %292 = vector.load %arg11[%c56_82, %c0_83] : memref<64x256xf32, #tpu.memory_space<vmem>>, vector<8x128xf32>
    %293 = vector.extract_strided_slice %291 {offsets = [0, 0], sizes = [8, 128], strides = [1, 1]} : vector<8x256xf32> to vector<8x128xf32>
    %294 = arith.addf %292, %293 : vector<8x128xf32>
    %c0_84 = arith.constant 0 : index
    %c128_85 = arith.constant 128 : index
    %295 = vector.load %arg11[%c0_84, %c128_85] : memref<64x256xf32, #tpu.memory_space<vmem>>, vector<8x128xf32>
    %296 = vector.extract_strided_slice %291 {offsets = [0, 128], sizes = [8, 128], strides = [1, 1]} : vector<8x256xf32> to vector<8x128xf32>
    %297 = arith.addf %295, %296 : vector<8x128xf32>
    %298 = arith.negf %294 : vector<8x128xf32>
    %299 = math.exp %298 : vector<8x128xf32>
    %cst_86 = arith.constant 1.000000e+00 : f32
    %300 = vector.broadcast %cst_86 : f32 to vector<8x128xf32>
    %301 = arith.addf %300, %299 : vector<8x128xf32>
    %302 = arith.divf %300, %301 : vector<8x128xf32>
    %303 = math.tanh %294 : vector<8x128xf32>
    %304 = vector.extract_strided_slice %302 {offsets = [0, 0], sizes = [8, 32], strides = [1, 1]} : vector<8x128xf32> to vector<8x32xf32>
    %305 = vector.extract_strided_slice %302 {offsets = [0, 32], sizes = [8, 32], strides = [1, 1]} : vector<8x128xf32> to vector<8x32xf32>
    %306 = vector.extract_strided_slice %302 {offsets = [0, 96], sizes = [8, 32], strides = [1, 1]} : vector<8x128xf32> to vector<8x32xf32>
    %307 = vector.extract_strided_slice %303 {offsets = [0, 64], sizes = [8, 32], strides = [1, 1]} : vector<8x128xf32> to vector<8x32xf32>
    %308 = arith.mulf %305, %270 : vector<8x32xf32>
    %309 = arith.mulf %304, %307 : vector<8x32xf32>
    %310 = arith.addf %308, %309 : vector<8x32xf32>
    %311 = math.tanh %310 : vector<8x32xf32>
    %312 = arith.mulf %306, %311 : vector<8x32xf32>
    %313 = arith.negf %297 : vector<8x128xf32>
    %314 = math.exp %313 : vector<8x128xf32>
    %cst_87 = arith.constant 1.000000e+00 : f32
    %315 = vector.broadcast %cst_87 : f32 to vector<8x128xf32>
    %316 = arith.addf %315, %314 : vector<8x128xf32>
    %317 = arith.divf %315, %316 : vector<8x128xf32>
    %318 = math.tanh %297 : vector<8x128xf32>
    %319 = vector.extract_strided_slice %317 {offsets = [0, 0], sizes = [8, 32], strides = [1, 1]} : vector<8x128xf32> to vector<8x32xf32>
    %320 = vector.extract_strided_slice %317 {offsets = [0, 32], sizes = [8, 32], strides = [1, 1]} : vector<8x128xf32> to vector<8x32xf32>
    %321 = vector.extract_strided_slice %317 {offsets = [0, 96], sizes = [8, 32], strides = [1, 1]} : vector<8x128xf32> to vector<8x32xf32>
    %322 = vector.extract_strided_slice %318 {offsets = [0, 64], sizes = [8, 32], strides = [1, 1]} : vector<8x128xf32> to vector<8x32xf32>
    %323 = arith.mulf %320, %285 : vector<8x32xf32>
    %324 = arith.mulf %319, %322 : vector<8x32xf32>
    %325 = arith.addf %323, %324 : vector<8x32xf32>
    %326 = math.tanh %325 : vector<8x32xf32>
    %327 = arith.mulf %321, %326 : vector<8x32xf32>
    %c56_88 = arith.constant 56 : index
    %c0_89 = arith.constant 0 : index
    %328 = vector.load %arg12[%c56_88, %c0_89] : memref<64x32xf32, #tpu.memory_space<vmem>>, vector<8x32xf32>
    tpu.vector_store %arg12[%c56_88, %c0_89], %312 {strides = array<i32>} : memref<64x32xf32, #tpu.memory_space<vmem>>, vector<8x32xf32>,
    %c0_90 = arith.constant 0 : index
    %c0_91 = arith.constant 0 : index
    %329 = vector.load %arg13[%c0_90, %c0_91] : memref<64x32xf32, #tpu.memory_space<vmem>>, vector<8x32xf32>
    tpu.vector_store %arg13[%c0_90, %c0_91], %327 {strides = array<i32>} : memref<64x32xf32, #tpu.memory_space<vmem>>, vector<8x32xf32>,
    %c0_92 = arith.constant 0 : index
    %c0_93 = arith.constant 0 : index
    %330 = vector.load %arg6[%c0_92, %c0_93] : memref<1x256xf32, #tpu.memory_space<vmem>>, vector<1x256xf32>
    %c0_94 = arith.constant 0 : index
    %c0_95 = arith.constant 0 : index
    %331 = vector.load %arg12[%c0_94, %c0_95] : memref<64x32xf32, #tpu.memory_space<vmem>>, vector<64x32xf32>
    %c0_96 = arith.constant 0 : index
    %c0_97 = arith.constant 0 : index
    %332 = vector.load %arg5[%c0_96, %c0_97] : memref<64x256xf32, #tpu.memory_space<vmem>>, vector<32x256xf32>
    %cst_98 = arith.constant dense<0.000000e+00> : vector<64x256xf32>
    %333 = tpu.matmul %331, %332, %cst_98 {dimension_numbers = #tpu.dot_dimension_numbers<[1], [0], [0], [1], [0, 0, 1, 1], [], []>} : vector<64x32xf32>, vector<32x256xf32>, vector<64x256xf32> -> vector<64x256xf32>
    %c0_99 = arith.constant 0 : index
    %c0_100 = arith.constant 0 : index
    %334 = vector.load %arg13[%c0_99, %c0_100] : memref<64x32xf32, #tpu.memory_space<vmem>>, vector<64x32xf32>
    %c32_101 = arith.constant 32 : index
    %c0_102 = arith.constant 0 : index
    %335 = vector.load %arg5[%c32_101, %c0_102] : memref<64x256xf32, #tpu.memory_space<vmem>>, vector<32x256xf32>
    %cst_103 = arith.constant dense<0.000000e+00> : vector<64x256xf32>
    %336 = tpu.matmul %334, %335, %cst_103 {dimension_numbers = #tpu.dot_dimension_numbers<[1], [0], [0], [1], [0, 0, 1, 1], [], []>} : vector<64x32xf32>, vector<32x256xf32>, vector<64x256xf32> -> vector<64x256xf32>
    %337 = arith.addf %333, %336 : vector<64x256xf32>
    %338 = vector.broadcast %330 : vector<1x256xf32> to vector<64x256xf32>
    %339 = arith.addf %337, %338 : vector<64x256xf32>
    %c0_104 = arith.constant 0 : index
    %c0_105 = arith.constant 0 : index
    %340 = vector.load %arg11[%c0_104, %c0_105] : memref<64x256xf32, #tpu.memory_space<vmem>>, vector<64x256xf32>
    tpu.vector_store %arg11[%c0_104, %c0_105], %339 {strides = array<i32>} : memref<64x256xf32, #tpu.memory_space<vmem>>, vector<64x256xf32>,
    %c0_106 = arith.constant 0 : index
    %c0_107 = arith.constant 0 : index
    %341 = vector.load %arg7[%c0_106, %c0_107] : memref<64x256xf32, #tpu.memory_space<vmem>>, vector<64x256xf32>
    %cst_108 = arith.constant 0.000000e+00 : f32
    %342 = vector.broadcast %cst_108 : f32 to vector<8x64xf32>
    %cst_109 = arith.constant 0.000000e+00 : f32
    %343 = vector.broadcast %cst_109 : f32 to vector<8x32xf32>
    %cst_110 = arith.constant 0.000000e+00 : f32
    %344 = vector.broadcast %cst_110 : f32 to vector<8x32xf32>
    %cst_111 = arith.constant dense<0.000000e+00> : vector<8x256xf32>
    %345 = tpu.matmul %342, %341, %cst_111 {dimension_numbers = #tpu.dot_dimension_numbers<[1], [0], [0], [1], [0, 0, 1, 1], [], []>} : vector<8x64xf32>, vector<64x256xf32>, vector<8x256xf32> -> vector<8x256xf32>
    %c0_112 = arith.constant 0 : index
    %c0_113 = arith.constant 0 : index
    %346 = vector.load %arg11[%c0_112, %c0_113] : memref<64x256xf32, #tpu.memory_space<vmem>>, vector<8x128xf32>
    %347 = vector.extract_strided_slice %345 {offsets = [0, 0], sizes = [8, 128], strides = [1, 1]} : vector<8x256xf32> to vector<8x128xf32>
    %348 = arith.addf %346, %347 : vector<8x128xf32>
    %c56_114 = arith.constant 56 : index
    %c128_115 = arith.constant 128 : index
    %349 = vector.load %arg11[%c56_114, %c128_115] : memref<64x256xf32, #tpu.memory_space<vmem>>, vector<8x128xf32>
    %350 = vector.extract_strided_slice %345 {offsets = [0, 128], sizes = [8, 128], strides = [1, 1]} : vector<8x256xf32> to vector<8x128xf32>
    %351 = arith.addf %349, %350 : vector<8x128xf32>
    %352 = arith.negf %348 : vector<8x128xf32>
    %353 = math.exp %352 : vector<8x128xf32>
    %cst_116 = arith.constant 1.000000e+00 : f32
    %354 = vector.broadcast %cst_116 : f32 to vector<8x128xf32>
    %355 = arith.addf %354, %353 : vector<8x128xf32>
    %356 = arith.divf %354, %355 : vector<8x128xf32>
    %357 = math.tanh %348 : vector<8x128xf32>
    %358 = vector.extract_strided_slice %356 {offsets = [0, 0], sizes = [8, 32], strides = [1, 1]} : vector<8x128xf32> to vector<8x32xf32>
    %359 = vector.extract_strided_slice %356 {offsets = [0, 32], sizes = [8, 32], strides = [1, 1]} : vector<8x128xf32> to vector<8x32xf32>
    %360 = vector.extract_strided_slice %356 {offsets = [0, 96], sizes = [8, 32], strides = [1, 1]} : vector<8x128xf32> to vector<8x32xf32>
    %361 = vector.extract_strided_slice %357 {offsets = [0, 64], sizes = [8, 32], strides = [1, 1]} : vector<8x128xf32> to vector<8x32xf32>
    %362 = arith.mulf %359, %343 : vector<8x32xf32>
    %363 = arith.mulf %358, %361 : vector<8x32xf32>
    %364 = arith.addf %362, %363 : vector<8x32xf32>
    %365 = math.tanh %364 : vector<8x32xf32>
    %366 = arith.mulf %360, %365 : vector<8x32xf32>
    %367 = arith.negf %351 : vector<8x128xf32>
    %368 = math.exp %367 : vector<8x128xf32>
    %cst_117 = arith.constant 1.000000e+00 : f32
    %369 = vector.broadcast %cst_117 : f32 to vector<8x128xf32>
    %370 = arith.addf %369, %368 : vector<8x128xf32>
    %371 = arith.divf %369, %370 : vector<8x128xf32>
    %372 = math.tanh %351 : vector<8x128xf32>
    %373 = vector.extract_strided_slice %371 {offsets = [0, 0], sizes = [8, 32], strides = [1, 1]} : vector<8x128xf32> to vector<8x32xf32>
    %374 = vector.extract_strided_slice %371 {offsets = [0, 32], sizes = [8, 32], strides = [1, 1]} : vector<8x128xf32> to vector<8x32xf32>
    %375 = vector.extract_strided_slice %371 {offsets = [0, 96], sizes = [8, 32], strides = [1, 1]} : vector<8x128xf32> to vector<8x32xf32>
    %376 = vector.extract_strided_slice %372 {offsets = [0, 64], sizes = [8, 32], strides = [1, 1]} : vector<8x128xf32> to vector<8x32xf32>
    %377 = arith.mulf %374, %344 : vector<8x32xf32>
    %378 = arith.mulf %373, %376 : vector<8x32xf32>
    %379 = arith.addf %377, %378 : vector<8x32xf32>
    %380 = math.tanh %379 : vector<8x32xf32>
    %381 = arith.mulf %375, %380 : vector<8x32xf32>
    %382 = tpu.concatenate %366, %381 in 1 : vector<8x32xf32>, vector<8x32xf32> -> vector<8x64xf32>
    %cst_118 = arith.constant dense<0.000000e+00> : vector<8x256xf32>
    %383 = tpu.matmul %382, %341, %cst_118 {dimension_numbers = #tpu.dot_dimension_numbers<[1], [0], [0], [1], [0, 0, 1, 1], [], []>} : vector<8x64xf32>, vector<64x256xf32>, vector<8x256xf32> -> vector<8x256xf32>
    %c8_119 = arith.constant 8 : index
    %c0_120 = arith.constant 0 : index
    %384 = vector.load %arg11[%c8_119, %c0_120] : memref<64x256xf32, #tpu.memory_space<vmem>>, vector<8x128xf32>
    %385 = vector.extract_strided_slice %383 {offsets = [0, 0], sizes = [8, 128], strides = [1, 1]} : vector<8x256xf32> to vector<8x128xf32>
    %386 = arith.addf %384, %385 : vector<8x128xf32>
    %c48_121 = arith.constant 48 : index
    %c128_122 = arith.constant 128 : index
    %387 = vector.load %arg11[%c48_121, %c128_122] : memref<64x256xf32, #tpu.memory_space<vmem>>, vector<8x128xf32>
    %388 = vector.extract_strided_slice %383 {offsets = [0, 128], sizes = [8, 128], strides = [1, 1]} : vector<8x256xf32> to vector<8x128xf32>
    %389 = arith.addf %387, %388 : vector<8x128xf32>
    %390 = arith.negf %386 : vector<8x128xf32>
    %391 = math.exp %390 : vector<8x128xf32>
    %cst_123 = arith.constant 1.000000e+00 : f32
    %392 = vector.broadcast %cst_123 : f32 to vector<8x128xf32>
    %393 = arith.addf %392, %391 : vector<8x128xf32>
    %394 = arith.divf %392, %393 : vector<8x128xf32>
    %395 = math.tanh %386 : vector<8x128xf32>
    %396 = vector.extract_strided_slice %394 {offsets = [0, 0], sizes = [8, 32], strides = [1, 1]} : vector<8x128xf32> to vector<8x32xf32>
    %397 = vector.extract_strided_slice %394 {offsets = [0, 32], sizes = [8, 32], strides = [1, 1]} : vector<8x128xf32> to vector<8x32xf32>
    %398 = vector.extract_strided_slice %394 {offsets = [0, 96], sizes = [8, 32], strides = [1, 1]} : vector<8x128xf32> to vector<8x32xf32>
    %399 = vector.extract_strided_slice %395 {offsets = [0, 64], sizes = [8, 32], strides = [1, 1]} : vector<8x128xf32> to vector<8x32xf32>
    %400 = arith.mulf %397, %364 : vector<8x32xf32>
    %401 = arith.mulf %396, %399 : vector<8x32xf32>
    %402 = arith.addf %400, %401 : vector<8x32xf32>
    %403 = math.tanh %402 : vector<8x32xf32>
    %404 = arith.mulf %398, %403 : vector<8x32xf32>
    %405 = arith.negf %389 : vector<8x128xf32>
    %406 = math.exp %405 : vector<8x128xf32>
    %cst_124 = arith.constant 1.000000e+00 : f32
    %407 = vector.broadcast %cst_124 : f32 to vector<8x128xf32>
    %408 = arith.addf %407, %406 : vector<8x128xf32>
    %409 = arith.divf %407, %408 : vector<8x128xf32>
    %410 = math.tanh %389 : vector<8x128xf32>
    %411 = vector.extract_strided_slice %409 {offsets = [0, 0], sizes = [8, 32], strides = [1, 1]} : vector<8x128xf32> to vector<8x32xf32>
    %412 = vector.extract_strided_slice %409 {offsets = [0, 32], sizes = [8, 32], strides = [1, 1]} : vector<8x128xf32> to vector<8x32xf32>
    %413 = vector.extract_strided_slice %409 {offsets = [0, 96], sizes = [8, 32], strides = [1, 1]} : vector<8x128xf32> to vector<8x32xf32>
    %414 = vector.extract_strided_slice %410 {offsets = [0, 64], sizes = [8, 32], strides = [1, 1]} : vector<8x128xf32> to vector<8x32xf32>
    %415 = arith.mulf %412, %379 : vector<8x32xf32>
    %416 = arith.mulf %411, %414 : vector<8x32xf32>
    %417 = arith.addf %415, %416 : vector<8x32xf32>
    %418 = math.tanh %417 : vector<8x32xf32>
    %419 = arith.mulf %413, %418 : vector<8x32xf32>
    %420 = tpu.concatenate %404, %419 in 1 : vector<8x32xf32>, vector<8x32xf32> -> vector<8x64xf32>
    %421 = arith.maximumf %366, %404 : vector<8x32xf32>
    %422 = arith.maximumf %381, %419 : vector<8x32xf32>
    %cst_125 = arith.constant dense<0.000000e+00> : vector<8x256xf32>
    %423 = tpu.matmul %420, %341, %cst_125 {dimension_numbers = #tpu.dot_dimension_numbers<[1], [0], [0], [1], [0, 0, 1, 1], [], []>} : vector<8x64xf32>, vector<64x256xf32>, vector<8x256xf32> -> vector<8x256xf32>
    %c16_126 = arith.constant 16 : index
    %c0_127 = arith.constant 0 : index
    %424 = vector.load %arg11[%c16_126, %c0_127] : memref<64x256xf32, #tpu.memory_space<vmem>>, vector<8x128xf32>
    %425 = vector.extract_strided_slice %423 {offsets = [0, 0], sizes = [8, 128], strides = [1, 1]} : vector<8x256xf32> to vector<8x128xf32>
    %426 = arith.addf %424, %425 : vector<8x128xf32>
    %c40_128 = arith.constant 40 : index
    %c128_129 = arith.constant 128 : index
    %427 = vector.load %arg11[%c40_128, %c128_129] : memref<64x256xf32, #tpu.memory_space<vmem>>, vector<8x128xf32>
    %428 = vector.extract_strided_slice %423 {offsets = [0, 128], sizes = [8, 128], strides = [1, 1]} : vector<8x256xf32> to vector<8x128xf32>
    %429 = arith.addf %427, %428 : vector<8x128xf32>
    %430 = arith.negf %426 : vector<8x128xf32>
    %431 = math.exp %430 : vector<8x128xf32>
    %cst_130 = arith.constant 1.000000e+00 : f32
    %432 = vector.broadcast %cst_130 : f32 to vector<8x128xf32>
    %433 = arith.addf %432, %431 : vector<8x128xf32>
    %434 = arith.divf %432, %433 : vector<8x128xf32>
    %435 = math.tanh %426 : vector<8x128xf32>
    %436 = vector.extract_strided_slice %434 {offsets = [0, 0], sizes = [8, 32], strides = [1, 1]} : vector<8x128xf32> to vector<8x32xf32>
    %437 = vector.extract_strided_slice %434 {offsets = [0, 32], sizes = [8, 32], strides = [1, 1]} : vector<8x128xf32> to vector<8x32xf32>
    %438 = vector.extract_strided_slice %434 {offsets = [0, 96], sizes = [8, 32], strides = [1, 1]} : vector<8x128xf32> to vector<8x32xf32>
    %439 = vector.extract_strided_slice %435 {offsets = [0, 64], sizes = [8, 32], strides = [1, 1]} : vector<8x128xf32> to vector<8x32xf32>
    %440 = arith.mulf %437, %402 : vector<8x32xf32>
    %441 = arith.mulf %436, %439 : vector<8x32xf32>
    %442 = arith.addf %440, %441 : vector<8x32xf32>
    %443 = math.tanh %442 : vector<8x32xf32>
    %444 = arith.mulf %438, %443 : vector<8x32xf32>
    %445 = arith.negf %429 : vector<8x128xf32>
    %446 = math.exp %445 : vector<8x128xf32>
    %cst_131 = arith.constant 1.000000e+00 : f32
    %447 = vector.broadcast %cst_131 : f32 to vector<8x128xf32>
    %448 = arith.addf %447, %446 : vector<8x128xf32>
    %449 = arith.divf %447, %448 : vector<8x128xf32>
    %450 = math.tanh %429 : vector<8x128xf32>
    %451 = vector.extract_strided_slice %449 {offsets = [0, 0], sizes = [8, 32], strides = [1, 1]} : vector<8x128xf32> to vector<8x32xf32>
    %452 = vector.extract_strided_slice %449 {offsets = [0, 32], sizes = [8, 32], strides = [1, 1]} : vector<8x128xf32> to vector<8x32xf32>
    %453 = vector.extract_strided_slice %449 {offsets = [0, 96], sizes = [8, 32], strides = [1, 1]} : vector<8x128xf32> to vector<8x32xf32>
    %454 = vector.extract_strided_slice %450 {offsets = [0, 64], sizes = [8, 32], strides = [1, 1]} : vector<8x128xf32> to vector<8x32xf32>
    %455 = arith.mulf %452, %417 : vector<8x32xf32>
    %456 = arith.mulf %451, %454 : vector<8x32xf32>
    %457 = arith.addf %455, %456 : vector<8x32xf32>
    %458 = math.tanh %457 : vector<8x32xf32>
    %459 = arith.mulf %453, %458 : vector<8x32xf32>
    %460 = tpu.concatenate %444, %459 in 1 : vector<8x32xf32>, vector<8x32xf32> -> vector<8x64xf32>
    %461 = arith.maximumf %421, %444 : vector<8x32xf32>
    %462 = arith.maximumf %422, %459 : vector<8x32xf32>
    %cst_132 = arith.constant dense<0.000000e+00> : vector<8x256xf32>
    %463 = tpu.matmul %460, %341, %cst_132 {dimension_numbers = #tpu.dot_dimension_numbers<[1], [0], [0], [1], [0, 0, 1, 1], [], []>} : vector<8x64xf32>, vector<64x256xf32>, vector<8x256xf32> -> vector<8x256xf32>
    %c24_133 = arith.constant 24 : index
    %c0_134 = arith.constant 0 : index
    %464 = vector.load %arg11[%c24_133, %c0_134] : memref<64x256xf32, #tpu.memory_space<vmem>>, vector<8x128xf32>
    %465 = vector.extract_strided_slice %463 {offsets = [0, 0], sizes = [8, 128], strides = [1, 1]} : vector<8x256xf32> to vector<8x128xf32>
    %466 = arith.addf %464, %465 : vector<8x128xf32>
    %c32_135 = arith.constant 32 : index
    %c128_136 = arith.constant 128 : index
    %467 = vector.load %arg11[%c32_135, %c128_136] : memref<64x256xf32, #tpu.memory_space<vmem>>, vector<8x128xf32>
    %468 = vector.extract_strided_slice %463 {offsets = [0, 128], sizes = [8, 128], strides = [1, 1]} : vector<8x256xf32> to vector<8x128xf32>
    %469 = arith.addf %467, %468 : vector<8x128xf32>
    %470 = arith.negf %466 : vector<8x128xf32>
    %471 = math.exp %470 : vector<8x128xf32>
    %cst_137 = arith.constant 1.000000e+00 : f32
    %472 = vector.broadcast %cst_137 : f32 to vector<8x128xf32>
    %473 = arith.addf %472, %471 : vector<8x128xf32>
    %474 = arith.divf %472, %473 : vector<8x128xf32>
    %475 = math.tanh %466 : vector<8x128xf32>
    %476 = vector.extract_strided_slice %474 {offsets = [0, 0], sizes = [8, 32], strides = [1, 1]} : vector<8x128xf32> to vector<8x32xf32>
    %477 = vector.extract_strided_slice %474 {offsets = [0, 32], sizes = [8, 32], strides = [1, 1]} : vector<8x128xf32> to vector<8x32xf32>
    %478 = vector.extract_strided_slice %474 {offsets = [0, 96], sizes = [8, 32], strides = [1, 1]} : vector<8x128xf32> to vector<8x32xf32>
    %479 = vector.extract_strided_slice %475 {offsets = [0, 64], sizes = [8, 32], strides = [1, 1]} : vector<8x128xf32> to vector<8x32xf32>
    %480 = arith.mulf %477, %442 : vector<8x32xf32>
    %481 = arith.mulf %476, %479 : vector<8x32xf32>
    %482 = arith.addf %480, %481 : vector<8x32xf32>
    %483 = math.tanh %482 : vector<8x32xf32>
    %484 = arith.mulf %478, %483 : vector<8x32xf32>
    %485 = arith.negf %469 : vector<8x128xf32>
    %486 = math.exp %485 : vector<8x128xf32>
    %cst_138 = arith.constant 1.000000e+00 : f32
    %487 = vector.broadcast %cst_138 : f32 to vector<8x128xf32>
    %488 = arith.addf %487, %486 : vector<8x128xf32>
    %489 = arith.divf %487, %488 : vector<8x128xf32>
    %490 = math.tanh %469 : vector<8x128xf32>
    %491 = vector.extract_strided_slice %489 {offsets = [0, 0], sizes = [8, 32], strides = [1, 1]} : vector<8x128xf32> to vector<8x32xf32>
    %492 = vector.extract_strided_slice %489 {offsets = [0, 32], sizes = [8, 32], strides = [1, 1]} : vector<8x128xf32> to vector<8x32xf32>
    %493 = vector.extract_strided_slice %489 {offsets = [0, 96], sizes = [8, 32], strides = [1, 1]} : vector<8x128xf32> to vector<8x32xf32>
    %494 = vector.extract_strided_slice %490 {offsets = [0, 64], sizes = [8, 32], strides = [1, 1]} : vector<8x128xf32> to vector<8x32xf32>
    %495 = arith.mulf %492, %457 : vector<8x32xf32>
    %496 = arith.mulf %491, %494 : vector<8x32xf32>
    %497 = arith.addf %495, %496 : vector<8x32xf32>
    %498 = math.tanh %497 : vector<8x32xf32>
    %499 = arith.mulf %493, %498 : vector<8x32xf32>
    %500 = tpu.concatenate %484, %499 in 1 : vector<8x32xf32>, vector<8x32xf32> -> vector<8x64xf32>
    %501 = arith.maximumf %461, %484 : vector<8x32xf32>
    %502 = arith.maximumf %462, %499 : vector<8x32xf32>
    %cst_139 = arith.constant dense<0.000000e+00> : vector<8x256xf32>
    %503 = tpu.matmul %500, %341, %cst_139 {dimension_numbers = #tpu.dot_dimension_numbers<[1], [0], [0], [1], [0, 0, 1, 1], [], []>} : vector<8x64xf32>, vector<64x256xf32>, vector<8x256xf32> -> vector<8x256xf32>
    %c32_140 = arith.constant 32 : index
    %c0_141 = arith.constant 0 : index
    %504 = vector.load %arg11[%c32_140, %c0_141] : memref<64x256xf32, #tpu.memory_space<vmem>>, vector<8x128xf32>
    %505 = vector.extract_strided_slice %503 {offsets = [0, 0], sizes = [8, 128], strides = [1, 1]} : vector<8x256xf32> to vector<8x128xf32>
    %506 = arith.addf %504, %505 : vector<8x128xf32>
    %c24_142 = arith.constant 24 : index
    %c128_143 = arith.constant 128 : index
    %507 = vector.load %arg11[%c24_142, %c128_143] : memref<64x256xf32, #tpu.memory_space<vmem>>, vector<8x128xf32>
    %508 = vector.extract_strided_slice %503 {offsets = [0, 128], sizes = [8, 128], strides = [1, 1]} : vector<8x256xf32> to vector<8x128xf32>
    %509 = arith.addf %507, %508 : vector<8x128xf32>
    %510 = arith.negf %506 : vector<8x128xf32>
    %511 = math.exp %510 : vector<8x128xf32>
    %cst_144 = arith.constant 1.000000e+00 : f32
    %512 = vector.broadcast %cst_144 : f32 to vector<8x128xf32>
    %513 = arith.addf %512, %511 : vector<8x128xf32>
    %514 = arith.divf %512, %513 : vector<8x128xf32>
    %515 = math.tanh %506 : vector<8x128xf32>
    %516 = vector.extract_strided_slice %514 {offsets = [0, 0], sizes = [8, 32], strides = [1, 1]} : vector<8x128xf32> to vector<8x32xf32>
    %517 = vector.extract_strided_slice %514 {offsets = [0, 32], sizes = [8, 32], strides = [1, 1]} : vector<8x128xf32> to vector<8x32xf32>
    %518 = vector.extract_strided_slice %514 {offsets = [0, 96], sizes = [8, 32], strides = [1, 1]} : vector<8x128xf32> to vector<8x32xf32>
    %519 = vector.extract_strided_slice %515 {offsets = [0, 64], sizes = [8, 32], strides = [1, 1]} : vector<8x128xf32> to vector<8x32xf32>
    %520 = arith.mulf %517, %482 : vector<8x32xf32>
    %521 = arith.mulf %516, %519 : vector<8x32xf32>
    %522 = arith.addf %520, %521 : vector<8x32xf32>
    %523 = math.tanh %522 : vector<8x32xf32>
    %524 = arith.mulf %518, %523 : vector<8x32xf32>
    %525 = arith.negf %509 : vector<8x128xf32>
    %526 = math.exp %525 : vector<8x128xf32>
    %cst_145 = arith.constant 1.000000e+00 : f32
    %527 = vector.broadcast %cst_145 : f32 to vector<8x128xf32>
    %528 = arith.addf %527, %526 : vector<8x128xf32>
    %529 = arith.divf %527, %528 : vector<8x128xf32>
    %530 = math.tanh %509 : vector<8x128xf32>
    %531 = vector.extract_strided_slice %529 {offsets = [0, 0], sizes = [8, 32], strides = [1, 1]} : vector<8x128xf32> to vector<8x32xf32>
    %532 = vector.extract_strided_slice %529 {offsets = [0, 32], sizes = [8, 32], strides = [1, 1]} : vector<8x128xf32> to vector<8x32xf32>
    %533 = vector.extract_strided_slice %529 {offsets = [0, 96], sizes = [8, 32], strides = [1, 1]} : vector<8x128xf32> to vector<8x32xf32>
    %534 = vector.extract_strided_slice %530 {offsets = [0, 64], sizes = [8, 32], strides = [1, 1]} : vector<8x128xf32> to vector<8x32xf32>
    %535 = arith.mulf %532, %497 : vector<8x32xf32>
    %536 = arith.mulf %531, %534 : vector<8x32xf32>
    %537 = arith.addf %535, %536 : vector<8x32xf32>
    %538 = math.tanh %537 : vector<8x32xf32>
    %539 = arith.mulf %533, %538 : vector<8x32xf32>
    %540 = tpu.concatenate %524, %539 in 1 : vector<8x32xf32>, vector<8x32xf32> -> vector<8x64xf32>
    %541 = arith.maximumf %501, %524 : vector<8x32xf32>
    %542 = arith.maximumf %502, %539 : vector<8x32xf32>
    %cst_146 = arith.constant dense<0.000000e+00> : vector<8x256xf32>
    %543 = tpu.matmul %540, %341, %cst_146 {dimension_numbers = #tpu.dot_dimension_numbers<[1], [0], [0], [1], [0, 0, 1, 1], [], []>} : vector<8x64xf32>, vector<64x256xf32>, vector<8x256xf32> -> vector<8x256xf32>
    %c40_147 = arith.constant 40 : index
    %c0_148 = arith.constant 0 : index
    %544 = vector.load %arg11[%c40_147, %c0_148] : memref<64x256xf32, #tpu.memory_space<vmem>>, vector<8x128xf32>
    %545 = vector.extract_strided_slice %543 {offsets = [0, 0], sizes = [8, 128], strides = [1, 1]} : vector<8x256xf32> to vector<8x128xf32>
    %546 = arith.addf %544, %545 : vector<8x128xf32>
    %c16_149 = arith.constant 16 : index
    %c128_150 = arith.constant 128 : index
    %547 = vector.load %arg11[%c16_149, %c128_150] : memref<64x256xf32, #tpu.memory_space<vmem>>, vector<8x128xf32>
    %548 = vector.extract_strided_slice %543 {offsets = [0, 128], sizes = [8, 128], strides = [1, 1]} : vector<8x256xf32> to vector<8x128xf32>
    %549 = arith.addf %547, %548 : vector<8x128xf32>
    %550 = arith.negf %546 : vector<8x128xf32>
    %551 = math.exp %550 : vector<8x128xf32>
    %cst_151 = arith.constant 1.000000e+00 : f32
    %552 = vector.broadcast %cst_151 : f32 to vector<8x128xf32>
    %553 = arith.addf %552, %551 : vector<8x128xf32>
    %554 = arith.divf %552, %553 : vector<8x128xf32>
    %555 = math.tanh %546 : vector<8x128xf32>
    %556 = vector.extract_strided_slice %554 {offsets = [0, 0], sizes = [8, 32], strides = [1, 1]} : vector<8x128xf32> to vector<8x32xf32>
    %557 = vector.extract_strided_slice %554 {offsets = [0, 32], sizes = [8, 32], strides = [1, 1]} : vector<8x128xf32> to vector<8x32xf32>
    %558 = vector.extract_strided_slice %554 {offsets = [0, 96], sizes = [8, 32], strides = [1, 1]} : vector<8x128xf32> to vector<8x32xf32>
    %559 = vector.extract_strided_slice %555 {offsets = [0, 64], sizes = [8, 32], strides = [1, 1]} : vector<8x128xf32> to vector<8x32xf32>
    %560 = arith.mulf %557, %522 : vector<8x32xf32>
    %561 = arith.mulf %556, %559 : vector<8x32xf32>
    %562 = arith.addf %560, %561 : vector<8x32xf32>
    %563 = math.tanh %562 : vector<8x32xf32>
    %564 = arith.mulf %558, %563 : vector<8x32xf32>
    %565 = arith.negf %549 : vector<8x128xf32>
    %566 = math.exp %565 : vector<8x128xf32>
    %cst_152 = arith.constant 1.000000e+00 : f32
    %567 = vector.broadcast %cst_152 : f32 to vector<8x128xf32>
    %568 = arith.addf %567, %566 : vector<8x128xf32>
    %569 = arith.divf %567, %568 : vector<8x128xf32>
    %570 = math.tanh %549 : vector<8x128xf32>
    %571 = vector.extract_strided_slice %569 {offsets = [0, 0], sizes = [8, 32], strides = [1, 1]} : vector<8x128xf32> to vector<8x32xf32>
    %572 = vector.extract_strided_slice %569 {offsets = [0, 32], sizes = [8, 32], strides = [1, 1]} : vector<8x128xf32> to vector<8x32xf32>
    %573 = vector.extract_strided_slice %569 {offsets = [0, 96], sizes = [8, 32], strides = [1, 1]} : vector<8x128xf32> to vector<8x32xf32>
    %574 = vector.extract_strided_slice %570 {offsets = [0, 64], sizes = [8, 32], strides = [1, 1]} : vector<8x128xf32> to vector<8x32xf32>
    %575 = arith.mulf %572, %537 : vector<8x32xf32>
    %576 = arith.mulf %571, %574 : vector<8x32xf32>
    %577 = arith.addf %575, %576 : vector<8x32xf32>
    %578 = math.tanh %577 : vector<8x32xf32>
    %579 = arith.mulf %573, %578 : vector<8x32xf32>
    %580 = tpu.concatenate %564, %579 in 1 : vector<8x32xf32>, vector<8x32xf32> -> vector<8x64xf32>
    %581 = arith.maximumf %541, %564 : vector<8x32xf32>
    %582 = arith.maximumf %542, %579 : vector<8x32xf32>
    %cst_153 = arith.constant dense<0.000000e+00> : vector<8x256xf32>
    %583 = tpu.matmul %580, %341, %cst_153 {dimension_numbers = #tpu.dot_dimension_numbers<[1], [0], [0], [1], [0, 0, 1, 1], [], []>} : vector<8x64xf32>, vector<64x256xf32>, vector<8x256xf32> -> vector<8x256xf32>
    %c48_154 = arith.constant 48 : index
    %c0_155 = arith.constant 0 : index
    %584 = vector.load %arg11[%c48_154, %c0_155] : memref<64x256xf32, #tpu.memory_space<vmem>>, vector<8x128xf32>
    %585 = vector.extract_strided_slice %583 {offsets = [0, 0], sizes = [8, 128], strides = [1, 1]} : vector<8x256xf32> to vector<8x128xf32>
    %586 = arith.addf %584, %585 : vector<8x128xf32>
    %c8_156 = arith.constant 8 : index
    %c128_157 = arith.constant 128 : index
    %587 = vector.load %arg11[%c8_156, %c128_157] : memref<64x256xf32, #tpu.memory_space<vmem>>, vector<8x128xf32>
    %588 = vector.extract_strided_slice %583 {offsets = [0, 128], sizes = [8, 128], strides = [1, 1]} : vector<8x256xf32> to vector<8x128xf32>
    %589 = arith.addf %587, %588 : vector<8x128xf32>
    %590 = arith.negf %586 : vector<8x128xf32>
    %591 = math.exp %590 : vector<8x128xf32>
    %cst_158 = arith.constant 1.000000e+00 : f32
    %592 = vector.broadcast %cst_158 : f32 to vector<8x128xf32>
    %593 = arith.addf %592, %591 : vector<8x128xf32>
    %594 = arith.divf %592, %593 : vector<8x128xf32>
    %595 = math.tanh %586 : vector<8x128xf32>
    %596 = vector.extract_strided_slice %594 {offsets = [0, 0], sizes = [8, 32], strides = [1, 1]} : vector<8x128xf32> to vector<8x32xf32>
    %597 = vector.extract_strided_slice %594 {offsets = [0, 32], sizes = [8, 32], strides = [1, 1]} : vector<8x128xf32> to vector<8x32xf32>
    %598 = vector.extract_strided_slice %594 {offsets = [0, 96], sizes = [8, 32], strides = [1, 1]} : vector<8x128xf32> to vector<8x32xf32>
    %599 = vector.extract_strided_slice %595 {offsets = [0, 64], sizes = [8, 32], strides = [1, 1]} : vector<8x128xf32> to vector<8x32xf32>
    %600 = arith.mulf %597, %562 : vector<8x32xf32>
    %601 = arith.mulf %596, %599 : vector<8x32xf32>
    %602 = arith.addf %600, %601 : vector<8x32xf32>
    %603 = math.tanh %602 : vector<8x32xf32>
    %604 = arith.mulf %598, %603 : vector<8x32xf32>
    %605 = arith.negf %589 : vector<8x128xf32>
    %606 = math.exp %605 : vector<8x128xf32>
    %cst_159 = arith.constant 1.000000e+00 : f32
    %607 = vector.broadcast %cst_159 : f32 to vector<8x128xf32>
    %608 = arith.addf %607, %606 : vector<8x128xf32>
    %609 = arith.divf %607, %608 : vector<8x128xf32>
    %610 = math.tanh %589 : vector<8x128xf32>
    %611 = vector.extract_strided_slice %609 {offsets = [0, 0], sizes = [8, 32], strides = [1, 1]} : vector<8x128xf32> to vector<8x32xf32>
    %612 = vector.extract_strided_slice %609 {offsets = [0, 32], sizes = [8, 32], strides = [1, 1]} : vector<8x128xf32> to vector<8x32xf32>
    %613 = vector.extract_strided_slice %609 {offsets = [0, 96], sizes = [8, 32], strides = [1, 1]} : vector<8x128xf32> to vector<8x32xf32>
    %614 = vector.extract_strided_slice %610 {offsets = [0, 64], sizes = [8, 32], strides = [1, 1]} : vector<8x128xf32> to vector<8x32xf32>
    %615 = arith.mulf %612, %577 : vector<8x32xf32>
    %616 = arith.mulf %611, %614 : vector<8x32xf32>
    %617 = arith.addf %615, %616 : vector<8x32xf32>
    %618 = math.tanh %617 : vector<8x32xf32>
    %619 = arith.mulf %613, %618 : vector<8x32xf32>
    %620 = tpu.concatenate %604, %619 in 1 : vector<8x32xf32>, vector<8x32xf32> -> vector<8x64xf32>
    %621 = arith.maximumf %581, %604 : vector<8x32xf32>
    %622 = arith.maximumf %582, %619 : vector<8x32xf32>
    %cst_160 = arith.constant dense<0.000000e+00> : vector<8x256xf32>
    %623 = tpu.matmul %620, %341, %cst_160 {dimension_numbers = #tpu.dot_dimension_numbers<[1], [0], [0], [1], [0, 0, 1, 1], [], []>} : vector<8x64xf32>, vector<64x256xf32>, vector<8x256xf32> -> vector<8x256xf32>
    %c56_161 = arith.constant 56 : index
    %c0_162 = arith.constant 0 : index
    %624 = vector.load %arg11[%c56_161, %c0_162] : memref<64x256xf32, #tpu.memory_space<vmem>>, vector<8x128xf32>
    %625 = vector.extract_strided_slice %623 {offsets = [0, 0], sizes = [8, 128], strides = [1, 1]} : vector<8x256xf32> to vector<8x128xf32>
    %626 = arith.addf %624, %625 : vector<8x128xf32>
    %c0_163 = arith.constant 0 : index
    %c128_164 = arith.constant 128 : index
    %627 = vector.load %arg11[%c0_163, %c128_164] : memref<64x256xf32, #tpu.memory_space<vmem>>, vector<8x128xf32>
    %628 = vector.extract_strided_slice %623 {offsets = [0, 128], sizes = [8, 128], strides = [1, 1]} : vector<8x256xf32> to vector<8x128xf32>
    %629 = arith.addf %627, %628 : vector<8x128xf32>
    %630 = arith.negf %626 : vector<8x128xf32>
    %631 = math.exp %630 : vector<8x128xf32>
    %cst_165 = arith.constant 1.000000e+00 : f32
    %632 = vector.broadcast %cst_165 : f32 to vector<8x128xf32>
    %633 = arith.addf %632, %631 : vector<8x128xf32>
    %634 = arith.divf %632, %633 : vector<8x128xf32>
    %635 = math.tanh %626 : vector<8x128xf32>
    %636 = vector.extract_strided_slice %634 {offsets = [0, 0], sizes = [8, 32], strides = [1, 1]} : vector<8x128xf32> to vector<8x32xf32>
    %637 = vector.extract_strided_slice %634 {offsets = [0, 32], sizes = [8, 32], strides = [1, 1]} : vector<8x128xf32> to vector<8x32xf32>
    %638 = vector.extract_strided_slice %634 {offsets = [0, 96], sizes = [8, 32], strides = [1, 1]} : vector<8x128xf32> to vector<8x32xf32>
    %639 = vector.extract_strided_slice %635 {offsets = [0, 64], sizes = [8, 32], strides = [1, 1]} : vector<8x128xf32> to vector<8x32xf32>
    %640 = arith.mulf %637, %602 : vector<8x32xf32>
    %641 = arith.mulf %636, %639 : vector<8x32xf32>
    %642 = arith.addf %640, %641 : vector<8x32xf32>
    %643 = math.tanh %642 : vector<8x32xf32>
    %644 = arith.mulf %638, %643 : vector<8x32xf32>
    %645 = arith.negf %629 : vector<8x128xf32>
    %646 = math.exp %645 : vector<8x128xf32>
    %cst_166 = arith.constant 1.000000e+00 : f32
    %647 = vector.broadcast %cst_166 : f32 to vector<8x128xf32>
    %648 = arith.addf %647, %646 : vector<8x128xf32>
    %649 = arith.divf %647, %648 : vector<8x128xf32>
    %650 = math.tanh %629 : vector<8x128xf32>
    %651 = vector.extract_strided_slice %649 {offsets = [0, 0], sizes = [8, 32], strides = [1, 1]} : vector<8x128xf32> to vector<8x32xf32>
    %652 = vector.extract_strided_slice %649 {offsets = [0, 32], sizes = [8, 32], strides = [1, 1]} : vector<8x128xf32> to vector<8x32xf32>
    %653 = vector.extract_strided_slice %649 {offsets = [0, 96], sizes = [8, 32], strides = [1, 1]} : vector<8x128xf32> to vector<8x32xf32>
    %654 = vector.extract_strided_slice %650 {offsets = [0, 64], sizes = [8, 32], strides = [1, 1]} : vector<8x128xf32> to vector<8x32xf32>
    %655 = arith.mulf %652, %617 : vector<8x32xf32>
    %656 = arith.mulf %651, %654 : vector<8x32xf32>
    %657 = arith.addf %655, %656 : vector<8x32xf32>
    %658 = math.tanh %657 : vector<8x32xf32>
    %659 = arith.mulf %653, %658 : vector<8x32xf32>
    %660 = arith.maximumf %621, %644 : vector<8x32xf32>
    %661 = arith.maximumf %622, %659 : vector<8x32xf32>
    %c0_167 = arith.constant 0 : index
    %c0_168 = arith.constant 0 : index
    %662 = vector.load %arg8[%c0_167, %c0_168] : memref<64x2xf32, #tpu.memory_space<vmem>>, vector<32x2xf32>
    %cst_169 = arith.constant dense<0.000000e+00> : vector<8x2xf32>
    %663 = tpu.matmul %660, %662, %cst_169 {dimension_numbers = #tpu.dot_dimension_numbers<[1], [0], [0], [1], [0, 0, 1, 1], [], []>} : vector<8x32xf32>, vector<32x2xf32>, vector<8x2xf32> -> vector<8x2xf32>
    %c32_170 = arith.constant 32 : index
    %c0_171 = arith.constant 0 : index
    %664 = vector.load %arg8[%c32_170, %c0_171] : memref<64x2xf32, #tpu.memory_space<vmem>>, vector<32x2xf32>
    %cst_172 = arith.constant dense<0.000000e+00> : vector<8x2xf32>
    %665 = tpu.matmul %661, %664, %cst_172 {dimension_numbers = #tpu.dot_dimension_numbers<[1], [0], [0], [1], [0, 0, 1, 1], [], []>} : vector<8x32xf32>, vector<32x2xf32>, vector<8x2xf32> -> vector<8x2xf32>
    %666 = arith.addf %663, %665 : vector<8x2xf32>
    %c0_173 = arith.constant 0 : index
    %c0_174 = arith.constant 0 : index
    %667 = vector.load %arg9[%c0_173, %c0_174] : memref<1x2xf32, #tpu.memory_space<vmem>>, vector<1x2xf32>
    %668 = vector.broadcast %667 : vector<1x2xf32> to vector<8x2xf32>
    %669 = arith.addf %666, %668 : vector<8x2xf32>
    %c0_175 = arith.constant 0 : index
    %c0_176 = arith.constant 0 : index
    %670 = vector.load %arg10[%c0_175, %c0_176] : memref<8x2xf32, #tpu.memory_space<vmem>>, vector<8x2xf32>
    tpu.vector_store %arg10[%c0_175, %c0_176], %669 {strides = array<i32>} : memref<8x2xf32, #tpu.memory_space<vmem>>, vector<8x2xf32>,
    return
  }
  func.func @transform_0(%arg0: i32) -> (i32, i32) {
    %c0_i32 = arith.constant 0 : i32
    %c0_i32_0 = arith.constant 0 : i32
    %c0_i32_1 = arith.constant 0 : i32
    return %c0_i32, %c0_i32_0 : i32, i32
  }
  func.func @transform_1(%arg0: i32) -> (i32, i32) {
    %c0_i32 = arith.constant 0 : i32
    %c0_i32_0 = arith.constant 0 : i32
    %c0_i32_1 = arith.constant 0 : i32
    return %c0_i32, %c0_i32_0 : i32, i32
  }
  func.func @transform_2(%arg0: i32) -> (i32, i32) {
    %c0_i32 = arith.constant 0 : i32
    %c0_i32_0 = arith.constant 0 : i32
    %c0_i32_1 = arith.constant 0 : i32
    return %c0_i32, %c0_i32_0 : i32, i32
  }
  func.func @transform_3(%arg0: i32) -> (i32, i32) {
    %c0_i32 = arith.constant 0 : i32
    %c0_i32_0 = arith.constant 0 : i32
    %c0_i32_1 = arith.constant 0 : i32
    return %c0_i32, %c0_i32_0 : i32, i32
  }
  func.func @transform_4(%arg0: i32) -> (i32, i32) {
    %c0_i32 = arith.constant 0 : i32
    %c0_i32_0 = arith.constant 0 : i32
    %c0_i32_1 = arith.constant 0 : i32
    return %c0_i32, %c0_i32_0 : i32, i32
  }
  func.func @transform_5(%arg0: i32) -> (i32, i32) {
    %c0_i32 = arith.constant 0 : i32
    %c0_i32_0 = arith.constant 0 : i32
    %c0_i32_1 = arith.constant 0 : i32
    return %c0_i32, %c0_i32_0 : i32, i32
  }
  func.func @transform_6(%arg0: i32) -> (i32, i32) {
    %c0_i32 = arith.constant 0 : i32
    %c0_i32_0 = arith.constant 0 : i32
    %c0_i32_1 = arith.constant 0 : i32
    return %c0_i32, %c0_i32_0 : i32, i32
  }
  func.func @transform_7(%arg0: i32) -> (i32, i32) {
    %c0_i32 = arith.constant 0 : i32
    %c0_i32_0 = arith.constant 0 : i32
    %c0_i32_1 = arith.constant 0 : i32
    return %c0_i32, %c0_i32_0 : i32, i32
  }
  func.func @transform_8(%arg0: i32) -> (i32, i32) {
    %c0_i32 = arith.constant 0 : i32
    %c0_i32_0 = arith.constant 0 : i32
    %c0_i32_1 = arith.constant 0 : i32
    return %c0_i32, %c0_i32_0 : i32, i32
  }
  func.func @transform_9(%arg0: i32) -> (i32, i32) {
    %c0_i32 = arith.constant 0 : i32
    %c0_i32_0 = arith.constant 0 : i32
    %c0_i32_1 = arith.constant 0 : i32
    return %c0_i32, %c0_i32_0 : i32, i32
  }
}

</mosaic_0001>

<bundles_post_ra>
// kernel: bilstm_forward.1
= control target key start
LH: loop header
LB: loop body
LE: loop exit
PB: predicated region body
PF: predicated region fallthrough
CT: control target
= control target key end

     0   :  { %v3634_v3 = vmov 0.0   ;;  %vm56_vm0 = vcmask 130048   ;;  %v46_v39 = vlaneseq  ;;  %vm361_vm1 = vcmask 261120   ;;  %s4480_s1 = inlined_call_operand.vmem [shape: f32[16,256], index: 1, kind: input, shape index: {}]   ;;  %s4481_s3 = inlined_call_operand.vmem [shape: f32[64,256], index: 3, kind: input, shape index: {}]   ;;  %s4482_s0 = inlined_call_operand.vmem [shape: f32[64,16], index: 0, kind: input, shape index: {}]   ;;  %s4483_s2 = inlined_call_operand.vmem [shape: f32[1,256], index: 2, kind: input, shape index: {}]   ;;  %s4484_s4 = inlined_call_operand.vmem [shape: f32[64,256], index: 4, kind: input, shape index: {}]   ;;  %s4485_s6 = inlined_call_operand.vmem [shape: f32[64,256], index: 6, kind: input, shape index: {}]   ;;  %s4486_s5 = inlined_call_operand.vmem [shape: f32[1,256], index: 5, kind: input, shape index: {}]   ;;  %s4487_s7 = inlined_call_operand.vmem [shape: f32[64,2], index: 7, kind: input, shape index: {}]   ;;  %s4488_s8 = inlined_call_operand.vmem [shape: f32[1,2], index: 8, kind: input, shape index: {}]   ;;  %s4489_s9 = inlined_call_operand.vmem [shape: f32[8,2], index: 9, kind: output, shape index: {}]  }
   0x1   :  { %v42_v0 = vld [vmem:[%s4480_s1 + $0x8] sm:$0xff]  ;;  %v44_v1 = vld [vmem:[%s4480_s1 + $0x18] sm:$0xff]  ;;  %145 = vmatprep.mubr.f32.mxu0 %v3634_v3  ;;  %294 = vmatprep.mubr.f32.mxu1 %v3634_v3  ;;  %v41_v6 = vld [vmem:[%s4480_s1] sm:$0xff]  ;;  %vm226_vm2 = vcmask 523264   ;;  %vm3638_vm3 = vmmov 0   ;;  %vm2958_vm4 = vcmask 15360  }
   0x2   :  { %v211_v2 = vld [vmem:[%s4481_s3 + $0x8] sm:$0xff]  ;;  %v3069_v4 = vpack.c.bf16 %v44_v1, %v42_v0  ;;  %v213_v5 = vld [vmem:[%s4481_s3 + $0x18] sm:$0xff]  ;;  %v43_v7 = vld [vmem:[%s4480_s1 + $0x10] sm:$0xff]  ;;  %v3835_v40 = vshrl.u32 %v46_v39, 7 }
   0x3   :  { %v3709_v8 = vpack.c.bf16 %v213_v5, %v211_v2  ;;  %v3071_v9 = vpack.c.bf16 %v43_v7, %v41_v6  ;;  %v210_v10 = vld [vmem:[%s4481_s3] sm:$0xff]  ;;  %v212_v11 = vld [vmem:[%s4481_s3 + $0x10] sm:$0xff]  ;;  %v215_v13 = vld [vmem:[%s4481_s3 + $0x28] sm:$0xff] }
   0x4   :  { %3070 = vmatprep.subr.bf16.mxu0 %v3069_v4  ;;  %v3717_v12 = vpack.c.bf16 %v212_v11, %v210_v10  ;;  %v217_v14 = vld [vmem:[%s4481_s3 + $0x38] sm:$0xff]  ;;  %v214_v15 = vld [vmem:[%s4481_s3 + $0x20] sm:$0xff]  ;;  %v216_v18 = vld [vmem:[%s4481_s3 + $0x30] sm:$0xff]  ;;  %v52_v41 = vsub.s32 1, %v3835_v40  ;;  %v48_v44 = vsub.s32 0, %v3835_v40 }
   0x5   :  { %3074 = vmatprep.subr.bf16.mxu1 %v3709_v8  ;;  %3072 = vmatpush1.bf16.msra.mxu0 %v3071_v9  ;;  %v33_v16 = vld [vmem:[%s4482_s0] sm:$0xff]  ;;  %v3732_v17 = vpack.c.bf16 %v217_v14, %v215_v13  ;;  %v219_v19 = vld [vmem:[%s4481_s3 + $0x48] sm:$0xff]  ;;  %v3741_v20 = vpack.c.bf16 %v216_v18, %v214_v15  ;;  %v221_v21 = vld [vmem:[%s4481_s3 + $0x58] sm:$0xff] }
   0x6   :  { %3076 = vmatpush1.bf16.msra.mxu1 %v3717_v12  ;;  %3106 = vmatprep.subr.bf16.mxu0 %v3709_v8  ;;  %v3748_v22 = vpack.c.bf16 %v221_v21, %v219_v19  ;;  %v218_v23 = vld [vmem:[%s4481_s3 + $0x40] sm:$0xff]  ;;  %v220_v24 = vld [vmem:[%s4481_s3 + $0x50] sm:$0xff]  ;;  %v223_v25 = vld [vmem:[%s4481_s3 + $0x68] sm:$0xff] }
   0x7   :  { %3078 = vmatprep.subr.bf16.mxu1 %v3732_v17  ;;  %v225_v26 = vld [vmem:[%s4481_s3 + $0x78] sm:$0xff]  ;;  %v34_v27 = vld [vmem:[%s4482_s0 + $0x8] sm:$0xff]  ;;  %v3769_v28 = vpack.c.bf16 %v220_v24, %v218_v23  ;;  %v222_v30 = vld [vmem:[%s4481_s3 + $0x60] sm:$0xff] }
   0x8   :  { %2964 = vmatmul.mubr.msk.f32.vlgmr.msra.gmra.mrb[0].mxu0 %vm56_vm0, %v33_v16  ;;  %v3773_v29 = vpack.c.bf16 %v225_v26, %v223_v25  ;;  %v224_v31 = vld [vmem:[%s4481_s3 + $0x70] sm:$0xff]  ;;  %v36_v34 = vld [vmem:[%s4482_s0 + $0x18] sm:$0xff]  ;;  %v37_v35 = vld [vmem:[%s4482_s0 + $0x20] sm:$0xff] }
   0x9   :  { %151 = vmatprep.mubr.f32.mxu0 %v3634_v3  ;;  %3108 = vmatpush1.bf16.msra.mxu0 %v3717_v12  ;;  %v35_v32 = vld [vmem:[%s4482_s0 + $0x10] sm:$0xff]  ;;  %v3788_v33 = vpack.c.bf16 %v224_v31, %v222_v30  ;;  %v38_v36 = vld [vmem:[%s4482_s0 + $0x28] sm:$0xff]  ;;  %v40_v38 = vld [vmem:[%s4482_s0 + $0x38] sm:$0xff] }
   0xa   :  { %3080 = vmatpush1.bf16.msra.mxu1 %v3741_v20  ;;  %3110 = vmatprep.subr.bf16.mxu0 %v3732_v17  ;;  %v39_v37 = vld [vmem:[%s4482_s0 + $0x30] sm:$0xff]  ;;  %v32_v42 = vld [vmem:[%s4483_s2] sm:$0x3]  ;;  %s3635_s0 = smov 64   ;;  %s3636_s2 = smov 32  }
   0xb   :  { %3082 = vmatprep.subr.bf16.mxu1 %v3748_v22  ;;  %v53_v43 = vrot.slane %v32_v42, %v52_v41  ;;  %v49_v48 = vrot.slane %v32_v42, %v48_v44 }
   0xc   :  { %2965 = vmatmul.mubr.msk.f32.gmra.mrb[2].mxu0 %vm56_vm0, %v34_v27 }
   0xd   :  { %157 = vmatprep.mubr.f32.mxu0 %v3634_v3  ;;  %3112 = vmatpush1.bf16.msra.mxu0 %v3741_v20 }
   0xe   :  { %3084 = vmatpush1.bf16.msra.mxu1 %v3769_v28  ;;  %3114 = vmatprep.subr.bf16.mxu0 %v3748_v22 }
   0xf   :  { %3086 = vmatprep.subr.bf16.mxu1 %v3773_v29 }
  0x10   :  { %2966 = vmatmul.mubr.msk.f32.gmra.mrb[4].mxu0 %vm56_vm0, %v35_v32 }
  0x11   :  { %163 = vmatprep.mubr.f32.mxu0 %v3634_v3  ;;  %3116 = vmatpush1.bf16.msra.mxu0 %v3769_v28 }
  0x12   :  { %3088 = vmatpush1.bf16.msra.mxu1 %v3788_v33  ;;  %3118 = vmatprep.subr.bf16.mxu0 %v3773_v29 }
  0x13   :  { %3090 = vmatprep.subr.bf16.mxu1 %v3709_v8 }
  0x14   :  { %2967 = vmatmul.mubr.msk.f32.gmra.mrb[6].mxu0 %vm56_vm0, %v36_v34 }
  0x15   :  { %295 = vmatmul.mubr.f32.vlgmr.msra.gmra.mrb[0].mxu1 %v3634_v3  ;;  %169 = vmatprep.mubr.f32.mxu0 %v3634_v3 }
  0x16   :  { %3092 = vmatpush1.bf16.msra.mxu1 %v3717_v12  ;;  %435 = vmatprep.mubr.f32.mxu1 %v3634_v3 }
  0x17   :  { %3094 = vmatprep.subr.bf16.mxu1 %v3732_v17  ;;  %3120 = vmatpush1.bf16.msra.mxu0 %v3788_v33 }
  0x18   :  { %2968 = vmatmul.mubr.msk.f32.gmra.mrb[8].mxu0 %vm56_vm0, %v37_v35  ;;  %3138 = vmatprep.subr.bf16.mxu0 %v3709_v8 }
  0x19   :  { %175 = vmatprep.mubr.f32.mxu0 %v3634_v3 }
  0x1a   :  { %3096 = vmatpush1.bf16.msra.mxu1 %v3741_v20 }
  0x1b   :  { %3098 = vmatprep.subr.bf16.mxu1 %v3748_v22 }
  0x1c   :  { %2969 = vmatmul.mubr.msk.f32.gmra.mrb[10].mxu0 %vm56_vm0, %v38_v36 }
  0x1d   :  { %181 = vmatprep.mubr.f32.mxu0 %v3634_v3 }
  0x1e   :  { %3100 = vmatpush1.bf16.msra.mxu1 %v3769_v28 }
  0x1f   :  { %3102 = vmatprep.subr.bf16.mxu1 %v3773_v29 }
  0x20   :  { %2970 = vmatmul.mubr.msk.f32.gmra.mrb[12].mxu0 %vm56_vm0, %v39_v37 }
  0x21   :  { %187 = vmatprep.mubr.f32.mxu0 %v3634_v3 }
  0x22   :  { %3104 = vmatpush1.bf16.msra.mxu1 %v3788_v33 }
  0x23   :  { %3122 = vmatprep.subr.bf16.mxu1 %v3709_v8 }
  0x24   :  { %2971 = vmatmul.mubr.msk.f32.gmra.mrb[14].mxu0 %vm56_vm0, %v40_v38 }
  0x25   :  { %575 = vmatprep.mubr.f32.mxu0 %v3634_v3 }
  0xdb   :  { %v147_v45 = vpop.f32.mrb[0].mxu0 }
  0xdc   :  { %v149_v46 = vpop.f32.mrb[1].mxu0  ;;  %v148_v57 = vadd.f32 %v147_v45, %v49_v48 }
  0xdd   :  { %v3844_v47 = vadd.f32 %v149_v46, %v53_v43 }
  0xdf   :  { %v153_v49 = vpop.f32.mrb[2].mxu0 }
  0xe0   :  { %v3848_v50 = vadd.f32 %v153_v49, %v49_v48  ;;  %v155_v51 = vpop.f32.mrb[3].mxu0 }
  0xe1   :  { %v3850_v52 = vadd.f32 %v155_v51, %v53_v43 }
  0xe3   :  { %v159_v53 = vpop.f32.mrb[4].mxu0 }
  0xe4   :  { %v3852_v54 = vadd.f32 %v159_v53, %v49_v48  ;;  %v161_v55 = vpop.f32.mrb[5].mxu0 }
  0xe5   :  { %v3854_v56 = vadd.f32 %v161_v55, %v53_v43 }
  0xe7   :  { %v165_v58 = vpop.f32.mrb[6].mxu0 }
  0xe8   :  { %v3856_v59 = vadd.f32 %v165_v58, %v49_v48  ;;  %v296_v60 = vpop.f32.mrb[0].mxu1  ;;  %v167_v61 = vpop.f32.mrb[7].mxu0 }
  0xe9   :  { %v302_v62 = vadd.f32 %v296_v60, %v148_v57  ;;  %v3858_v63 = vadd.f32 %v167_v61, %v53_v43  ;;  %v298_v0 = vpop.f32.mrb[1].mxu1 }
  0xeb   :  { %3378 = vtanh.f32 %v302_v62  ;;  %v171_v1 = vpop.f32.mrb[8].mxu0  ;;  %v2972_v26 = vmul.f32 -1.442695, %v302_v62 }
  0xec   :  { %v3860_v2 = vadd.f32 %v171_v1, %v49_v48  ;;  %v173_v4 = vpop.f32.mrb[9].mxu0 }
  0xed   :  { %v3862_v5 = vadd.f32 %v173_v4, %v53_v43 }
  0xef   :  { %v177_v6 = vpop.f32.mrb[10].mxu0 }
  0xf0   :  { %v3864_v7 = vadd.f32 %v177_v6, %v49_v48  ;;  %v179_v9 = vpop.f32.mrb[11].mxu0 }
  0xf1   :  { %v3866_v10 = vadd.f32 %v179_v9, %v53_v43 }
  0xf3   :  { %v183_v11 = vpop.f32.mrb[12].mxu0 }
  0xf4   :  { %v3868_v13 = vadd.f32 %v183_v11, %v49_v48  ;;  %v185_v14 = vpop.f32.mrb[13].mxu0 }
  0xf5   :  { %v3379_v15 = vpop.eup %3378  ;;  %v3870_v16 = vadd.f32 %v185_v14, %v53_v43 }
  0xf6   :  { %314 = vrot.lane.b32.xlu0 %v3379_v15, %s3635_s0 }
  0xf7   :  { %v189_v18 = vpop.f32.mrb[14].mxu0 }
  0xf8   :  { %v3873_v19 = vadd.f32 %v189_v18, %v49_v48  ;;  %v191_v21 = vpop.f32.mrb[15].mxu0 }
  0xf9   :  { %v192_v23 = vadd.f32 %v191_v21, %v53_v43 }
  0xfb   :  { %v304_v24 = vadd.f32 %v298_v0, %v192_v23 }
  0xfd   :  { %3380 = vtanh.f32 %v304_v24  ;;  %v2973_v31 = vmul.f32 -1.442695, %v304_v24 }
  0xfe   :  { %3382 = vpow2.f32 %v2972_v26 }
 0x107   :  { %v3381_v25 = vpop.eup %3380 }
 0x108   :  { %338 = vrot.lane.b32.xlu0 %v3381_v25, %s3635_s0  ;;  %v3383_v27 = vpop.eup %3382 }
 0x109   :  { %v308_v30 = vadd.f32 1.0, %v3383_v27 }
 0x10b   :  { %3384 = vrcp.f32 %v308_v30 }
 0x10c   :  { %3386 = vpow2.f32 %v2973_v31 }
 0x115   :  { %v3385_v32 = vpop.eup %3384 }
 0x116   :  { %v3387_v35 = vpop.eup %3386  ;;  %v312_v43 = vmul.f32 0.0, %v3385_v32 }
 0x117   :  { %v332_v37 = vadd.f32 1.0, %v3387_v35 }
 0x119   :  { %3388 = vrcp.f32 %v332_v37 }
 0x123   :  { %v3389_v38 = vpop.eup %3388 }
 0x124   :  { %v336_v49 = vmul.f32 0.0, %v3389_v38 }
 0x168   :  { %v315_v34 = vpop.permute.xlu0 %314 }
 0x169   :  { %v317_v36 = vmul.f32 %v3385_v32, %v315_v34 }
 0x16b   :  { %319 = vrot.lane.b32.xlu1 %v317_v36, %s3636_s2 }
 0x17a   :  { %v339_v39 = vpop.permute.xlu0 %338 }
 0x17b   :  { %v341_v42 = vmul.f32 %v3389_v38, %v339_v39 }
 0x17d   :  { %343 = vrot.lane.b32.xlu1 %v341_v42, %s3636_s2 }
 0x1dd   :  { %v320_v45 = vpop.permute.xlu1 %319 }
 0x1de   :  { %v322_v46 = vadd.f32 %v320_v45, %v312_v43 }
 0x1e0   :  { %3390 = vtanh.f32 %v322_v46 }
 0x1ea   :  { %v3391_v48 = vpop.eup %3390 }
 0x1eb   :  { %325 = vrot.lane.b32.xlu0 %v3391_v48, %s3635_s0 }
 0x1ef   :  { %v344_v51 = vpop.permute.xlu1 %343 }
 0x1f0   :  { %v346_v53 = vadd.f32 %v344_v51, %v336_v49 }
 0x1f2   :  { %3392 = vtanh.f32 %v346_v53 }
 0x1fc   :  { %v3393_v55 = vpop.eup %3392 }
 0x1fd   :  { %349 = vrot.lane.b32.xlu1 %v3393_v55, %s3635_s0 }
 0x25d   :  { %v326_v57 = vpop.permute.xlu0 %325 }
 0x25e   :  { %v328_v58 = vmul.f32 %v3385_v32, %v326_v57 }
 0x260   :  { %354 = vrot.lane.b32.xlu0 %v328_v58, %s3636_s2 }
 0x26f   :  { %v350_v60 = vpop.permute.xlu1 %349 }
 0x270   :  { %v3881_v61 = vmul.f32 %v3389_v38, %v350_v60 }
 0x272   :  { %358 = vrot.lane.b32.xlu1 %v3881_v61, %s3635_s0 }
 0x2d2   :  { %v355_v62 = vpop.permute.xlu0 %354 }
 0x2d3   :  { %363 = vst.msk [vmem:[#allocation3] sm:$0xff] %vm361_vm1, %v355_v62 }
 0x2e4   :  { %v359_v0 = vpop.permute.xlu1 %358 }
 0x2e5   :  { %v362_v1 = vsel %vm361_vm1, %v355_v62, %v359_v0 }
 0x2e6   :  { %2974 = vmatmul.mubr.msk.f32.vlgmr.msra.gmra.mrb[2].mxu1 %vm226_vm2, %v362_v1 }
 0x2e7   :  { %3124 = vmatpush1.bf16.msra.mxu1 %v3717_v12  ;;  %715 = vmatprep.mubr.f32.mxu1 %v3634_v3 }
 0x2e8   :  { %3126 = vmatprep.subr.bf16.mxu1 %v3732_v17 }
 0x2eb   :  { %3128 = vmatpush1.bf16.msra.mxu1 %v3741_v20 }
 0x2ec   :  { %3130 = vmatprep.subr.bf16.mxu1 %v3748_v22 }
 0x2ef   :  { %3132 = vmatpush1.bf16.msra.mxu1 %v3769_v28 }
 0x2f0   :  { %3134 = vmatprep.subr.bf16.mxu1 %v3773_v29 }
 0x2f3   :  { %3136 = vmatpush1.bf16.msra.mxu1 %v3788_v33 }
 0x2f4   :  { %3154 = vmatprep.subr.bf16.mxu1 %v3709_v8 }
 0x3b9   :  { %v437_v4 = vpop.f32.mrb[2].mxu1 }
 0x3ba   :  { %v443_v6 = vadd.f32 %v437_v4, %v3848_v50  ;;  %v439_v9 = vpop.f32.mrb[3].mxu1 }
 0x3bb   :  { %v445_v11 = vadd.f32 %v439_v9, %v3870_v16 }
 0x3bc   :  { %3394 = vtanh.f32 %v443_v6  ;;  %v2975_v18 = vmul.f32 -1.442695, %v443_v6 }
 0x3bd   :  { %3396 = vtanh.f32 %v445_v11  ;;  %v2976_v21 = vmul.f32 -1.442695, %v445_v11 }
 0x3be   :  { %3398 = vpow2.f32 %v2975_v18 }
 0x3bf   :  { %3400 = vpow2.f32 %v2976_v21 }
 0x3c6   :  { %v3395_v14 = vpop.eup %3394 }
 0x3c7   :  { %v3397_v15 = vpop.eup %3396  ;;  %455 = vrot.lane.b32.xlu0 %v3395_v14, %s3635_s0 }
 0x3c8   :  { %479 = vrot.lane.b32.xlu1 %v3397_v15, %s3635_s0  ;;  %v3399_v23 = vpop.eup %3398 }
 0x3c9   :  { %v3401_v24 = vpop.eup %3400  ;;  %v449_v25 = vadd.f32 1.0, %v3399_v23 }
 0x3ca   :  { %v473_v26 = vadd.f32 1.0, %v3401_v24 }
 0x3cb   :  { %3402 = vrcp.f32 %v449_v25 }
 0x3cc   :  { %3404 = vrcp.f32 %v473_v26 }
 0x3d5   :  { %v3403_v50 = vpop.eup %3402 }
 0x3d6   :  { %v3405_v27 = vpop.eup %3404  ;;  %v453_v34 = vmul.f32 %v3403_v50, %v322_v46 }
 0x3d7   :  { %v477_v36 = vmul.f32 %v3405_v27, %v346_v53 }
 0x439   :  { %v456_v16 = vpop.permute.xlu0 %455 }
 0x43a   :  { %v458_v30 = vmul.f32 %v3403_v50, %v456_v16  ;;  %v480_v31 = vpop.permute.xlu1 %479 }
 0x43b   :  { %v482_v32 = vmul.f32 %v3405_v27, %v480_v31 }
 0x43c   :  { %460 = vrot.lane.b32.xlu0 %v458_v30, %s3636_s2 }
 0x43d   :  { %484 = vrot.lane.b32.xlu1 %v482_v32, %s3636_s2 }
 0x4ae   :  { %v461_v35 = vpop.permute.xlu0 %460 }
 0x4af   :  { %v463_v37 = vadd.f32 %v461_v35, %v453_v34  ;;  %v485_v38 = vpop.permute.xlu1 %484 }
 0x4b0   :  { %v487_v39 = vadd.f32 %v485_v38, %v477_v36 }
 0x4b1   :  { %3406 = vtanh.f32 %v463_v37 }
 0x4b2   :  { %3408 = vtanh.f32 %v487_v39 }
 0x4bb   :  { %v3407_v42 = vpop.eup %3406 }
 0x4bc   :  { %v3409_v43 = vpop.eup %3408  ;;  %466 = vrot.lane.b32.xlu0 %v3407_v42, %s3635_s0 }
 0x4bd   :  { %490 = vrot.lane.b32.xlu1 %v3409_v43, %s3635_s0 }
 0x52e   :  { %v467_v45 = vpop.permute.xlu0 %466 }
 0x52f   :  { %v469_v48 = vmul.f32 %v3403_v50, %v467_v45  ;;  %v491_v49 = vpop.permute.xlu1 %490 }
 0x530   :  { %v3905_v51 = vmul.f32 %v3405_v27, %v491_v49 }
 0x531   :  { %495 = vrot.lane.b32.xlu0 %v469_v48, %s3636_s2 }
 0x532   :  { %499 = vrot.lane.b32.xlu1 %v3905_v51, %s3635_s0 }
 0x5a3   :  { %v496_v46 = vpop.permute.xlu0 %495 }
 0x5a4   :  { %503 = vst.msk [vmem:[#allocation3 + $0x8] sm:$0xff] %vm361_vm1, %v496_v46  ;;  %v500_v53 = vpop.permute.xlu1 %499 }
 0x5a5   :  { %v502_v55 = vsel %vm361_vm1, %v496_v46, %v500_v53 }
 0x5a6   :  { %2977 = vmatmul.mubr.msk.f32.vlgmr.msra.gmra.mrb[16].mxu0 %vm226_vm2, %v502_v55 }
 0x5a7   :  { %3140 = vmatpush1.bf16.msra.mxu0 %v3717_v12  ;;  %855 = vmatprep.mubr.f32.mxu0 %v3634_v3 }
 0x5a8   :  { %3142 = vmatprep.subr.bf16.mxu0 %v3732_v17 }
 0x5ab   :  { %3144 = vmatpush1.bf16.msra.mxu0 %v3741_v20 }
 0x5ac   :  { %3146 = vmatprep.subr.bf16.mxu0 %v3748_v22 }
 0x5af   :  { %3148 = vmatpush1.bf16.msra.mxu0 %v3769_v28 }
 0x5b0   :  { %3150 = vmatprep.subr.bf16.mxu0 %v3773_v29 }
 0x5b3   :  { %3152 = vmatpush1.bf16.msra.mxu0 %v3788_v33 }
 0x5b4   :  { %3170 = vmatprep.subr.bf16.mxu0 %v3709_v8 }
 0x679   :  { %v577_v57 = vpop.f32.mrb[16].mxu0 }
 0x67a   :  { %v583_v58 = vadd.f32 %v577_v57, %v3852_v54  ;;  %v579_v60 = vpop.f32.mrb[17].mxu0 }
 0x67b   :  { %v585_v62 = vadd.f32 %v579_v60, %v3866_v10 }
 0x67c   :  { %3410 = vtanh.f32 %v583_v58  ;;  %v2978_v4 = vmul.f32 -1.442695, %v583_v58 }
 0x67d   :  { %3412 = vtanh.f32 %v585_v62  ;;  %v2979_v6 = vmul.f32 -1.442695, %v585_v62 }
 0x67e   :  { %3414 = vpow2.f32 %v2978_v4 }
 0x67f   :  { %3416 = vpow2.f32 %v2979_v6 }
 0x686   :  { %v3411_v0 = vpop.eup %3410 }
 0x687   :  { %v3413_v1 = vpop.eup %3412  ;;  %595 = vrot.lane.b32.xlu0 %v3411_v0, %s3635_s0 }
 0x688   :  { %619 = vrot.lane.b32.xlu1 %v3413_v1, %s3635_s0  ;;  %v3415_v9 = vpop.eup %3414 }
 0x689   :  { %v3417_v11 = vpop.eup %3416  ;;  %v589_v14 = vadd.f32 1.0, %v3415_v9 }
 0x68a   :  { %v613_v15 = vadd.f32 1.0, %v3417_v11 }
 0x68b   :  { %3418 = vrcp.f32 %v589_v14 }
 0x68c   :  { %3420 = vrcp.f32 %v613_v15 }
 0x695   :  { %v3419_v54 = vpop.eup %3418 }
 0x696   :  { %v3421_v18 = vpop.eup %3420  ;;  %v593_v25 = vmul.f32 %v3419_v54, %v463_v37 }
 0x697   :  { %v617_v50 = vmul.f32 %v3421_v18, %v487_v39 }
 0x6f9   :  { %v596_v10 = vpop.permute.xlu0 %595 }
 0x6fa   :  { %v598_v21 = vmul.f32 %v3419_v54, %v596_v10  ;;  %v620_v23 = vpop.permute.xlu1 %619 }
 0x6fb   :  { %v622_v24 = vmul.f32 %v3421_v18, %v620_v23 }
 0x6fc   :  { %600 = vrot.lane.b32.xlu0 %v598_v21, %s3636_s2 }
 0x6fd   :  { %624 = vrot.lane.b32.xlu1 %v622_v24, %s3636_s2 }
 0x76e   :  { %v601_v26 = vpop.permute.xlu0 %600 }
 0x76f   :  { %v603_v16 = vadd.f32 %v601_v26, %v593_v25  ;;  %v625_v27 = vpop.permute.xlu1 %624 }
 0x770   :  { %v627_v30 = vadd.f32 %v625_v27, %v617_v50 }
 0x771   :  { %3422 = vtanh.f32 %v603_v16 }
 0x772   :  { %3424 = vtanh.f32 %v627_v30 }
 0x77b   :  { %v3423_v31 = vpop.eup %3422 }
 0x77c   :  { %v3425_v32 = vpop.eup %3424  ;;  %606 = vrot.lane.b32.xlu0 %v3423_v31, %s3635_s0 }
 0x77d   :  { %630 = vrot.lane.b32.xlu1 %v3425_v32, %s3635_s0 }
 0x7ee   :  { %v607_v34 = vpop.permute.xlu0 %606 }
 0x7ef   :  { %v609_v35 = vmul.f32 %v3419_v54, %v607_v34  ;;  %v631_v36 = vpop.permute.xlu1 %630 }
 0x7f0   :  { %v3930_v38 = vmul.f32 %v3421_v18, %v631_v36 }
 0x7f1   :  { %635 = vrot.lane.b32.xlu0 %v609_v35, %s3636_s2 }
 0x7f2   :  { %639 = vrot.lane.b32.xlu1 %v3930_v38, %s3635_s0 }
 0x863   :  { %v636_v37 = vpop.permute.xlu0 %635 }
 0x864   :  { %643 = vst.msk [vmem:[#allocation3 + $0x10] sm:$0xff] %vm361_vm1, %v636_v37  ;;  %v640_v39 = vpop.permute.xlu1 %639 }
 0x865   :  { %v642_v42 = vsel %vm361_vm1, %v636_v37, %v640_v39 }
 0x866   :  { %2980 = vmatmul.mubr.msk.f32.vlgmr.msra.gmra.mrb[4].mxu1 %vm226_vm2, %v642_v42 }
 0x867   :  { %3156 = vmatpush1.bf16.msra.mxu1 %v3717_v12  ;;  %995 = vmatprep.mubr.f32.mxu1 %v3634_v3 }
 0x868   :  { %3158 = vmatprep.subr.bf16.mxu1 %v3732_v17 }
 0x86b   :  { %3160 = vmatpush1.bf16.msra.mxu1 %v3741_v20 }
 0x86c   :  { %3162 = vmatprep.subr.bf16.mxu1 %v3748_v22 }
 0x86f   :  { %3164 = vmatpush1.bf16.msra.mxu1 %v3769_v28 }
 0x870   :  { %3166 = vmatprep.subr.bf16.mxu1 %v3773_v29 }
 0x873   :  { %3168 = vmatpush1.bf16.msra.mxu1 %v3788_v33 }
 0x874   :  { %3186 = vmatprep.subr.bf16.mxu1 %v3709_v8 }
 0x939   :  { %v717_v43 = vpop.f32.mrb[4].mxu1 }
 0x93a   :  { %v723_v45 = vadd.f32 %v717_v43, %v3856_v59  ;;  %v719_v48 = vpop.f32.mrb[5].mxu1 }
 0x93b   :  { %v725_v49 = vadd.f32 %v719_v48, %v3862_v5 }
 0x93c   :  { %3426 = vtanh.f32 %v723_v45  ;;  %v2981_v55 = vmul.f32 -1.442695, %v723_v45 }
 0x93d   :  { %3428 = vtanh.f32 %v725_v49  ;;  %v2982_v57 = vmul.f32 -1.442695, %v725_v49 }
 0x93e   :  { %3430 = vpow2.f32 %v2981_v55 }
 0x93f   :  { %3432 = vpow2.f32 %v2982_v57 }
 0x946   :  { %v3427_v46 = vpop.eup %3426 }
 0x947   :  { %v3429_v53 = vpop.eup %3428  ;;  %735 = vrot.lane.b32.xlu0 %v3427_v46, %s3635_s0 }
 0x948   :  { %759 = vrot.lane.b32.xlu1 %v3429_v53, %s3635_s0  ;;  %v3431_v58 = vpop.eup %3430 }
 0x949   :  { %v3433_v8 = vpop.eup %3432  ;;  %v729_v60 = vadd.f32 1.0, %v3431_v58 }
 0x94a   :  { %v753_v62 = vadd.f32 1.0, %v3433_v8 }
 0x94b   :  { %3434 = vrcp.f32 %v729_v60 }
 0x94c   :  { %3436 = vrcp.f32 %v753_v62 }
 0x955   :  { %v3435_v59 = vpop.eup %3434 }
 0x956   :  { %v3437_v0 = vpop.eup %3436  ;;  %v733_v9 = vmul.f32 %v3435_v59, %v603_v16 }
 0x957   :  { %v757_v14 = vmul.f32 %v3437_v0, %v627_v30 }
 0x9b9   :  { %v736_v5 = vpop.permute.xlu0 %735 }
 0x9ba   :  { %v738_v1 = vmul.f32 %v3435_v59, %v736_v5  ;;  %v760_v4 = vpop.permute.xlu1 %759 }
 0x9bb   :  { %v762_v6 = vmul.f32 %v3437_v0, %v760_v4 }
 0x9bc   :  { %740 = vrot.lane.b32.xlu0 %v738_v1, %s3636_s2 }
 0x9bd   :  { %764 = vrot.lane.b32.xlu1 %v762_v6, %s3636_s2 }
 0xa2e   :  { %v741_v11 = vpop.permute.xlu0 %740 }
 0xa2f   :  { %v743_v15 = vadd.f32 %v741_v11, %v733_v9  ;;  %v765_v54 = vpop.permute.xlu1 %764 }
 0xa30   :  { %v767_v10 = vadd.f32 %v765_v54, %v757_v14 }
 0xa31   :  { %3438 = vtanh.f32 %v743_v15 }
 0xa32   :  { %3440 = vtanh.f32 %v767_v10 }
 0xa3b   :  { %v3439_v18 = vpop.eup %3438 }
 0xa3c   :  { %v3441_v21 = vpop.eup %3440  ;;  %746 = vrot.lane.b32.xlu0 %v3439_v18, %s3635_s0 }
 0xa3d   :  { %770 = vrot.lane.b32.xlu1 %v3441_v21, %s3635_s0 }
 0xaae   :  { %v747_v23 = vpop.permute.xlu0 %746 }
 0xaaf   :  { %v749_v24 = vmul.f32 %v3435_v59, %v747_v23  ;;  %v771_v25 = vpop.permute.xlu1 %770 }
 0xab0   :  { %v3955_v26 = vmul.f32 %v3437_v0, %v771_v25 }
 0xab1   :  { %775 = vrot.lane.b32.xlu0 %v749_v24, %s3636_s2 }
 0xab2   :  { %779 = vrot.lane.b32.xlu1 %v3955_v26, %s3635_s0 }
 0xb23   :  { %v776_v50 = vpop.permute.xlu0 %775 }
 0xb24   :  { %783 = vst.msk [vmem:[#allocation3 + $0x18] sm:$0xff] %vm361_vm1, %v776_v50  ;;  %v780_v16 = vpop.permute.xlu1 %779 }
 0xb25   :  { %v782_v27 = vsel %vm361_vm1, %v776_v50, %v780_v16 }
 0xb26   :  { %2983 = vmatmul.mubr.msk.f32.vlgmr.msra.gmra.mrb[18].mxu0 %vm226_vm2, %v782_v27 }
 0xb27   :  { %3172 = vmatpush1.bf16.msra.mxu0 %v3717_v12  ;;  %1135 = vmatprep.mubr.f32.mxu0 %v3634_v3 }
 0xb28   :  { %3174 = vmatprep.subr.bf16.mxu0 %v3732_v17 }
 0xb2b   :  { %3176 = vmatpush1.bf16.msra.mxu0 %v3741_v20 }
 0xb2c   :  { %3178 = vmatprep.subr.bf16.mxu0 %v3748_v22 }
 0xb2f   :  { %3180 = vmatpush1.bf16.msra.mxu0 %v3769_v28 }
 0xb30   :  { %3182 = vmatprep.subr.bf16.mxu0 %v3773_v29 }
 0xb33   :  { %3184 = vmatpush1.bf16.msra.mxu0 %v3788_v33 }
 0xbf9   :  { %v857_v30 = vpop.f32.mrb[18].mxu0 }
 0xbfa   :  { %v863_v31 = vadd.f32 %v857_v30, %v3860_v2  ;;  %v859_v32 = vpop.f32.mrb[19].mxu0 }
 0xbfb   :  { %v865_v34 = vadd.f32 %v859_v32, %v3858_v63 }
 0xbfc   :  { %3442 = vtanh.f32 %v863_v31  ;;  %v2984_v37 = vmul.f32 -1.442695, %v863_v31 }
 0xbfd   :  { %3444 = vtanh.f32 %v865_v34  ;;  %v2985_v39 = vmul.f32 -1.442695, %v865_v34 }
 0xbfe   :  { %3446 = vpow2.f32 %v2984_v37 }
 0xbff   :  { %3448 = vpow2.f32 %v2985_v39 }
 0xc06   :  { %v3443_v35 = vpop.eup %3442 }
 0xc07   :  { %v3445_v36 = vpop.eup %3444  ;;  %875 = vrot.lane.b32.xlu0 %v3443_v35, %s3635_s0 }
 0xc08   :  { %899 = vrot.lane.b32.xlu1 %v3445_v36, %s3635_s0  ;;  %v3447_v42 = vpop.eup %3446 }
 0xc09   :  { %v3449_v43 = vpop.eup %3448  ;;  %v869_v45 = vadd.f32 1.0, %v3447_v42 }
 0xc0a   :  { %v893_v48 = vadd.f32 1.0, %v3449_v43 }
 0xc0b   :  { %3450 = vrcp.f32 %v869_v45 }
 0xc0c   :  { %3452 = vrcp.f32 %v893_v48 }
 0xc15   :  { %v3451_v2 = vpop.eup %3450 }
 0xc16   :  { %v3453_v49 = vpop.eup %3452  ;;  %v873_v57 = vmul.f32 %v3451_v2, %v743_v15 }
 0xc17   :  { %v897_v8 = vmul.f32 %v3453_v49, %v767_v10 }
 0xc79   :  { %v876_v63 = vpop.permute.xlu0 %875 }
 0xc7a   :  { %v878_v46 = vmul.f32 %v3451_v2, %v876_v63  ;;  %v900_v53 = vpop.permute.xlu1 %899 }
 0xc7b   :  { %v902_v55 = vmul.f32 %v3453_v49, %v900_v53 }
 0xc7c   :  { %880 = vrot.lane.b32.xlu0 %v878_v46, %s3636_s2 }
 0xc7d   :  { %904 = vrot.lane.b32.xlu1 %v902_v55, %s3636_s2 }
 0xcee   :  { %v881_v58 = vpop.permute.xlu0 %880 }
 0xcef   :  { %v883_v60 = vadd.f32 %v881_v58, %v873_v57  ;;  %v905_v62 = vpop.permute.xlu1 %904 }
 0xcf0   :  { %v907_v59 = vadd.f32 %v905_v62, %v897_v8 }
 0xcf1   :  { %3454 = vtanh.f32 %v883_v60 }
 0xcf2   :  { %3456 = vtanh.f32 %v907_v59 }
 0xcfb   :  { %v3455_v5 = vpop.eup %3454 }
 0xcfc   :  { %v3457_v0 = vpop.eup %3456  ;;  %886 = vrot.lane.b32.xlu0 %v3455_v5, %s3635_s0 }
 0xcfd   :  { %910 = vrot.lane.b32.xlu1 %v3457_v0, %s3635_s0 }
 0xd6e   :  { %v887_v1 = vpop.permute.xlu0 %886 }
 0xd6f   :  { %v889_v4 = vmul.f32 %v3451_v2, %v887_v1  ;;  %v911_v6 = vpop.permute.xlu1 %910 }
 0xd70   :  { %v3979_v9 = vmul.f32 %v3453_v49, %v911_v6 }
 0xd71   :  { %915 = vrot.lane.b32.xlu0 %v889_v4, %s3636_s2 }
 0xd72   :  { %919 = vrot.lane.b32.xlu1 %v3979_v9, %s3635_s0 }
 0xde3   :  { %v916_v11 = vpop.permute.xlu0 %915 }
 0xde4   :  { %923 = vst.msk [vmem:[#allocation3 + $0x20] sm:$0xff] %vm361_vm1, %v916_v11  ;;  %v920_v14 = vpop.permute.xlu1 %919 }
 0xde5   :  { %v922_v15 = vsel %vm361_vm1, %v916_v11, %v920_v14 }
 0xde6   :  { %2986 = vmatmul.mubr.msk.f32.vlgmr.msra.gmra.mrb[6].mxu1 %vm226_vm2, %v922_v15 }
 0xde7   :  { %3188 = vmatpush1.bf16.msra.mxu1 %v3717_v12  ;;  %1275 = vmatprep.mubr.f32.mxu1 %v3634_v3 }
 0xde8   :  { %3190 = vmatprep.subr.bf16.mxu1 %v3732_v17 }
 0xdeb   :  { %3192 = vmatpush1.bf16.msra.mxu1 %v3741_v20 }
 0xdec   :  { %3194 = vmatprep.subr.bf16.mxu1 %v3748_v22 }
 0xdef   :  { %3196 = vmatpush1.bf16.msra.mxu1 %v3769_v28 }
 0xdf0   :  { %3198 = vmatprep.subr.bf16.mxu1 %v3773_v29 }
 0xdf3   :  { %3200 = vmatpush1.bf16.msra.mxu1 %v3788_v33 }
 0xeb9   :  { %v997_v54 = vpop.f32.mrb[6].mxu1 }
 0xeba   :  { %v1003_v10 = vadd.f32 %v997_v54, %v3864_v7  ;;  %v999_v18 = vpop.f32.mrb[7].mxu1 }
 0xebb   :  { %v1005_v12 = vadd.f32 %v999_v18, %v3854_v56 }
 0xebc   :  { %3458 = vtanh.f32 %v1003_v10  ;;  %v2987_v20 = vmul.f32 -1.442695, %v1003_v10 }
 0xebd   :  { %3460 = vtanh.f32 %v1005_v12  ;;  %v2988_v22 = vmul.f32 -1.442695, %v1005_v12 }
 0xebe   :  { %3462 = vpow2.f32 %v2987_v20 }
 0xebf   :  { %3464 = vpow2.f32 %v2988_v22 }
 0xec6   :  { %v3459_v21 = vpop.eup %3458 }
 0xec7   :  { %v3461_v17 = vpop.eup %3460  ;;  %1015 = vrot.lane.b32.xlu0 %v3459_v21, %s3635_s0 }
 0xec8   :  { %1039 = vrot.lane.b32.xlu1 %v3461_v17, %s3635_s0  ;;  %v3463_v28 = vpop.eup %3462 }
 0xec9   :  { %v3465_v29 = vpop.eup %3464  ;;  %v1009_v33 = vadd.f32 1.0, %v3463_v28 }
 0xeca   :  { %v1033_v23 = vadd.f32 1.0, %v3465_v29 }
 0xecb   :  { %3466 = vrcp.f32 %v1009_v33 }
 0xecc   :  { %3468 = vrcp.f32 %v1033_v23 }
 0xed5   :  { %v3467_v7 = vpop.eup %3466 }
 0xed6   :  { %v3469_v24 = vpop.eup %3468  ;;  %v1013_v27 = vmul.f32 %v3467_v7, %v883_v60 }
 0xed7   :  { %v1037_v31 = vmul.f32 %v3469_v24, %v907_v59 }
 0xf39   :  { %v1016_v56 = vpop.permute.xlu0 %1015 }
 0xf3a   :  { %v1018_v25 = vmul.f32 %v3467_v7, %v1016_v56  ;;  %v1040_v50 = vpop.permute.xlu1 %1039 }
 0xf3b   :  { %v1042_v16 = vmul.f32 %v3469_v24, %v1040_v50 }
 0xf3c   :  { %1020 = vrot.lane.b32.xlu0 %v1018_v25, %s3636_s2 }
 0xf3d   :  { %1044 = vrot.lane.b32.xlu1 %v1042_v16, %s3636_s2 }
 0xfae   :  { %v1021_v30 = vpop.permute.xlu0 %1020 }
 0xfaf   :  { %v1023_v32 = vadd.f32 %v1021_v30, %v1013_v27  ;;  %v1045_v34 = vpop.permute.xlu1 %1044 }
 0xfb0   :  { %v1047_v35 = vadd.f32 %v1045_v34, %v1037_v31 }
 0xfb1   :  { %3470 = vtanh.f32 %v1023_v32 }
 0xfb2   :  { %3472 = vtanh.f32 %v1047_v35 }
 0xfbb   :  { %v3471_v36 = vpop.eup %3470 }
 0xfbc   :  { %v3473_v37 = vpop.eup %3472  ;;  %1026 = vrot.lane.b32.xlu0 %v3471_v36, %s3635_s0 }
 0xfbd   :  { %1050 = vrot.lane.b32.xlu1 %v3473_v37, %s3635_s0 }
0x102e   :  { %v1027_v39 = vpop.permute.xlu0 %1026 }
0x102f   :  { %v1029_v42 = vmul.f32 %v3467_v7, %v1027_v39  ;;  %v1051_v43 = vpop.permute.xlu1 %1050 }
0x1030   :  { %v4003_v45 = vmul.f32 %v3469_v24, %v1051_v43 }
0x1031   :  { %1055 = vrot.lane.b32.xlu0 %v1029_v42, %s3636_s2 }
0x1032   :  { %1059 = vrot.lane.b32.xlu1 %v4003_v45, %s3635_s0 }
0x10a3   :  { %v1056_v48 = vpop.permute.xlu0 %1055 }
0x10a4   :  { %1063 = vst.msk [vmem:[#allocation3 + $0x28] sm:$0xff] %vm361_vm1, %v1056_v48  ;;  %v1060_v2 = vpop.permute.xlu1 %1059 }
0x10a5   :  { %v1062_v63 = vsel %vm361_vm1, %v1056_v48, %v1060_v2 }
0x10a6   :  { %2989 = vmatmul.mubr.msk.f32.vlgmr.msra.gmra.mrb[20].mxu0 %vm226_vm2, %v1062_v63 }
0x10a7   :  { %1465 = vmatprep.mubr.f32.mxu0 %v3634_v3 }
0x1179   :  { %v1137_v49 = vpop.f32.mrb[20].mxu0 }
0x117a   :  { %v1143_v46 = vadd.f32 %v1137_v49, %v3868_v13  ;;  %v1139_v53 = vpop.f32.mrb[21].mxu0 }
0x117b   :  { %v1145_v55 = vadd.f32 %v1139_v53, %v3850_v52 }
0x117c   :  { %3474 = vtanh.f32 %v1143_v46  ;;  %v2990_v8 = vmul.f32 -1.442695, %v1143_v46 }
0x117d   :  { %3476 = vtanh.f32 %v1145_v55  ;;  %v2991_v60 = vmul.f32 -1.442695, %v1145_v55 }
0x117e   :  { %3478 = vpow2.f32 %v2990_v8  ;;  %v1372_v8 = vld [vmem:[%s4484_s4 + $0x58] sm:$0xff] }
0x117f   :  { %3480 = vpow2.f32 %v2991_v60 }
0x1186   :  { %v3475_v57 = vpop.eup %3474 }
0x1187   :  { %v3477_v58 = vpop.eup %3476  ;;  %1155 = vrot.lane.b32.xlu0 %v3475_v57, %s3635_s0 }
0x1188   :  { %1179 = vrot.lane.b32.xlu1 %v3477_v58, %s3635_s0  ;;  %v3479_v62 = vpop.eup %3478  ;;  %v1370_v58 = vld [vmem:[%s4484_s4 + $0x48] sm:$0xff] }
0x1189   :  { %v3481_v59 = vpop.eup %3480  ;;  %v1149_v5 = vadd.f32 1.0, %v3479_v62  ;;  %v3201_v60 = vpack.c.bf16 %v1372_v8, %v1370_v58  ;;  %v1369_v62 = vld [vmem:[%s4484_s4 + $0x40] sm:$0xff] }
0x118a   :  { %v1173_v0 = vadd.f32 1.0, %v3481_v59  ;;  %v1371_v59 = vld [vmem:[%s4484_s4 + $0x50] sm:$0xff] }
0x118b   :  { %3482 = vrcp.f32 %v1149_v5  ;;  %3202 = vmatprep.subr.bf16.mxu0 %v3201_v60  ;;  %v3203_v5 = vpack.c.bf16 %v1371_v59, %v1369_v62 }
0x118c   :  { %3484 = vrcp.f32 %v1173_v0 }
0x118d   :  { %3204 = vmatpush1.bf16.msra.mxu0 %v3203_v5 }
0x1195   :  { %v3483_v13 = vpop.eup %3482 }
0x1196   :  { %v3485_v1 = vpop.eup %3484  ;;  %v1153_v14 = vmul.f32 %v3483_v13, %v1023_v32 }
0x1197   :  { %v1177_v54 = vmul.f32 %v3485_v1, %v1047_v35 }
0x11f9   :  { %v1156_v52 = vpop.permute.xlu0 %1155 }
0x11fa   :  { %v1158_v4 = vmul.f32 %v3483_v13, %v1156_v52  ;;  %v1180_v6 = vpop.permute.xlu1 %1179 }
0x11fb   :  { %v1182_v11 = vmul.f32 %v3485_v1, %v1180_v6 }
0x11fc   :  { %1160 = vrot.lane.b32.xlu0 %v1158_v4, %s3636_s2  ;;  %v1356_v4 = vld [vmem:[%s4484_s4 + $0x18] sm:$0xff] }
0x11fd   :  { %1184 = vrot.lane.b32.xlu1 %v1182_v11, %s3636_s2 }
0x126e   :  { %v1161_v15 = vpop.permute.xlu0 %1160 }
0x126f   :  { %v1163_v10 = vadd.f32 %v1161_v15, %v1153_v14  ;;  %v1185_v18 = vpop.permute.xlu1 %1184 }
0x1270   :  { %v1187_v12 = vadd.f32 %v1185_v18, %v1177_v54 }
0x1271   :  { %3486 = vtanh.f32 %v1163_v10 }
0x1272   :  { %3488 = vtanh.f32 %v1187_v12 }
0x127b   :  { %v3487_v21 = vpop.eup %3486 }
0x127c   :  { %v3489_v17 = vpop.eup %3488  ;;  %1166 = vrot.lane.b32.xlu0 %v3487_v21, %s3635_s0 }
0x127d   :  { %1190 = vrot.lane.b32.xlu1 %v3489_v17, %s3635_s0  ;;  %v1694_v17 = vld [vmem:[%s4485_s6] sm:$0xff] }
0x12ee   :  { %v1167_v20 = vpop.permute.xlu0 %1166 }
0x12ef   :  { %v1169_v22 = vmul.f32 %v3483_v13, %v1167_v20  ;;  %v1191_v28 = vpop.permute.xlu1 %1190  ;;  %v1375_v13 = vld [vmem:[%s4484_s4 + $0x70] sm:$0xff] }
0x12f0   :  { %v1193_v29 = vmul.f32 %v3485_v1, %v1191_v28  ;;  %v1354_v1 = vld [vmem:[%s4484_s4 + $0x8] sm:$0xff]  ;;  %v1696_v20 = vld [vmem:[%s4485_s6 + $0x10] sm:$0xff] }
0x12f1   :  { %1195 = vrot.lane.b32.xlu0 %v1169_v22, %s3636_s2  ;;  %v3209_v6 = vpack.c.bf16 %v1356_v4, %v1354_v1  ;;  %v4101_v28 = vpack.c.bf16 %v1696_v20, %v1694_v17  ;;  %v1348_v1 = vld [vmem:[#allocation3 + $0x18] sm:$0xff]  ;;  %v1349_v4 = vld [vmem:[#allocation3 + $0x20] sm:$0xff] }
0x12f2   :  { %1199 = vrot.lane.b32.xlu1 %v1193_v29, %s3635_s0 }
0x1363   :  { %v1196_v33 = vpop.permute.xlu0 %1195 }
0x1364   :  { %1203 = vst.msk [vmem:[#allocation3 + $0x30] sm:$0xff] %vm361_vm1, %v1196_v33  ;;  %v1200_v23 = vpop.permute.xlu1 %1199 }
0x1365   :  { %v1202_v7 = vsel %vm361_vm1, %v1196_v33, %v1200_v23  ;;  %v1698_v23 = vld [vmem:[%s4485_s6 + $0x20] sm:$0xff] }
0x1366   :  { %2992 = vmatmul.mubr.msk.f32.vlgmr.msra.gmra.mrb[8].mxu1 %vm226_vm2, %v1202_v7  ;;  %v1700_v7 = vld [vmem:[%s4485_s6 + $0x30] sm:$0xff] }
0x1367   :  { %1774 = vmatprep.mubr.f32.mxu1 %v3634_v3 }
0x1439   :  { %v1277_v56 = vpop.f32.mrb[8].mxu1 }
0x143a   :  { %v1283_v24 = vadd.f32 %v1277_v56, %v3873_v19  ;;  %v1279_v25 = vpop.f32.mrb[9].mxu1  ;;  %v4120_v56 = vpack.c.bf16 %v1700_v7, %v1698_v23 }
0x143b   :  { %v1285_v50 = vadd.f32 %v1279_v25, %v3844_v47  ;;  %v1705_v25 = vld [vmem:[%s4485_s6 + $0x58] sm:$0xff] }
0x143c   :  { %3490 = vtanh.f32 %v1283_v24  ;;  %v2993_v30 = vmul.f32 -1.442695, %v1283_v24  ;;  %v1703_v24 = vld [vmem:[%s4485_s6 + $0x48] sm:$0xff] }
0x143d   :  { %3492 = vtanh.f32 %v1285_v50  ;;  %v2994_v31 = vmul.f32 -1.442695, %v1285_v50  ;;  %v4130_v50 = vpack.c.bf16 %v1705_v25, %v1703_v24 }
0x143e   :  { %3494 = vpow2.f32 %v2993_v30 }
0x143f   :  { %3496 = vpow2.f32 %v2994_v31  ;;  %v1707_v31 = vld [vmem:[%s4485_s6 + $0x68] sm:$0xff] }
0x1446   :  { %v3491_v16 = vpop.eup %3490 }
0x1447   :  { %v3493_v27 = vpop.eup %3492  ;;  %1295 = vrot.lane.b32.xlu1 %v3491_v16, %s3635_s0  ;;  %v1702_v16 = vld [vmem:[%s4485_s6 + $0x40] sm:$0xff] }
0x1448   :  { %1319 = vrot.lane.b32.xlu0 %v3493_v27, %s3635_s0  ;;  %v3495_v32 = vpop.eup %3494  ;;  %v1704_v27 = vld [vmem:[%s4485_s6 + $0x50] sm:$0xff] }
0x1449   :  { %v3497_v34 = vpop.eup %3496  ;;  %v1289_v35 = vadd.f32 1.0, %v3495_v32  ;;  %v4138_v30 = vpack.c.bf16 %v1704_v27, %v1702_v16  ;;  %v1709_v32 = vld [vmem:[%s4485_s6 + $0x78] sm:$0xff] }
0x144a   :  { %v1313_v36 = vadd.f32 1.0, %v3497_v34  ;;  %v4148_v34 = vpack.c.bf16 %v1709_v32, %v1707_v31 }
0x144b   :  { %3498 = vrcp.f32 %v1289_v35  ;;  %v1706_v35 = vld [vmem:[%s4485_s6 + $0x60] sm:$0xff] }
0x144c   :  { %3500 = vrcp.f32 %v1313_v36  ;;  %v1708_v36 = vld [vmem:[%s4485_s6 + $0x70] sm:$0xff] }
0x1455   :  { %v4030_v19 = vpop.eup %3498 }
0x1456   :  { %v3501_v37 = vpop.eup %3500  ;;  %v1293_v48 = vmul.f32 %v4030_v19, %v1163_v10 }
0x1457   :  { %v1317_v63 = vmul.f32 %v3501_v37, %v1187_v12  ;;  %v1695_v12 = vld [vmem:[%s4485_s6 + $0x8] sm:$0xff] }
0x14b9   :  { %v1296_v47 = vpop.permute.xlu1 %1295 }
0x14ba   :  { %v1298_v39 = vmul.f32 %v4030_v19, %v1296_v47  ;;  %v1320_v42 = vpop.permute.xlu0 %1319 }
0x14bb   :  { %v1322_v43 = vmul.f32 %v3501_v37, %v1320_v42 }
0x14bc   :  { %1300 = vrot.lane.b32.xlu1 %v1298_v39, %s3636_s2  ;;  %v1355_v39 = vld [vmem:[%s4484_s4 + $0x10] sm:$0xff] }
0x14bd   :  { %1324 = vrot.lane.b32.xlu0 %v1322_v43, %s3636_s2  ;;  %v1358_v43 = vld [vmem:[%s4484_s4 + $0x28] sm:$0xff] }
0x152e   :  { %v1301_v2 = vpop.permute.xlu1 %1300 }
0x152f   :  { %v1303_v49 = vadd.f32 %v1301_v2, %v1293_v48  ;;  %v1325_v46 = vpop.permute.xlu0 %1324  ;;  %v1360_v48 = vld [vmem:[%s4484_s4 + $0x38] sm:$0xff] }
0x1530   :  { %v1327_v53 = vadd.f32 %v1325_v46, %v1317_v63  ;;  %v3213_v63 = vpack.c.bf16 %v1360_v48, %v1358_v43  ;;  %v1359_v46 = vld [vmem:[%s4484_s4 + $0x30] sm:$0xff] }
0x1531   :  { %3502 = vtanh.f32 %v1303_v49  ;;  %v1357_v49 = vld [vmem:[%s4484_s4 + $0x20] sm:$0xff] }
0x1532   :  { %3504 = vtanh.f32 %v1327_v53 }
0x153b   :  { %v3503_v55 = vpop.eup %3502 }
0x153c   :  { %v3505_v57 = vpop.eup %3504  ;;  %1306 = vrot.lane.b32.xlu1 %v3503_v55, %s3635_s0 }
0x153d   :  { %1330 = vrot.lane.b32.xlu0 %v3505_v57, %s3635_s0  ;;  %v3215_v57 = vpack.c.bf16 %v1359_v46, %v1357_v49 }
0x1540   :  { %1204 = vrot.lane.b32.xlu1 %v1193_v29, %s3636_s2  ;;  %v1701_v29 = vld [vmem:[%s4485_s6 + $0x38] sm:$0xff] }
0x1544   :  { %924 = vrot.lane.b32.xlu1 %v3979_v9, %s3636_s2  ;;  %v1374_v9 = vld [vmem:[%s4484_s4 + $0x68] sm:$0xff] }
0x1548   :  { %644 = vrot.lane.b32.xlu1 %v3930_v38, %s3636_s2  ;;  %v1376_v38 = vld [vmem:[%s4484_s4 + $0x78] sm:$0xff] }
0x1549   :  { %v3205_v0 = vpack.c.bf16 %v1376_v38, %v1374_v9 }
0x154b   :  { %3206 = vmatprep.subr.bf16.mxu0 %v3205_v0 }
0x154c   :  { %364 = vrot.lane.b32.xlu1 %v3881_v61, %s3636_s2  ;;  %v1373_v61 = vld [vmem:[%s4484_s4 + $0x60] sm:$0xff] }
0x154d   :  { %v3207_v52 = vpack.c.bf16 %v1375_v13, %v1373_v61  ;;  %v1345_v61 = vld [vmem:[#allocation3] sm:$0xff]  ;;  %v1346_v13 = vld [vmem:[#allocation3 + $0x8] sm:$0xff] }
0x154f   :  { %3208 = vmatpush1.bf16.msra.mxu0 %v3207_v52  ;;  %v1347_v52 = vld [vmem:[#allocation3 + $0x10] sm:$0xff] }
0x1550   :  { %3210 = vmatprep.subr.bf16.mxu0 %v3209_v6  ;;  %v1350_v6 = vld [vmem:[#allocation3 + $0x28] sm:$0xff] }
0x15ae   :  { %v1307_v11 = vpop.permute.xlu1 %1306 }
0x15af   :  { %v1331_v14 = vpop.permute.xlu0 %1330  ;;  %v1309_v22 = vmul.f32 %v4030_v19, %v1307_v11  ;;  %v4156_v19 = vpack.c.bf16 %v1708_v36, %v1706_v35  ;;  %v1351_v11 = vld [vmem:[#allocation3 + $0x30] sm:$0xff] }
0x15b0   :  { %v1333_v15 = vmul.f32 %v3501_v37, %v1331_v14  ;;  %v1353_v37 = vld [vmem:[%s4484_s4] sm:$0xff] }
0x15b1   :  { %v3211_v2 = vpack.c.bf16 %v1355_v39, %v1353_v37 }
0x15b2   :  { %v1205_v54 = vpop.permute.xlu1 %1204  ;;  %1340 = vrot.lane.b32.xlu0 %v1333_v15, %s3636_s2 }
0x15b3   :  { %1207 = vst.msk [vmem:[#allocation4 + $0x8] sm:$0xff] %vm361_vm1, %v1205_v54 }
0x15b6   :  { %v925_v10 = vpop.permute.xlu1 %924  ;;  %1064 = vrot.lane.b32.xlu0 %v4003_v45, %s3636_s2  ;;  %v1697_v45 = vld [vmem:[%s4485_s6 + $0x18] sm:$0xff] }
0x15b7   :  { %927 = vst.msk [vmem:[#allocation4 + $0x18] sm:$0xff] %vm361_vm1, %v925_v10  ;;  %v1344_v10 = vld [vmem:[%s4486_s5] sm:$0x3] }
0x15ba   :  { %v645_v18 = vpop.permute.xlu1 %644  ;;  %784 = vrot.lane.b32.xlu0 %v3955_v26, %s3636_s2  ;;  %v4095_v26 = vpack.c.bf16 %v1697_v45, %v1695_v12  ;;  %v1362_v8 = vld [vmem:[#allocation4 + $0x8] sm:$0xff]  ;;  %v1659_v12 = vrot.slane %v1344_v10, %v52_v41 }
0x15bb   :  { %647 = vst.msk [vmem:[#allocation4 + $0x28] sm:$0xff] %vm361_vm1, %v645_v18  ;;  %v1655_v18 = vrot.slane %v1344_v10, %v48_v44 }
0x15bc   :  { %3218 = vmatprep.subr.bf16.mxu1 %v4095_v26 }
0x15bd   :  { %3220 = vmatpush1.bf16.msra.mxu1 %v4101_v28 }
0x15be   :  { %v365_v21 = vpop.permute.xlu1 %364  ;;  %504 = vrot.lane.b32.xlu0 %v3905_v51, %s3636_s2  ;;  %v1699_v51 = vld [vmem:[%s4485_s6 + $0x28] sm:$0xff]  ;;  %v1364_v59 = vld [vmem:[#allocation4 + $0x18] sm:$0xff] }
0x15bf   :  { %367 = vst.msk [vmem:[#allocation4 + $0x38] sm:$0xff] %vm361_vm1, %v365_v21  ;;  %v4112_v33 = vpack.c.bf16 %v1701_v29, %v1699_v51 }
0x15c1   :  { %3222 = vmatprep.subr.bf16.mxu1 %v4112_v33 }
0x15c2   :  { %1335 = vrot.lane.b32.xlu0 %v1309_v22, %s3636_s2  ;;  %3224 = vmatpush1.bf16.msra.mxu1 %v4120_v56  ;;  %v1366_v9 = vld [vmem:[#allocation4 + $0x28] sm:$0xff] }
0x15c3   :  { %3226 = vmatprep.subr.bf16.mxu1 %v4130_v50 }
0x15c6   :  { %3228 = vmatpush1.bf16.msra.mxu1 %v4138_v30  ;;  %v1368_v0 = vld [vmem:[#allocation4 + $0x38] sm:$0xff] }
0x15c7   :  { %3230 = vmatprep.subr.bf16.mxu1 %v4148_v34 }
0x15ca   :  { %3232 = vmatpush1.bf16.msra.mxu1 %v4156_v19 }
0x15cb   :  { %3234 = vmatprep.subr.bf16.mxu1 %v4095_v26 }
0x15cd   :  { %1775 = vmatmul.mubr.f32.vlgmr.msra.gmra.mrb[10].mxu1 %v3634_v3 }
0x15ce   :  { %3236 = vmatpush1.bf16.msra.mxu1 %v4101_v28  ;;  %1909 = vmatprep.mubr.f32.mxu1 %v3634_v3 }
0x15cf   :  { %3238 = vmatprep.subr.bf16.mxu1 %v4112_v33 }
0x15d2   :  { %3240 = vmatpush1.bf16.msra.mxu1 %v4120_v56 }
0x15d3   :  { %3242 = vmatprep.subr.bf16.mxu1 %v4130_v50 }
0x15d6   :  { %3244 = vmatpush1.bf16.msra.mxu1 %v4138_v30 }
0x15d7   :  { %3246 = vmatprep.subr.bf16.mxu1 %v4148_v34 }
0x15da   :  { %3248 = vmatpush1.bf16.msra.mxu1 %v4156_v19 }
0x15db   :  { %3250 = vmatprep.subr.bf16.mxu1 %v4095_v26 }
0x1624   :  { %v1341_v47 = vpop.permute.xlu0 %1340 }
0x1625   :  { %1343 = vst.msk [vmem:[#allocation4] sm:$0xff] %vm361_vm1, %v1341_v47 }
0x1628   :  { %v1065_v42 = vpop.permute.xlu0 %1064 }
0x1629   :  { %1067 = vst.msk [vmem:[#allocation4 + $0x10] sm:$0xff] %vm361_vm1, %v1065_v42 }
0x162c   :  { %v785_v53 = vpop.permute.xlu0 %784  ;;  %v1361_v55 = vld [vmem:[#allocation4] sm:$0xff] }
0x162d   :  { %787 = vst.msk [vmem:[#allocation4 + $0x20] sm:$0xff] %vm361_vm1, %v785_v53  ;;  %2995 = vmatmul.mubr.msk.f32.vlgmr.msra.gmra.mrb[22].mxu0 %vm361_vm1, %v1361_v55 }
0x162e   :  { %3212 = vmatpush1.bf16.msra.mxu0 %v3211_v2  ;;  %1471 = vmatprep.mubr.f32.mxu0 %v3634_v3 }
0x162f   :  { %3214 = vmatprep.subr.bf16.mxu0 %v3213_v63 }
0x1630   :  { %v505_v58 = vpop.permute.xlu0 %504  ;;  %v1363_v62 = vld [vmem:[#allocation4 + $0x10] sm:$0xff] }
0x1631   :  { %507 = vst.msk [vmem:[#allocation4 + $0x30] sm:$0xff] %vm361_vm1, %v505_v58  ;;  %2996 = vmatmul.mubr.msk.f32.gmra.mrb[24].mxu0 %vm361_vm1, %v1362_v8 }
0x1632   :  { %1477 = vmatprep.mubr.f32.mxu0 %v3634_v3  ;;  %3216 = vmatpush1.bf16.msra.mxu0 %v3215_v57 }
0x1633   :  { %3266 = vmatprep.subr.bf16.mxu0 %v4095_v26 }
0x1634   :  { %v1336_v60 = vpop.permute.xlu0 %1335  ;;  %v1365_v5 = vld [vmem:[#allocation4 + $0x20] sm:$0xff] }
0x1635   :  { %1338 = vst.msk [vmem:[#allocation3 + $0x38] sm:$0xff] %vm361_vm1, %v1336_v60  ;;  %2997 = vmatmul.mubr.msk.f32.gmra.mrb[26].mxu0 %vm361_vm1, %v1363_v62 }
0x1636   :  { %1483 = vmatprep.mubr.f32.mxu0 %v3634_v3 }
0x1638   :  { %v1367_v38 = vld [vmem:[#allocation4 + $0x30] sm:$0xff] }
0x1639   :  { %2998 = vmatmul.mubr.msk.f32.gmra.mrb[28].mxu0 %vm361_vm1, %v1364_v59 }
0x163a   :  { %1489 = vmatprep.mubr.f32.mxu0 %v3634_v3 }
0x163c   :  { %v1352_v14 = vld [vmem:[#allocation3 + $0x38] sm:$0xff] }
0x163d   :  { %2999 = vmatmul.mubr.msk.f32.gmra.mrb[30].mxu0 %vm361_vm1, %v1365_v5 }
0x163e   :  { %1495 = vmatprep.mubr.f32.mxu0 %v3634_v3 }
0x1641   :  { %3000 = vmatmul.mubr.msk.f32.gmra.mrb[32].mxu0 %vm361_vm1, %v1366_v9 }
0x1642   :  { %1501 = vmatprep.mubr.f32.mxu0 %v3634_v3 }
0x1645   :  { %3001 = vmatmul.mubr.msk.f32.gmra.mrb[34].mxu0 %vm361_vm1, %v1367_v38 }
0x1646   :  { %1507 = vmatprep.mubr.f32.mxu0 %v3634_v3 }
0x1649   :  { %3002 = vmatmul.mubr.msk.f32.gmra.mrb[36].mxu0 %vm361_vm1, %v1368_v0 }
0x164a   :  { %1602 = vmatprep.mubr.f32.mxu0 %v3634_v3 }
0x164d   :  { %3003 = vmatmul.mubr.msk.f32.vlgmr.msra.gmra.mrb[22].mxu0 %vm361_vm1, %v1345_v61 }
0x164e   :  { %1608 = vmatprep.mubr.f32.mxu0 %v3634_v3  ;;  %3268 = vmatpush1.bf16.msra.mxu0 %v4101_v28 }
0x164f   :  { %3270 = vmatprep.subr.bf16.mxu0 %v4112_v33 }
0x1651   :  { %3004 = vmatmul.mubr.msk.f32.gmra.mrb[24].mxu0 %vm361_vm1, %v1346_v13 }
0x1652   :  { %1614 = vmatprep.mubr.f32.mxu0 %v3634_v3  ;;  %3272 = vmatpush1.bf16.msra.mxu0 %v4120_v56 }
0x1653   :  { %3274 = vmatprep.subr.bf16.mxu0 %v4130_v50 }
0x1655   :  { %3005 = vmatmul.mubr.msk.f32.gmra.mrb[26].mxu0 %vm361_vm1, %v1347_v52 }
0x1656   :  { %1620 = vmatprep.mubr.f32.mxu0 %v3634_v3  ;;  %3276 = vmatpush1.bf16.msra.mxu0 %v4138_v30 }
0x1657   :  { %3278 = vmatprep.subr.bf16.mxu0 %v4148_v34 }
0x1659   :  { %3006 = vmatmul.mubr.msk.f32.gmra.mrb[28].mxu0 %vm361_vm1, %v1348_v1 }
0x165a   :  { %1626 = vmatprep.mubr.f32.mxu0 %v3634_v3  ;;  %3280 = vmatpush1.bf16.msra.mxu0 %v4156_v19 }
0x165b   :  { %3298 = vmatprep.subr.bf16.mxu0 %v4095_v26 }
0x165d   :  { %3007 = vmatmul.mubr.msk.f32.gmra.mrb[30].mxu0 %vm361_vm1, %v1349_v4 }
0x165e   :  { %1632 = vmatprep.mubr.f32.mxu0 %v3634_v3 }
0x1661   :  { %3008 = vmatmul.mubr.msk.f32.gmra.mrb[32].mxu0 %vm361_vm1, %v1350_v6 }
0x1662   :  { %1638 = vmatprep.mubr.f32.mxu0 %v3634_v3 }
0x1665   :  { %3009 = vmatmul.mubr.msk.f32.gmra.mrb[34].mxu0 %vm361_vm1, %v1351_v11 }
0x1666   :  { %1644 = vmatprep.mubr.f32.mxu0 %v3634_v3 }
0x1669   :  { %3010 = vmatmul.mubr.msk.f32.gmra.mrb[36].mxu0 %vm361_vm1, %v1352_v14 }
0x166a   :  { %2183 = vmatprep.mubr.f32.mxu0 %v3634_v3 }
0x16a0   :  { %v1776_v15 = vpop.f32.mrb[10].mxu1 }
0x16a1   :  { %v1778_v54 = vpop.f32.mrb[11].mxu1 }
0x1720   :  { %v1604_v21 = vpop.f32.mrb[22].mxu0 }
0x1721   :  { %v1662_v45 = vadd.f32 %v1655_v18, %v1604_v21  ;;  %v1606_v17 = vpop.f32.mrb[23].mxu0 }
0x1722   :  { %v4242_v20 = vadd.f32 %v1659_v12, %v1606_v17 }
0x1723   :  { %v1782_v22 = vadd.f32 %v1776_v15, %v1662_v45 }
0x1724   :  { %v1610_v51 = vpop.f32.mrb[24].mxu0 }
0x1725   :  { %3506 = vtanh.f32 %v1782_v22  ;;  %v4244_v29 = vadd.f32 %v1655_v18, %v1610_v51  ;;  %v1612_v23 = vpop.f32.mrb[25].mxu0  ;;  %v3011_v62 = vmul.f32 -1.442695, %v1782_v22 }
0x1726   :  { %v4246_v7 = vadd.f32 %v1659_v12, %v1612_v23 }
0x1728   :  { %v1616_v24 = vpop.f32.mrb[26].mxu0 }
0x1729   :  { %v4248_v25 = vadd.f32 %v1655_v18, %v1616_v24  ;;  %v1618_v44 = vpop.f32.mrb[27].mxu0 }
0x172a   :  { %v4250_v16 = vadd.f32 %v1659_v12, %v1618_v44 }
0x172c   :  { %v1622_v40 = vpop.f32.mrb[28].mxu0 }
0x172d   :  { %v4252_v41 = vadd.f32 %v1655_v18, %v1622_v40  ;;  %v1624_v27 = vpop.f32.mrb[29].mxu0 }
0x172e   :  { %v4254_v31 = vadd.f32 %v1659_v12, %v1624_v27 }
0x172f   :  { %v3507_v32 = vpop.eup %3506 }
0x1730   :  { %1794 = vrot.lane.b32.xlu1 %v3507_v32, %s3635_s0  ;;  %v1628_v35 = vpop.f32.mrb[30].mxu0 }
0x1731   :  { %v4257_v36 = vadd.f32 %v1655_v18, %v1628_v35  ;;  %v1630_v47 = vpop.f32.mrb[31].mxu0 }
0x1732   :  { %v4259_v37 = vadd.f32 %v1659_v12, %v1630_v47 }
0x1734   :  { %v1634_v39 = vpop.f32.mrb[32].mxu0 }
0x1735   :  { %v4261_v42 = vadd.f32 %v1655_v18, %v1634_v39  ;;  %v1636_v43 = vpop.f32.mrb[33].mxu0 }
0x1736   :  { %v4263_v48 = vadd.f32 %v1659_v12, %v1636_v43 }
0x1738   :  { %v1640_v2 = vpop.f32.mrb[34].mxu0 }
0x1739   :  { %v4265_v63 = vadd.f32 %v1655_v18, %v1640_v2  ;;  %v1642_v49 = vpop.f32.mrb[35].mxu0 }
0x173a   :  { %v1675_v46 = vadd.f32 %v1659_v12, %v1642_v49 }
0x173c   :  { %v1646_v53 = vpop.f32.mrb[36].mxu0 }
0x173d   :  { %v4267_v55 = vadd.f32 %v1655_v18, %v1646_v53  ;;  %v1648_v57 = vpop.f32.mrb[37].mxu0 }
0x173e   :  { %v1677_v58 = vadd.f32 %v1659_v12, %v1648_v57 }
0x1740   :  { %v1784_v8 = vadd.f32 %v1778_v54, %v1677_v58 }
0x1742   :  { %3508 = vtanh.f32 %v1784_v8  ;;  %v3012_v9 = vmul.f32 -1.442695, %v1784_v8 }
0x1743   :  { %3510 = vpow2.f32 %v3011_v62 }
0x174c   :  { %v3509_v60 = vpop.eup %3508 }
0x174d   :  { %1818 = vrot.lane.b32.xlu0 %v3509_v60, %s3635_s0  ;;  %v3511_v59 = vpop.eup %3510 }
0x174e   :  { %v1788_v5 = vadd.f32 1.0, %v3511_v59 }
0x1750   :  { %3512 = vrcp.f32 %v1788_v5 }
0x1751   :  { %3514 = vpow2.f32 %v3012_v9 }
0x175a   :  { %v3513_v38 = vpop.eup %3512 }
0x175b   :  { %v3515_v13 = vpop.eup %3514  ;;  %v1792_v11 = vmul.f32 0.0, %v3513_v38 }
0x175c   :  { %v1812_v52 = vadd.f32 1.0, %v3515_v13 }
0x175e   :  { %3516 = vrcp.f32 %v1812_v52 }
0x1768   :  { %v3517_v1 = vpop.eup %3516 }
0x1769   :  { %v1816_v10 = vmul.f32 0.0, %v3517_v1 }
0x17a2   :  { %v1795_v0 = vpop.permute.xlu1 %1794 }
0x17a3   :  { %v1797_v61 = vmul.f32 %v3513_v38, %v1795_v0 }
0x17a5   :  { %1799 = vrot.lane.b32.xlu1 %v1797_v61, %s3636_s2 }
0x17bf   :  { %v1819_v4 = vpop.permute.xlu0 %1818 }
0x17c0   :  { %v1821_v6 = vmul.f32 %v3517_v1, %v1819_v4 }
0x17c2   :  { %1823 = vrot.lane.b32.xlu0 %v1821_v6, %s3636_s2 }
0x1817   :  { %v1800_v14 = vpop.permute.xlu1 %1799 }
0x1818   :  { %v1802_v15 = vadd.f32 %v1800_v14, %v1792_v11 }
0x181a   :  { %3518 = vtanh.f32 %v1802_v15 }
0x1824   :  { %v3519_v54 = vpop.eup %3518 }
0x1825   :  { %1805 = vrot.lane.b32.xlu1 %v3519_v54, %s3635_s0 }
0x1834   :  { %v1824_v18 = vpop.permute.xlu0 %1823 }
0x1835   :  { %v1826_v12 = vadd.f32 %v1824_v18, %v1816_v10 }
0x1837   :  { %3520 = vtanh.f32 %v1826_v12 }
0x1841   :  { %v3521_v21 = vpop.eup %3520 }
0x1842   :  { %1829 = vrot.lane.b32.xlu0 %v3521_v21, %s3635_s0 }
0x1897   :  { %v1806_v45 = vpop.permute.xlu1 %1805 }
0x1898   :  { %v4274_v17 = vmul.f32 %v3513_v38, %v1806_v45 }
0x189a   :  { %1834 = vrot.lane.b32.xlu1 %v4274_v17, %s3636_s2 }
0x18b4   :  { %v1830_v22 = vpop.permute.xlu0 %1829 }
0x18b5   :  { %v4278_v51 = vmul.f32 %v3517_v1, %v1830_v22 }
0x18b7   :  { %1838 = vrot.lane.b32.xlu0 %v4278_v51, %s3635_s0 }
0x190c   :  { %v1835_v23 = vpop.permute.xlu1 %1834 }
0x1929   :  { %v1839_v24 = vpop.permute.xlu0 %1838 }
0x192a   :  { %v1841_v44 = vsel %vm361_vm1, %v1835_v23, %v1839_v24 }
0x192b   :  { %3013 = vmatmul.mubr.msk.f32.vlgmr.msra.gmra.mrb[12].mxu1 %vm226_vm2, %v1841_v44 }
0x192c   :  { %3252 = vmatpush1.bf16.msra.mxu1 %v4101_v28  ;;  %2046 = vmatprep.mubr.f32.mxu1 %v3634_v3 }
0x192d   :  { %3254 = vmatprep.subr.bf16.mxu1 %v4112_v33 }
0x1930   :  { %3256 = vmatpush1.bf16.msra.mxu1 %v4120_v56 }
0x1931   :  { %3258 = vmatprep.subr.bf16.mxu1 %v4130_v50 }
0x1934   :  { %3260 = vmatpush1.bf16.msra.mxu1 %v4138_v30 }
0x1935   :  { %3262 = vmatprep.subr.bf16.mxu1 %v4148_v34 }
0x1938   :  { %3264 = vmatpush1.bf16.msra.mxu1 %v4156_v19 }
0x1939   :  { %3282 = vmatprep.subr.bf16.mxu1 %v4095_v26 }
0x19fe   :  { %v1911_v40 = vpop.f32.mrb[12].mxu1 }
0x19ff   :  { %v1917_v27 = vadd.f32 %v1911_v40, %v4244_v29  ;;  %v1913_v32 = vpop.f32.mrb[13].mxu1 }
0x1a00   :  { %v1919_v35 = vadd.f32 %v1913_v32, %v1675_v46 }
0x1a01   :  { %3522 = vtanh.f32 %v1917_v27  ;;  %v3014_v43 = vmul.f32 -1.442695, %v1917_v27 }
0x1a02   :  { %3524 = vtanh.f32 %v1919_v35  ;;  %v3015_v2 = vmul.f32 -1.442695, %v1919_v35 }
0x1a03   :  { %3526 = vpow2.f32 %v3014_v43 }
0x1a04   :  { %3528 = vpow2.f32 %v3015_v2 }
0x1a0b   :  { %v3523_v47 = vpop.eup %3522 }
0x1a0c   :  { %v3525_v39 = vpop.eup %3524  ;;  %1929 = vrot.lane.b32.xlu1 %v3523_v47, %s3635_s0 }
0x1a0d   :  { %1953 = vrot.lane.b32.xlu0 %v3525_v39, %s3635_s0  ;;  %v3527_v49 = vpop.eup %3526 }
0x1a0e   :  { %v3529_v53 = vpop.eup %3528  ;;  %v1923_v57 = vadd.f32 1.0, %v3527_v49 }
0x1a0f   :  { %v1947_v58 = vadd.f32 1.0, %v3529_v53 }
0x1a10   :  { %3530 = vrcp.f32 %v1923_v57 }
0x1a11   :  { %3532 = vrcp.f32 %v1947_v58 }
0x1a1a   :  { %v3531_v29 = vpop.eup %3530 }
0x1a1b   :  { %v3533_v8 = vpop.eup %3532  ;;  %v1927_v5 = vmul.f32 %v3531_v29, %v1802_v15 }
0x1a1c   :  { %v1951_v38 = vmul.f32 %v3533_v8, %v1826_v12 }
0x1a7e   :  { %v1930_v46 = vpop.permute.xlu1 %1929 }
0x1a7f   :  { %v1932_v60 = vmul.f32 %v3531_v29, %v1930_v46  ;;  %v1954_v62 = vpop.permute.xlu0 %1953 }
0x1a80   :  { %v1956_v59 = vmul.f32 %v3533_v8, %v1954_v62 }
0x1a81   :  { %1934 = vrot.lane.b32.xlu1 %v1932_v60, %s3636_s2 }
0x1a82   :  { %1958 = vrot.lane.b32.xlu0 %v1956_v59, %s3636_s2 }
0x1af3   :  { %v1935_v9 = vpop.permute.xlu1 %1934 }
0x1af4   :  { %v1937_v0 = vadd.f32 %v1935_v9, %v1927_v5  ;;  %v1959_v61 = vpop.permute.xlu0 %1958 }
0x1af5   :  { %v1961_v13 = vadd.f32 %v1959_v61, %v1951_v38 }
0x1af6   :  { %3534 = vtanh.f32 %v1937_v0 }
0x1af7   :  { %3536 = vtanh.f32 %v1961_v13 }
0x1b00   :  { %v3535_v52 = vpop.eup %3534 }
0x1b01   :  { %v3537_v1 = vpop.eup %3536  ;;  %1940 = vrot.lane.b32.xlu1 %v3535_v52, %s3635_s0 }
0x1b02   :  { %1964 = vrot.lane.b32.xlu0 %v3537_v1, %s3635_s0 }
0x1b73   :  { %v1941_v4 = vpop.permute.xlu1 %1940 }
0x1b74   :  { %v4300_v6 = vmul.f32 %v3531_v29, %v1941_v4  ;;  %v1965_v11 = vpop.permute.xlu0 %1964 }
0x1b75   :  { %v4302_v14 = vmul.f32 %v3533_v8, %v1965_v11 }
0x1b76   :  { %1969 = vrot.lane.b32.xlu1 %v4300_v6, %s3636_s2  ;;  %v1977_v59 = vmax.f32 %v4274_v17, %v4300_v6 }
0x1b77   :  { %1973 = vrot.lane.b32.xlu0 %v4302_v14, %s3635_s0  ;;  %v1978_v38 = vmax.f32 %v4278_v51, %v4302_v14 }
0x1be8   :  { %v1970_v15 = vpop.permute.xlu1 %1969 }
0x1be9   :  { %v1974_v54 = vpop.permute.xlu0 %1973 }
0x1bea   :  { %v1976_v10 = vsel %vm361_vm1, %v1970_v15, %v1974_v54 }
0x1beb   :  { %3016 = vmatmul.mubr.msk.f32.vlgmr.msra.gmra.mrb[14].mxu1 %vm226_vm2, %v1976_v10 }
0x1bec   :  { %3284 = vmatpush1.bf16.msra.mxu1 %v4101_v28  ;;  %2320 = vmatprep.mubr.f32.mxu1 %v3634_v3 }
0x1bed   :  { %3286 = vmatprep.subr.bf16.mxu1 %v4112_v33 }
0x1bf0   :  { %3288 = vmatpush1.bf16.msra.mxu1 %v4120_v56 }
0x1bf1   :  { %3290 = vmatprep.subr.bf16.mxu1 %v4130_v50 }
0x1bf4   :  { %3292 = vmatpush1.bf16.msra.mxu1 %v4138_v30 }
0x1bf5   :  { %3294 = vmatprep.subr.bf16.mxu1 %v4148_v34 }
0x1bf8   :  { %3296 = vmatpush1.bf16.msra.mxu1 %v4156_v19 }
0x1bf9   :  { %3314 = vmatprep.subr.bf16.mxu1 %v4095_v26 }
0x1cbe   :  { %v2048_v18 = vpop.f32.mrb[14].mxu1 }
0x1cbf   :  { %v2054_v12 = vadd.f32 %v2048_v18, %v4248_v25  ;;  %v2050_v21 = vpop.f32.mrb[15].mxu1 }
0x1cc0   :  { %v2056_v45 = vadd.f32 %v2050_v21, %v4263_v48 }
0x1cc1   :  { %3538 = vtanh.f32 %v2054_v12  ;;  %v3017_v24 = vmul.f32 -1.442695, %v2054_v12 }
0x1cc2   :  { %3540 = vtanh.f32 %v2056_v45  ;;  %v3018_v44 = vmul.f32 -1.442695, %v2056_v45 }
0x1cc3   :  { %3542 = vpow2.f32 %v3017_v24 }
0x1cc4   :  { %3544 = vpow2.f32 %v3018_v44 }
0x1ccb   :  { %v3539_v22 = vpop.eup %3538 }
0x1ccc   :  { %v3541_v23 = vpop.eup %3540  ;;  %2066 = vrot.lane.b32.xlu1 %v3539_v22, %s3635_s0 }
0x1ccd   :  { %2090 = vrot.lane.b32.xlu0 %v3541_v23, %s3635_s0  ;;  %v3543_v40 = vpop.eup %3542 }
0x1cce   :  { %v3545_v27 = vpop.eup %3544  ;;  %v2060_v32 = vadd.f32 1.0, %v3543_v40 }
0x1ccf   :  { %v2084_v35 = vadd.f32 1.0, %v3545_v27 }
0x1cd0   :  { %3546 = vrcp.f32 %v2060_v32 }
0x1cd1   :  { %3548 = vrcp.f32 %v2084_v35 }
0x1cda   :  { %v3547_v25 = vpop.eup %3546 }
0x1cdb   :  { %v3549_v47 = vpop.eup %3548  ;;  %v2064_v49 = vmul.f32 %v3547_v25, %v1937_v0 }
0x1cdc   :  { %v2088_v57 = vmul.f32 %v3549_v47, %v1961_v13 }
0x1d3e   :  { %v2067_v48 = vpop.permute.xlu1 %2066 }
0x1d3f   :  { %v2069_v39 = vmul.f32 %v3547_v25, %v2067_v48  ;;  %v2091_v43 = vpop.permute.xlu0 %2090 }
0x1d40   :  { %v2093_v2 = vmul.f32 %v3549_v47, %v2091_v43 }
0x1d41   :  { %2071 = vrot.lane.b32.xlu1 %v2069_v39, %s3636_s2 }
0x1d42   :  { %2095 = vrot.lane.b32.xlu0 %v2093_v2, %s3636_s2 }
0x1db3   :  { %v2072_v53 = vpop.permute.xlu1 %2071 }
0x1db4   :  { %v2074_v58 = vadd.f32 %v2072_v53, %v2064_v49  ;;  %v2096_v29 = vpop.permute.xlu0 %2095 }
0x1db5   :  { %v2098_v46 = vadd.f32 %v2096_v29, %v2088_v57 }
0x1db6   :  { %3550 = vtanh.f32 %v2074_v58 }
0x1db7   :  { %3552 = vtanh.f32 %v2098_v46 }
0x1dc0   :  { %v3551_v8 = vpop.eup %3550 }
0x1dc1   :  { %v3553_v60 = vpop.eup %3552  ;;  %2077 = vrot.lane.b32.xlu1 %v3551_v8, %s3635_s0 }
0x1dc2   :  { %2101 = vrot.lane.b32.xlu0 %v3553_v60, %s3635_s0 }
0x1e33   :  { %v2078_v62 = vpop.permute.xlu1 %2077 }
0x1e34   :  { %v2080_v5 = vmul.f32 %v3547_v25, %v2078_v62  ;;  %v2102_v9 = vpop.permute.xlu0 %2101 }
0x1e35   :  { %v2104_v0 = vmul.f32 %v3549_v47, %v2102_v9 }
0x1e36   :  { %v4331_v61 = vmax.f32 %v1977_v59, %v2080_v5  ;;  %2106 = vrot.lane.b32.xlu1 %v2080_v5, %s3636_s2 }
0x1e37   :  { %v4334_v13 = vmax.f32 %v1978_v38, %v2104_v0  ;;  %2110 = vrot.lane.b32.xlu0 %v2104_v0, %s3635_s0 }
0x1ea8   :  { %v2107_v52 = vpop.permute.xlu1 %2106 }
0x1ea9   :  { %v2111_v1 = vpop.permute.xlu0 %2110 }
0x1eaa   :  { %v2113_v4 = vsel %vm361_vm1, %v2107_v52, %v2111_v1 }
0x1eab   :  { %3019 = vmatmul.mubr.msk.f32.vlgmr.msra.gmra.mrb[38].mxu0 %vm226_vm2, %v2113_v4 }
0x1eac   :  { %3300 = vmatpush1.bf16.msra.mxu0 %v4101_v28  ;;  %2457 = vmatprep.mubr.f32.mxu0 %v3634_v3 }
0x1ead   :  { %3302 = vmatprep.subr.bf16.mxu0 %v4112_v33 }
0x1eb0   :  { %3304 = vmatpush1.bf16.msra.mxu0 %v4120_v56 }
0x1eb1   :  { %3306 = vmatprep.subr.bf16.mxu0 %v4130_v50 }
0x1eb4   :  { %3308 = vmatpush1.bf16.msra.mxu0 %v4138_v30 }
0x1eb5   :  { %3310 = vmatprep.subr.bf16.mxu0 %v4148_v34 }
0x1eb8   :  { %3312 = vmatpush1.bf16.msra.mxu0 %v4156_v19 }
0x1eb9   :  { %3330 = vmatprep.subr.bf16.mxu0 %v4095_v26 }
0x1f7e   :  { %v2185_v17 = vpop.f32.mrb[38].mxu0 }
0x1f7f   :  { %v2191_v51 = vadd.f32 %v2185_v17, %v4252_v41  ;;  %v2187_v6 = vpop.f32.mrb[39].mxu0 }
0x1f80   :  { %v2193_v11 = vadd.f32 %v2187_v6, %v4259_v37 }
0x1f81   :  { %3554 = vtanh.f32 %v2191_v51  ;;  %v3020_v54 = vmul.f32 -1.442695, %v2191_v51 }
0x1f82   :  { %3556 = vtanh.f32 %v2193_v11  ;;  %v3021_v10 = vmul.f32 -1.442695, %v2193_v11 }
0x1f83   :  { %3558 = vpow2.f32 %v3020_v54 }
0x1f84   :  { %3560 = vpow2.f32 %v3021_v10 }
0x1f8b   :  { %v3555_v14 = vpop.eup %3554 }
0x1f8c   :  { %v3557_v15 = vpop.eup %3556  ;;  %2203 = vrot.lane.b32.xlu1 %v3555_v14, %s3635_s0 }
0x1f8d   :  { %2227 = vrot.lane.b32.xlu0 %v3557_v15, %s3635_s0  ;;  %v3559_v18 = vpop.eup %3558 }
0x1f8e   :  { %v3561_v26 = vpop.eup %3560  ;;  %v2197_v12 = vadd.f32 1.0, %v3559_v18 }
0x1f8f   :  { %v2221_v21 = vadd.f32 1.0, %v3561_v26 }
0x1f90   :  { %3562 = vrcp.f32 %v2197_v12 }
0x1f91   :  { %3564 = vrcp.f32 %v2221_v21 }
0x1f9a   :  { %v3563_v41 = vpop.eup %3562 }
0x1f9b   :  { %v3565_v45 = vpop.eup %3564  ;;  %v2201_v44 = vmul.f32 %v3563_v41, %v2074_v58 }
0x1f9c   :  { %v2225_v27 = vmul.f32 %v3565_v45, %v2098_v46 }
0x1ffe   :  { %v2204_v37 = vpop.permute.xlu1 %2203 }
0x1fff   :  { %v2206_v22 = vmul.f32 %v3563_v41, %v2204_v37  ;;  %v2228_v23 = vpop.permute.xlu0 %2227 }
0x2000   :  { %v2230_v24 = vmul.f32 %v3565_v45, %v2228_v23 }
0x2001   :  { %2208 = vrot.lane.b32.xlu1 %v2206_v22, %s3636_s2 }
0x2002   :  { %2232 = vrot.lane.b32.xlu0 %v2230_v24, %s3636_s2 }
0x2073   :  { %v2209_v40 = vpop.permute.xlu1 %2208 }
0x2074   :  { %v2211_v32 = vadd.f32 %v2209_v40, %v2201_v44  ;;  %v2233_v35 = vpop.permute.xlu0 %2232 }
0x2075   :  { %v2235_v25 = vadd.f32 %v2233_v35, %v2225_v27 }
0x2076   :  { %3566 = vtanh.f32 %v2211_v32 }
0x2077   :  { %3568 = vtanh.f32 %v2235_v25 }
0x2080   :  { %v3567_v48 = vpop.eup %3566 }
0x2081   :  { %v3569_v47 = vpop.eup %3568  ;;  %2214 = vrot.lane.b32.xlu1 %v3567_v48, %s3635_s0 }
0x2082   :  { %2238 = vrot.lane.b32.xlu0 %v3569_v47, %s3635_s0 }
0x20f3   :  { %v2215_v39 = vpop.permute.xlu1 %2214 }
0x20f4   :  { %v4356_v43 = vmul.f32 %v3563_v41, %v2215_v39  ;;  %v2239_v2 = vpop.permute.xlu0 %2238 }
0x20f5   :  { %v4358_v49 = vmul.f32 %v3565_v45, %v2239_v2 }
0x20f6   :  { %v2251_v53 = vmax.f32 %v4331_v61, %v4356_v43  ;;  %2243 = vrot.lane.b32.xlu1 %v4356_v43, %s3636_s2 }
0x20f7   :  { %v2252_v57 = vmax.f32 %v4334_v13, %v4358_v49  ;;  %2247 = vrot.lane.b32.xlu0 %v4358_v49, %s3635_s0 }
0x2168   :  { %v2244_v58 = vpop.permute.xlu1 %2243 }
0x2169   :  { %v2248_v29 = vpop.permute.xlu0 %2247 }
0x216a   :  { %v2250_v46 = vsel %vm361_vm1, %v2244_v58, %v2248_v29 }
0x216b   :  { %3022 = vmatmul.mubr.msk.f32.vlgmr.msra.gmra.mrb[16].mxu1 %vm226_vm2, %v2250_v46 }
0x216c   :  { %3316 = vmatpush1.bf16.msra.mxu1 %v4101_v28  ;;  %2594 = vmatprep.mubr.f32.mxu1 %v3634_v3 }
0x216d   :  { %3318 = vmatprep.subr.bf16.mxu1 %v4112_v33 }
0x2170   :  { %3320 = vmatpush1.bf16.msra.mxu1 %v4120_v56 }
0x2171   :  { %3322 = vmatprep.subr.bf16.mxu1 %v4130_v50 }
0x2174   :  { %3324 = vmatpush1.bf16.msra.mxu1 %v4138_v30 }
0x2175   :  { %3326 = vmatprep.subr.bf16.mxu1 %v4148_v34 }
0x2178   :  { %3328 = vmatpush1.bf16.msra.mxu1 %v4156_v19 }
0x223e   :  { %v2322_v8 = vpop.f32.mrb[16].mxu1 }
0x223f   :  { %v2328_v60 = vadd.f32 %v2322_v8, %v4257_v36  ;;  %v2324_v62 = vpop.f32.mrb[17].mxu1 }
0x2240   :  { %v2330_v59 = vadd.f32 %v2324_v62, %v4254_v31 }
0x2241   :  { %3570 = vtanh.f32 %v2328_v60  ;;  %v3023_v38 = vmul.f32 -1.442695, %v2328_v60 }
0x2242   :  { %3572 = vtanh.f32 %v2330_v59  ;;  %v3024_v0 = vmul.f32 -1.442695, %v2330_v59 }
0x2243   :  { %3574 = vpow2.f32 %v3023_v38 }
0x2244   :  { %3576 = vpow2.f32 %v3024_v0 }
0x224b   :  { %v3571_v5 = vpop.eup %3570 }
0x224c   :  { %v3573_v9 = vpop.eup %3572  ;;  %2340 = vrot.lane.b32.xlu1 %v3571_v5, %s3635_s0 }
0x224d   :  { %2364 = vrot.lane.b32.xlu0 %v3573_v9, %s3635_s0  ;;  %v3575_v61 = vpop.eup %3574 }
0x224e   :  { %v3577_v13 = vpop.eup %3576  ;;  %v2334_v52 = vadd.f32 1.0, %v3575_v61 }
0x224f   :  { %v2358_v1 = vadd.f32 1.0, %v3577_v13 }
0x2250   :  { %3578 = vrcp.f32 %v2334_v52 }
0x2251   :  { %3580 = vrcp.f32 %v2358_v1 }
0x225a   :  { %v3579_v36 = vpop.eup %3578 }
0x225b   :  { %v3581_v4 = vpop.eup %3580  ;;  %v2338_v11 = vmul.f32 %v3579_v36, %v2211_v32 }
0x225c   :  { %v2362_v15 = vmul.f32 %v3581_v4, %v2235_v25 }
0x22be   :  { %v2341_v31 = vpop.permute.xlu1 %2340 }
0x22bf   :  { %v2343_v17 = vmul.f32 %v3579_v36, %v2341_v31  ;;  %v2365_v51 = vpop.permute.xlu0 %2364 }
0x22c0   :  { %v2367_v6 = vmul.f32 %v3581_v4, %v2365_v51 }
0x22c1   :  { %2345 = vrot.lane.b32.xlu1 %v2343_v17, %s3636_s2 }
0x22c2   :  { %2369 = vrot.lane.b32.xlu0 %v2367_v6, %s3636_s2 }
0x2333   :  { %v2346_v14 = vpop.permute.xlu1 %2345 }
0x2334   :  { %v2348_v54 = vadd.f32 %v2346_v14, %v2338_v11  ;;  %v2370_v10 = vpop.permute.xlu0 %2369 }
0x2335   :  { %v2372_v18 = vadd.f32 %v2370_v10, %v2362_v15 }
0x2336   :  { %3582 = vtanh.f32 %v2348_v54 }
0x2337   :  { %3584 = vtanh.f32 %v2372_v18 }
0x2340   :  { %v3583_v26 = vpop.eup %3582 }
0x2341   :  { %v3585_v12 = vpop.eup %3584  ;;  %2351 = vrot.lane.b32.xlu1 %v3583_v26, %s3635_s0 }
0x2342   :  { %2375 = vrot.lane.b32.xlu0 %v3585_v12, %s3635_s0 }
0x23b3   :  { %v2352_v21 = vpop.permute.xlu1 %2351 }
0x23b4   :  { %v2354_v41 = vmul.f32 %v3579_v36, %v2352_v21  ;;  %v2376_v37 = vpop.permute.xlu0 %2375 }
0x23b5   :  { %v2378_v45 = vmul.f32 %v3581_v4, %v2376_v37 }
0x23b6   :  { %v4386_v22 = vmax.f32 %v2251_v53, %v2354_v41  ;;  %2380 = vrot.lane.b32.xlu1 %v2354_v41, %s3636_s2 }
0x23b7   :  { %v4389_v23 = vmax.f32 %v2252_v57, %v2378_v45  ;;  %2384 = vrot.lane.b32.xlu0 %v2378_v45, %s3635_s0 }
0x2428   :  { %v2381_v24 = vpop.permute.xlu1 %2380 }
0x2429   :  { %v2385_v44 = vpop.permute.xlu0 %2384 }
0x242a   :  { %v2387_v40 = vsel %vm361_vm1, %v2381_v24, %v2385_v44 }
0x242b   :  { %3025 = vmatmul.mubr.msk.f32.vlgmr.msra.gmra.mrb[40].mxu0 %vm226_vm2, %v2387_v40 }
0x242c   :  { %3332 = vmatpush1.bf16.msra.mxu0 %v4101_v28  ;;  %2731 = vmatprep.mubr.f32.mxu0 %v3634_v3 }
0x242d   :  { %3334 = vmatprep.subr.bf16.mxu0 %v4112_v33 }
0x2430   :  { %3336 = vmatpush1.bf16.msra.mxu0 %v4120_v56 }
0x2431   :  { %3338 = vmatprep.subr.bf16.mxu0 %v4130_v50 }
0x2434   :  { %3340 = vmatpush1.bf16.msra.mxu0 %v4138_v30 }
0x2435   :  { %3342 = vmatprep.subr.bf16.mxu0 %v4148_v34 }
0x2438   :  { %3344 = vmatpush1.bf16.msra.mxu0 %v4156_v19 }
0x24fe   :  { %v2459_v27 = vpop.f32.mrb[40].mxu0 }
0x24ff   :  { %v2465_v32 = vadd.f32 %v2459_v27, %v4261_v42  ;;  %v2461_v35 = vpop.f32.mrb[41].mxu0 }
0x2500   :  { %v2467_v28 = vadd.f32 %v2461_v35, %v4250_v16 }
0x2501   :  { %3586 = vtanh.f32 %v2465_v32  ;;  %v3026_v56 = vmul.f32 -1.442695, %v2465_v32 }
0x2502   :  { %3588 = vtanh.f32 %v2467_v28  ;;  %v3027_v50 = vmul.f32 -1.442695, %v2467_v28 }
0x2503   :  { %3590 = vpow2.f32 %v3026_v56 }
0x2504   :  { %3592 = vpow2.f32 %v3027_v50 }
0x250b   :  { %v3587_v25 = vpop.eup %3586 }
0x250c   :  { %v3589_v33 = vpop.eup %3588  ;;  %2477 = vrot.lane.b32.xlu1 %v3587_v25, %s3635_s0 }
0x250d   :  { %2501 = vrot.lane.b32.xlu0 %v3589_v33, %s3635_s0  ;;  %v3591_v30 = vpop.eup %3590 }
0x250e   :  { %v3593_v34 = vpop.eup %3592  ;;  %v2471_v19 = vadd.f32 1.0, %v3591_v30 }
0x250f   :  { %v2495_v48 = vadd.f32 1.0, %v3593_v34 }
0x2510   :  { %3594 = vrcp.f32 %v2471_v19 }
0x2511   :  { %3596 = vrcp.f32 %v2495_v48 }
0x251a   :  { %v3595_v42 = vpop.eup %3594 }
0x251b   :  { %v3597_v47 = vpop.eup %3596  ;;  %v2475_v49 = vmul.f32 %v3595_v42, %v2348_v54 }
0x251c   :  { %v2499_v57 = vmul.f32 %v3597_v47, %v2372_v18 }
0x257e   :  { %v2478_v16 = vpop.permute.xlu1 %2477 }
0x257f   :  { %v2480_v39 = vmul.f32 %v3595_v42, %v2478_v16  ;;  %v2502_v43 = vpop.permute.xlu0 %2501 }
0x2580   :  { %v2504_v2 = vmul.f32 %v3597_v47, %v2502_v43 }
0x2581   :  { %2482 = vrot.lane.b32.xlu1 %v2480_v39, %s3636_s2 }
0x2582   :  { %2506 = vrot.lane.b32.xlu0 %v2504_v2, %s3636_s2 }
0x25f3   :  { %v2483_v53 = vpop.permute.xlu1 %2482 }
0x25f4   :  { %v2485_v58 = vadd.f32 %v2483_v53, %v2475_v49  ;;  %v2507_v29 = vpop.permute.xlu0 %2506 }
0x25f5   :  { %v2509_v46 = vadd.f32 %v2507_v29, %v2499_v57 }
0x25f6   :  { %3598 = vtanh.f32 %v2485_v58 }
0x25f7   :  { %3600 = vtanh.f32 %v2509_v46 }
0x2600   :  { %v3599_v8 = vpop.eup %3598 }
0x2601   :  { %v3601_v60 = vpop.eup %3600  ;;  %2488 = vrot.lane.b32.xlu1 %v3599_v8, %s3635_s0 }
0x2602   :  { %2512 = vrot.lane.b32.xlu0 %v3601_v60, %s3635_s0 }
0x2673   :  { %v2489_v62 = vpop.permute.xlu1 %2488 }
0x2674   :  { %v2491_v59 = vmul.f32 %v3595_v42, %v2489_v62  ;;  %v2513_v5 = vpop.permute.xlu0 %2512 }
0x2675   :  { %v2515_v9 = vmul.f32 %v3597_v47, %v2513_v5 }
0x2676   :  { %v2525_v38 = vmax.f32 %v4386_v22, %v2491_v59  ;;  %2517 = vrot.lane.b32.xlu1 %v2491_v59, %s3636_s2 }
0x2677   :  { %v2526_v0 = vmax.f32 %v4389_v23, %v2515_v9  ;;  %2521 = vrot.lane.b32.xlu0 %v2515_v9, %s3635_s0 }
0x26e8   :  { %v2518_v61 = vpop.permute.xlu1 %2517 }
0x26e9   :  { %v2522_v13 = vpop.permute.xlu0 %2521 }
0x26ea   :  { %v2524_v52 = vsel %vm361_vm1, %v2518_v61, %v2522_v13  ;;  %v2796_v61 = vld [vmem:[%s4487_s7 + $0x20] sm:$0xff]  ;;  %v2797_v13 = vld [vmem:[%s4487_s7 + $0x28] sm:$0xff] }
0x26eb   :  { %3028 = vmatmul.mubr.msk.f32.vlgmr.msra.gmra.mrb[18].mxu1 %vm226_vm2, %v2524_v52  ;;  %v2798_v52 = vld [vmem:[%s4487_s7 + $0x30] sm:$0xff] }
0x26ec   :  { %3055 = vmatprep.mubr.msk.f32.mxu1 %vm3638_vm3, %v3634_v3 }
0x27be   :  { %v2596_v1 = vpop.f32.mrb[18].mxu1 }
0x27bf   :  { %v2602_v36 = vadd.f32 %v2596_v1, %v4265_v63  ;;  %v2598_v31 = vpop.f32.mrb[19].mxu1  ;;  %v3346_v1 = vpack.c.bf16 %v2797_v13, %v2796_v61 }
0x27c0   :  { %v2604_v4 = vadd.f32 %v2598_v31, %v4246_v7 }
0x27c1   :  { %3602 = vtanh.f32 %v2602_v36  ;;  %v3029_v6 = vmul.f32 -1.442695, %v2602_v36  ;;  %v2799_v36 = vld [vmem:[%s4487_s7 + $0x38] sm:$0xff] }
0x27c2   :  { %3604 = vtanh.f32 %v2604_v4  ;;  %v3030_v11 = vmul.f32 -1.442695, %v2604_v4  ;;  %v3349_v31 = vpack.c.bf16 %v2799_v36, %v2798_v52 }
0x27c3   :  { %3606 = vpow2.f32 %v3029_v6 }
0x27c4   :  { %3608 = vpow2.f32 %v3030_v11 }
0x27cb   :  { %v3603_v17 = vpop.eup %3602 }
0x27cc   :  { %v3605_v51 = vpop.eup %3604  ;;  %2614 = vrot.lane.b32.xlu1 %v3603_v17, %s3635_s0 }
0x27cd   :  { %2638 = vrot.lane.b32.xlu0 %v3605_v51, %s3635_s0  ;;  %v3607_v14 = vpop.eup %3606 }
0x27ce   :  { %v3609_v15 = vpop.eup %3608  ;;  %v2608_v54 = vadd.f32 1.0, %v3607_v14 }
0x27cf   :  { %v2632_v10 = vadd.f32 1.0, %v3609_v15 }
0x27d0   :  { %3610 = vrcp.f32 %v2608_v54 }
0x27d1   :  { %3612 = vrcp.f32 %v2632_v10  ;;  %v2792_v10 = vld [vmem:[%s4487_s7] sm:$0xff] }
0x27da   :  { %v3611_v63 = vpop.eup %3610 }
0x27db   :  { %v3613_v18 = vpop.eup %3612  ;;  %v2612_v41 = vmul.f32 %v3611_v63, %v2485_v58 }
0x27dc   :  { %v2636_v45 = vmul.f32 %v3613_v18, %v2509_v46 }
0x283e   :  { %v2615_v7 = vpop.permute.xlu1 %2614 }
0x283f   :  { %v2617_v26 = vmul.f32 %v3611_v63, %v2615_v7  ;;  %v2639_v12 = vpop.permute.xlu0 %2638 }
0x2840   :  { %v2641_v21 = vmul.f32 %v3613_v18, %v2639_v12 }
0x2841   :  { %2619 = vrot.lane.b32.xlu1 %v2617_v26, %s3636_s2  ;;  %v2795_v26 = vld [vmem:[%s4487_s7 + $0x18] sm:$0xff] }
0x2842   :  { %2643 = vrot.lane.b32.xlu0 %v2641_v21, %s3636_s2 }
0x28b3   :  { %v2620_v37 = vpop.permute.xlu1 %2619 }
0x28b4   :  { %v2622_v22 = vadd.f32 %v2620_v37, %v2612_v41  ;;  %v2644_v23 = vpop.permute.xlu0 %2643 }
0x28b5   :  { %v2646_v24 = vadd.f32 %v2644_v23, %v2636_v45  ;;  %v3036_v23 = vld [vmem:[%s4488_s8] ss:$0 sm:$0xff] }
0x28b6   :  { %3614 = vtanh.f32 %v2622_v22 }
0x28b7   :  { %3616 = vtanh.f32 %v2646_v24 }
0x28c0   :  { %v3615_v44 = vpop.eup %3614 }
0x28c1   :  { %v3617_v40 = vpop.eup %3616  ;;  %2625 = vrot.lane.b32.xlu1 %v3615_v44, %s3635_s0 }
0x28c2   :  { %2649 = vrot.lane.b32.xlu0 %v3617_v40, %s3635_s0 }
0x2933   :  { %v2626_v27 = vpop.permute.xlu1 %2625 }
0x2934   :  { %v2628_v32 = vmul.f32 %v3611_v63, %v2626_v27  ;;  %v2650_v35 = vpop.permute.xlu0 %2649  ;;  %v2793_v63 = vld [vmem:[%s4487_s7 + $0x8] sm:$0xff] }
0x2935   :  { %v2652_v28 = vmul.f32 %v3613_v18, %v2650_v35  ;;  %v3352_v7 = vpack.c.bf16 %v2793_v63, %v2792_v10  ;;  %v2794_v18 = vld [vmem:[%s4487_s7 + $0x10] sm:$0xff] }
0x2936   :  { %v4424_v25 = vmax.f32 %v2525_v38, %v2628_v32  ;;  %2654 = vrot.lane.b32.xlu1 %v2628_v32, %s3636_s2  ;;  %v3355_v21 = vpack.c.bf16 %v2795_v26, %v2794_v18 }
0x2937   :  { %v4427_v33 = vmax.f32 %v2526_v0, %v2652_v28  ;;  %2658 = vrot.lane.b32.xlu0 %v2652_v28, %s3635_s0  ;;  %v3637_v0 = vmov 0.0|0.0  }
0x2938   :  { %3345 = vmatprep.subr.bf16.mxu1 %v3637_v0 }
0x2939   :  { %3347 = vmatpush3.bf16.msra.mxu1 %v3346_v1 }
0x293a   :  { %3348 = vmatprep.subr.bf16.mxu1 %v3637_v0 }
0x293d   :  { %3350 = vmatpush3.bf16.msra.mxu1 %v3349_v31 }
0x293e   :  { %3351 = vmatprep.subr.bf16.mxu1 %v3637_v0 }
0x29a8   :  { %v2655_v56 = vpop.permute.xlu1 %2654 }
0x29a9   :  { %v2659_v50 = vpop.permute.xlu0 %2658 }
0x29aa   :  { %v2661_v30 = vsel %vm361_vm1, %v2655_v56, %v2659_v50 }
0x29ab   :  { %3031 = vmatmul.mubr.msk.f32.vlgmr.msra.gmra.mrb[42].mxu0 %vm226_vm2, %v2661_v30 }
0x2a7e   :  { %v2733_v34 = vpop.f32.mrb[42].mxu0 }
0x2a7f   :  { %v2739_v19 = vadd.f32 %v2733_v34, %v4267_v55  ;;  %v2735_v48 = vpop.f32.mrb[43].mxu0 }
0x2a80   :  { %v2741_v42 = vadd.f32 %v2735_v48, %v4242_v20 }
0x2a81   :  { %3618 = vtanh.f32 %v2739_v19  ;;  %v3032_v39 = vmul.f32 -1.442695, %v2739_v19 }
0x2a82   :  { %3620 = vtanh.f32 %v2741_v42  ;;  %v3033_v43 = vmul.f32 -1.442695, %v2741_v42 }
0x2a83   :  { %3622 = vpow2.f32 %v3032_v39 }
0x2a84   :  { %3624 = vpow2.f32 %v3033_v43 }
0x2a8b   :  { %v3619_v16 = vpop.eup %3618 }
0x2a8c   :  { %v3621_v47 = vpop.eup %3620  ;;  %2751 = vrot.lane.b32.xlu0 %v3619_v16, %s3635_s0 }
0x2a8d   :  { %2775 = vrot.lane.b32.xlu1 %v3621_v47, %s3635_s0  ;;  %v3623_v2 = vpop.eup %3622 }
0x2a8e   :  { %v3625_v49 = vpop.eup %3624  ;;  %v2745_v53 = vadd.f32 1.0, %v3623_v2 }
0x2a8f   :  { %v2769_v57 = vadd.f32 1.0, %v3625_v49 }
0x2a90   :  { %3626 = vrcp.f32 %v2745_v53 }
0x2a91   :  { %3628 = vrcp.f32 %v2769_v57 }
0x2a9a   :  { %v3627_v55 = vpop.eup %3626 }
0x2a9b   :  { %v3629_v58 = vpop.eup %3628  ;;  %v2749_v60 = vmul.f32 %v3627_v55, %v2622_v22 }
0x2a9c   :  { %v2773_v59 = vmul.f32 %v3629_v58, %v2646_v24 }
0x2afe   :  { %v2752_v20 = vpop.permute.xlu0 %2751 }
0x2aff   :  { %v2754_v29 = vmul.f32 %v3627_v55, %v2752_v20  ;;  %v2776_v46 = vpop.permute.xlu1 %2775 }
0x2b00   :  { %v2778_v8 = vmul.f32 %v3629_v58, %v2776_v46 }
0x2b01   :  { %2756 = vrot.lane.b32.xlu0 %v2754_v29, %s3636_s2 }
0x2b02   :  { %2780 = vrot.lane.b32.xlu1 %v2778_v8, %s3636_s2 }
0x2b73   :  { %v2757_v62 = vpop.permute.xlu0 %2756 }
0x2b74   :  { %v2759_v5 = vadd.f32 %v2757_v62, %v2749_v60  ;;  %v2781_v9 = vpop.permute.xlu1 %2780 }
0x2b75   :  { %v2783_v38 = vadd.f32 %v2781_v9, %v2773_v59 }
0x2b76   :  { %3630 = vtanh.f32 %v2759_v5 }
0x2b77   :  { %3632 = vtanh.f32 %v2783_v38 }
0x2b80   :  { %v3631_v4 = vpop.eup %3630 }
0x2b81   :  { %v3633_v17 = vpop.eup %3632  ;;  %2762 = vrot.lane.b32.xlu0 %v3631_v4, %s3635_s0 }
0x2b82   :  { %2786 = vrot.lane.b32.xlu1 %v3633_v17, %s3635_s0 }
0x2bf3   :  { %v2763_v51 = vpop.permute.xlu0 %2762 }
0x2bf4   :  { %v2765_v6 = vmul.f32 %v3627_v55, %v2763_v51  ;;  %v2787_v11 = vpop.permute.xlu1 %2786 }
0x2bf5   :  { %v2789_v14 = vmul.f32 %v3629_v58, %v2787_v11 }
0x2bf6   :  { %v2790_v15 = vmax.f32 %v4424_v25, %v2765_v6 }
0x2bf7   :  { %v2791_v54 = vmax.f32 %v4427_v33, %v2789_v14 }
0x2bf8   :  { %2876 = vrot.lane.b32.xlu0 %v2790_v15, %s3636_s2 }
0x2bf9   :  { %2801 = vrot.lane.b32.xlu1 %v2791_v54, %s3636_s2 }
0x2c6a   :  { %v2877_v41 = vpop.permute.xlu0 %2876 }
0x2c6b   :  { %v2802_v12 = vpop.permute.xlu1 %2801 }
0x2c6c   :  { %3056 = vmatmul.mubr.msk.f32.vlgmr.msra.gmra.mrb[20].mxu1 %vm361_vm1, %v2802_v12 }
0x2c6d   :  { %3353 = vmatpush3.bf16.msra.mxu1 %v3352_v7  ;;  %3066 = vmatprep.mubr.msk.f32.mxu1 %vm3638_vm3, %v3634_v3 }
0x2c6e   :  { %3354 = vmatprep.subr.bf16.mxu1 %v3637_v0 }
0x2c71   :  { %3356 = vmatpush3.bf16.msra.mxu1 %v3355_v21 }
0x2c74   :  { %3067 = vmatmul.mubr.msk.f32.vlgmr.msra.gmra.mrb[22].mxu1 %vm361_vm1, %v2877_v41 }
0x2d3f   :  { %v2871_v37 = vpop.f32.mrb[20].mxu1 }
0x2d40   :  { %v3057_v45 = vpop.f32.mrb[21].mxu1 }
0x2d47   :  { %v2946_v22 = vpop.f32.mrb[22].mxu1 }
0x2d48   :  { %v2947_v24 = vadd.f32 %v2946_v22, %v2871_v37  ;;  %v3068_v44 = vpop.f32.mrb[23].mxu1 }
0x2d4a   :  { %v2957_v40 = vadd.f32 %v3036_v23, %v2947_v24 }
0x2d4c   :  { %2959 = vst.msk [vmem:[%s4489_s9] sm:$0xff] %vm2958_vm4, %v2957_v40 }

</bundles_post_ra>
